<compile_context>
chip_gen: v7x
topology: tpu7x:2x2x1
jax: 0.10.0
libtpu: 0.0.40
codegen_flags: <defaults>
</compile_context>

<pallas_src>
import jax
import jax.numpy as jnp
import numpy as np
from jax import lax
from jax.experimental import pallas as pl
from jax.experimental.pallas import tpu as pltpu

EPS = 1e-5
MXU_DTYPE = jnp.bfloat16            # MXU operand / intermediate-activation dtype
VMEM_LIMIT = 32 * 1024 * 1024       # explicit scoped-VMEM budget (safe on v5e/v6e/v7x)


# ----------------------------------------------------------------------------
# in-kernel 3x3 conv helper: im2col (taps folded into K) + one MXU matmul
# ----------------------------------------------------------------------------
def _conv3x3_im2col(x2d, w_ref, H, W):
    """3x3 / stride-1 / pad-1 conv of one image.

    x2d:   (H*W, Cin) activation rows in row-major (y, x) order, MXU dtype.
    w_ref: Ref of shape (9*Cin, Cout), tap-major packing ((ky*3+kx)*Cin + ci).
    Returns (H*W, Cout) float32 accumulator.

    Zero padding is handled without any padded scratch buffer: W+1 zero rows on
    top/bottom of the flattened tile cover the dy = +/-1 taps, and the dx = +/-1
    taps mask the first/last image column where the flat shift would wrap.
    """
    M, C = x2d.shape
    P = W + 1
    zrows = jnp.zeros((P, C), x2d.dtype)
    xp = jnp.concatenate([zrows, x2d, zrows], axis=0)          # (M + 2P, C)

    col = lax.broadcasted_iota(jnp.int32, (M, 1), 0) % W       # x coordinate
    ok_left = col >= 1                                         # tap dx = -1
    ok_right = col <= W - 2                                    # tap dx = +1

    taps = []
    for dy in (-1, 0, 1):
        for dx in (-1, 0, 1):
            off = dy * W + dx
            t = xp[P + off:P + off + M, :]
            if dx == -1:
                t = jnp.where(ok_left, t, jnp.zeros_like(t))
            elif dx == 1:
                t = jnp.where(ok_right, t, jnp.zeros_like(t))
            taps.append(t)
    patch = jnp.concatenate(taps, axis=-1)                     # (M, 9*Cin)
    return jnp.dot(patch, w_ref[...], preferred_element_type=jnp.float32)


def _write_stats(stats_ref, acc_f32):
    """Per-tile BatchNorm partial statistics: [sum; sum of squares] per channel."""
    s = jnp.sum(acc_f32, axis=0, keepdims=True)                # (1, C)
    ss = jnp.sum(acc_f32 * acc_f32, axis=0, keepdims=True)     # (1, C)
    stats_ref[...] = jnp.concatenate([s, ss], axis=0).reshape(stats_ref.shape)


# ----------------------------------------------------------------------------
# kernels (grid = (N,), one image per grid step)
# ----------------------------------------------------------------------------
def conv1_stats_kernel(x_ref, w_ref, y_ref, stats_ref):
    _, H, W, Cin = x_ref.shape
    M = H * W
    acc = _conv3x3_im2col(x_ref[...].reshape(M, Cin), w_ref, H, W)   # f32
    _write_stats(stats_ref, acc)
    y_ref[...] = acc.reshape(y_ref.shape).astype(y_ref.dtype)


def bn_relu_conv2_stats_kernel(y1_ref, scale_ref, shift_ref, w_ref,
                               y2_ref, stats_ref):
    _, H, W, C = y1_ref.shape
    M = H * W
    y1 = y1_ref[...].reshape(M, C).astype(jnp.float32)
    h = jnp.maximum(y1 * scale_ref[...] + shift_ref[...], 0.0)       # bn1 + relu (f32)
    acc = _conv3x3_im2col(h.astype(MXU_DTYPE), w_ref, H, W)          # conv2 (f32 acc)
    _write_stats(stats_ref, acc)
    y2_ref[...] = acc.reshape(y2_ref.shape).astype(y2_ref.dtype)


def bn_add_relu_kernel(y2_ref, x_ref, scale_ref, shift_ref, out_ref):
    _, H, W, C = y2_ref.shape
    M = H * W
    y2 = y2_ref[...].reshape(M, C).astype(jnp.float32)
    ident = x_ref[...].reshape(M, C).astype(jnp.float32)
    out = jnp.maximum(y2 * scale_ref[...] + shift_ref[...] + ident, 0.0)
    out_ref[...] = out.reshape(out_ref.shape).astype(out_ref.dtype)


# ----------------------------------------------------------------------------
# wrapper
# ----------------------------------------------------------------------------
def _img_spec(H, W, C):
    return pl.BlockSpec((1, H, W, C), lambda n: (n, 0, 0, 0))


def _const_spec(shape):
    nd = len(shape)
    return pl.BlockSpec(shape, lambda n: (0,) * nd)     # resident across grid steps


def _stats_spec(C):
    return pl.BlockSpec((1, 2, C), lambda n: (n, 0, 0))


def _fold_bn(stats, gamma, beta, count):
    """Reduce per-tile partial stats and fold BN into per-channel scale/shift."""
    total = jnp.sum(stats.astype(jnp.float32), axis=0)            # (2, C)
    mean = total[0] / count
    var = jnp.maximum(total[1] / count - mean * mean, 0.0)        # biased variance
    scale = gamma.astype(jnp.float32) * lax.rsqrt(var + EPS)
    shift = beta.astype(jnp.float32) - mean * scale
    return scale.reshape(1, -1), shift.reshape(1, -1)


@jax.jit
def basic_block(x_nchw, w1, g1, b1, w2, g2, b2):
    """x_nchw: (N, Cin, H, W); w*: (Cout, Cin, 3, 3); g*, b*: (Cout,)."""
    x = jnp.transpose(x_nchw, (0, 2, 3, 1))                       # NHWC (C on lanes)
    N, H, W, Cin = x.shape
    Cout = w1.shape[0]
    assert Cin == Cout, "stride=1 / downsample=None requires in == out channels"

    x_mxu = x.astype(MXU_DTYPE)
    # (Cout, Cin, 3, 3) -> (3, 3, Cin, Cout) -> (9*Cin, Cout): taps folded into K.
    w1r = jnp.transpose(w1, (2, 3, 1, 0)).reshape(9 * Cin, Cout).astype(MXU_DTYPE)
    w2r = jnp.transpose(w2, (2, 3, 1, 0)).reshape(9 * Cout, Cout).astype(MXU_DTYPE)

    cparams = pltpu.CompilerParams(
        dimension_semantics=("parallel",),        # tiles independent -> 2 TCs on v7x
        vmem_limit_bytes=VMEM_LIMIT)

    # ---- pass 1: conv1 + BN1 partial stats ---------------------------------
    y1, stats1 = pl.pallas_call(
        conv1_stats_kernel,
        out_shape=(jax.ShapeDtypeStruct((N, H, W, Cout), MXU_DTYPE),
                   jax.ShapeDtypeStruct((N, 2, Cout), jnp.float32)),
        grid_spec=pltpu.PrefetchScalarGridSpec(
            num_scalar_prefetch=0, grid=(N,),
            in_specs=[_img_spec(H, W, Cin), _const_spec((9 * Cin, Cout))],
            out_specs=(_img_spec(H, W, Cout), _stats_spec(Cout))),
        compiler_params=cparams,
    )(x_mxu, w1r)

    scale1, shift1 = _fold_bn(stats1, g1, b1, N * H * W)

    # ---- pass 2: bn1 + relu + conv2 + BN2 partial stats ---------------------
    y2, stats2 = pl.pallas_call(
        bn_relu_conv2_stats_kernel,
        out_shape=(jax.ShapeDtypeStruct((N, H, W, Cout), MXU_DTYPE),
                   jax.ShapeDtypeStruct((N, 2, Cout), jnp.float32)),
        grid_spec=pltpu.PrefetchScalarGridSpec(
            num_scalar_prefetch=0, grid=(N,),
            in_specs=[_img_spec(H, W, Cout),
                      _const_spec((1, Cout)), _const_spec((1, Cout)),
                      _const_spec((9 * Cout, Cout))],
            out_specs=(_img_spec(H, W, Cout), _stats_spec(Cout))),
        compiler_params=cparams,
    )(y1, scale1, shift1, w2r)

    scale2, shift2 = _fold_bn(stats2, g2, b2, N * H * W)

    # ---- pass 3: bn2 + residual add + relu ----------------------------------
    out_nhwc = pl.pallas_call(
        bn_add_relu_kernel,
        out_shape=jax.ShapeDtypeStruct((N, H, W, Cout), jnp.float32),
        grid_spec=pltpu.PrefetchScalarGridSpec(
            num_scalar_prefetch=0, grid=(N,),
            in_specs=[_img_spec(H, W, Cout), _img_spec(H, W, Cin),
                      _const_spec((1, Cout)), _const_spec((1, Cout))],
            out_specs=_img_spec(H, W, Cout)),
        compiler_params=cparams,
    )(y2, x_mxu, scale2, shift2)

    return jnp.transpose(out_nhwc, (0, 3, 1, 2))                  # back to NCHW


# ----------------------------------------------------------------------------
# plain-JAX reference (mirrors the PyTorch forward in training mode)
# ----------------------------------------------------------------------------
def basic_block_ref(x_nchw, w1, g1, b1, w2, g2, b2):
    x = jnp.transpose(x_nchw, (0, 2, 3, 1)).astype(jnp.float32)

    def conv(inp, w):
        w_hwio = jnp.transpose(w, (2, 3, 1, 0)).astype(jnp.float32)
        return jax.lax.conv_general_dilated(
            inp, w_hwio, window_strides=(1, 1), padding="SAME",
            dimension_numbers=("NHWC", "HWIO", "NHWC"))

    def bn(y, g, b):
        m = jnp.mean(y, axis=(0, 1, 2), keepdims=True)
        v = jnp.mean((y - m) ** 2, axis=(0, 1, 2), keepdims=True)
        return (y - m) * jax.lax.rsqrt(v + EPS) * g + b

    h = jnp.maximum(bn(conv(x, w1), g1, b1), 0.0)
    h2 = bn(conv(h, w2), g2, b2)
    out = jnp.maximum(h2 + x, 0.0)
    return jnp.transpose(out, (0, 3, 1, 2))


if __name__ == "__main__":
    key = jax.random.PRNGKey(0)
    k_x, k_w1, k_w2 = jax.random.split(key, 3)

    N, C, H, W = 2, 4, 16, 16          # in_channels == out_channels, stride=1
    x = jax.random.normal(k_x, (N, C, H, W), jnp.float32)
    w1 = jax.random.normal(k_w1, (C, C, 3, 3), jnp.float32) * 0.1
    w2 = jax.random.normal(k_w2, (C, C, 3, 3), jnp.float32) * 0.1
    # BatchNorm2d default init: weight (gamma) = 1, bias (beta) = 0
    g1 = jnp.ones((C,), jnp.float32)
    b1 = jnp.zeros((C,), jnp.float32)
    g2 = jnp.ones((C,), jnp.float32)
    b2 = jnp.zeros((C,), jnp.float32)

    out = jax.block_until_ready(basic_block(x, w1, g1, b1, w2, g2, b2))
    ref = jax.block_until_ready(basic_block_ref(x, w1, g1, b1, w2, g2, b2))

    # bf16 MXU operands + bf16 intermediate activations -> relaxed tolerance.
    np.testing.assert_allclose(np.asarray(out), np.asarray(ref),
                               rtol=2e-2, atol=2e-2)
    print("KERNEL_OK")
</pallas_src>

<mosaic_0001>
module attributes {stable_mosaic.version = 11 : i64} {
  func.func @bn_add_relu_kernel(%arg0: i32, %arg1: memref<1x16x16x4xbf16, #tpu.memory_space<vmem>>, %arg2: memref<1x16x16x4xbf16, #tpu.memory_space<vmem>>, %arg3: memref<1x4xf32, #tpu.memory_space<vmem>>, %arg4: memref<1x4xf32, #tpu.memory_space<vmem>>, %arg5: memref<1x16x16x4xf32, #tpu.memory_space<vmem>>) attributes {dimension_semantics = [#tpu.dimension_semantics<parallel>], iteration_bounds = array<i64: 2>, scalar_prefetch = 0 : i64, scratch_operands = 0 : i64, tpu.core_type = #tpu.core_type<tc>, window_params = [{transform_indices = @transform_0, window_bounds = array<i64: 1, 16, 16, 4>}, {transform_indices = @transform_1, window_bounds = array<i64: 1, 16, 16, 4>}, {pipeline_mode = #tpu.pipeline_mode<synchronous>, transform_indices = @transform_2, window_bounds = array<i64: 1, 4>}, {pipeline_mode = #tpu.pipeline_mode<synchronous>, transform_indices = @transform_3, window_bounds = array<i64: 1, 4>}, {transform_indices = @transform_4, window_bounds = array<i64: 1, 16, 16, 4>}]} {
    %c0 = arith.constant 0 : index
    %c0_0 = arith.constant 0 : index
    %c0_1 = arith.constant 0 : index
    %c0_2 = arith.constant 0 : index
    %0 = vector.load %arg1[%c0, %c0_0, %c0_1, %c0_2] : memref<1x16x16x4xbf16, #tpu.memory_space<vmem>>, vector<1x16x16x4xbf16>
    %1 = vector.shape_cast %0 : vector<1x16x16x4xbf16> to vector<256x4xbf16>
    %2 = arith.extf %1 : vector<256x4xbf16> to vector<256x4xf32>
    %c0_3 = arith.constant 0 : index
    %c0_4 = arith.constant 0 : index
    %c0_5 = arith.constant 0 : index
    %c0_6 = arith.constant 0 : index
    %3 = vector.load %arg2[%c0_3, %c0_4, %c0_5, %c0_6] : memref<1x16x16x4xbf16, #tpu.memory_space<vmem>>, vector<1x16x16x4xbf16>
    %4 = vector.shape_cast %3 : vector<1x16x16x4xbf16> to vector<256x4xbf16>
    %5 = arith.extf %4 : vector<256x4xbf16> to vector<256x4xf32>
    %c0_7 = arith.constant 0 : index
    %c0_8 = arith.constant 0 : index
    %6 = vector.load %arg3[%c0_7, %c0_8] : memref<1x4xf32, #tpu.memory_space<vmem>>, vector<1x4xf32>
    %7 = vector.broadcast %6 : vector<1x4xf32> to vector<256x4xf32>
    %8 = arith.mulf %2, %7 : vector<256x4xf32>
    %c0_9 = arith.constant 0 : index
    %c0_10 = arith.constant 0 : index
    %9 = vector.load %arg4[%c0_9, %c0_10] : memref<1x4xf32, #tpu.memory_space<vmem>>, vector<1x4xf32>
    %10 = vector.broadcast %9 : vector<1x4xf32> to vector<256x4xf32>
    %11 = arith.addf %8, %10 : vector<256x4xf32>
    %12 = arith.addf %11, %5 : vector<256x4xf32>
    %cst = arith.constant 0.000000e+00 : f32
    %13 = vector.broadcast %cst : f32 to vector<256x4xf32>
    %14 = arith.maximumf %12, %13 : vector<256x4xf32>
    %15 = vector.shape_cast %14 : vector<256x4xf32> to vector<1x16x16x4xf32>
    %c0_11 = arith.constant 0 : index
    %c0_12 = arith.constant 0 : index
    %c0_13 = arith.constant 0 : index
    %c0_14 = arith.constant 0 : index
    %16 = vector.load %arg5[%c0_11, %c0_12, %c0_13, %c0_14] : memref<1x16x16x4xf32, #tpu.memory_space<vmem>>, vector<1x16x16x4xf32>
    tpu.vector_store %arg5[%c0_11, %c0_12, %c0_13, %c0_14], %15 {strides = array<i32>} : memref<1x16x16x4xf32, #tpu.memory_space<vmem>>, vector<1x16x16x4xf32>,
    return
  }
  func.func @transform_0(%arg0: i32) -> (i32, i32, i32, i32) {
    %c0_i32 = arith.constant 0 : i32
    %c0_i32_0 = arith.constant 0 : i32
    %c0_i32_1 = arith.constant 0 : i32
    %c0_i32_2 = arith.constant 0 : i32
    return %arg0, %c0_i32, %c0_i32_0, %c0_i32_1 : i32, i32, i32, i32
  }
  func.func @transform_1(%arg0: i32) -> (i32, i32, i32, i32) {
    %c0_i32 = arith.constant 0 : i32
    %c0_i32_0 = arith.constant 0 : i32
    %c0_i32_1 = arith.constant 0 : i32
    %c0_i32_2 = arith.constant 0 : i32
    return %arg0, %c0_i32, %c0_i32_0, %c0_i32_1 : i32, i32, i32, i32
  }
  func.func @transform_2(%arg0: i32) -> (i32, i32) {
    %c0_i32 = arith.constant 0 : i32
    %c0_i32_0 = arith.constant 0 : i32
    %c0_i32_1 = arith.constant 0 : i32
    return %c0_i32, %c0_i32_0 : i32, i32
  }
  func.func @transform_3(%arg0: i32) -> (i32, i32) {
    %c0_i32 = arith.constant 0 : i32
    %c0_i32_0 = arith.constant 0 : i32
    %c0_i32_1 = arith.constant 0 : i32
    return %c0_i32, %c0_i32_0 : i32, i32
  }
  func.func @transform_4(%arg0: i32) -> (i32, i32, i32, i32) {
    %c0_i32 = arith.constant 0 : i32
    %c0_i32_0 = arith.constant 0 : i32
    %c0_i32_1 = arith.constant 0 : i32
    %c0_i32_2 = arith.constant 0 : i32
    return %arg0, %c0_i32, %c0_i32_0, %c0_i32_1 : i32, i32, i32, i32
  }
}

module attributes {stable_mosaic.version = 11 : i64} {
  func.func @conv1_stats_kernel(%arg0: i32, %arg1: memref<1x16x16x4xbf16, #tpu.memory_space<vmem>>, %arg2: memref<36x4xbf16, #tpu.memory_space<vmem>>, %arg3: memref<1x16x16x4xbf16, #tpu.memory_space<vmem>>, %arg4: memref<1x2x4xf32, #tpu.memory_space<vmem>>) attributes {dimension_semantics = [#tpu.dimension_semantics<parallel>], iteration_bounds = array<i64: 2>, scalar_prefetch = 0 : i64, scratch_operands = 0 : i64, tpu.core_type = #tpu.core_type<tc>, window_params = [{transform_indices = @transform_0, window_bounds = array<i64: 1, 16, 16, 4>}, {pipeline_mode = #tpu.pipeline_mode<synchronous>, transform_indices = @transform_1, window_bounds = array<i64: 36, 4>}, {transform_indices = @transform_2, window_bounds = array<i64: 1, 16, 16, 4>}, {transform_indices = @transform_3, window_bounds = array<i64: 1, 2, 4>}]} {
    %c0 = arith.constant 0 : index
    %c0_0 = arith.constant 0 : index
    %c0_1 = arith.constant 0 : index
    %c0_2 = arith.constant 0 : index
    %0 = vector.load %arg1[%c0, %c0_0, %c0_1, %c0_2] : memref<1x16x16x4xbf16, #tpu.memory_space<vmem>>, vector<1x16x16x4xbf16>
    %1 = vector.shape_cast %0 : vector<1x16x16x4xbf16> to vector<256x4xbf16>
    %cst = arith.constant 0.000000e+00 : bf16
    %2 = vector.broadcast %cst : bf16 to vector<17x4xbf16>
    %3 = tpu.concatenate %2, %1, %2 in 0 : vector<17x4xbf16>, vector<256x4xbf16>, vector<17x4xbf16> -> vector<290x4xbf16>
    %4 = tpu.iota {dimensions = array<i32: 0>} : vector<256x1xi32>
    %c16_i32 = arith.constant 16 : i32
    %c0_i32 = arith.constant 0 : i32
    %5 = arith.cmpi eq, %c16_i32, %c0_i32 : i32
    %c1_i32 = arith.constant 1 : i32
    %6 = arith.select %5, %c1_i32, %c16_i32 : i32
    %7 = vector.broadcast %6 : i32 to vector<256x1xi32>
    %8 = arith.remsi %4, %7 : vector<256x1xi32>
    %c0_i32_3 = arith.constant 0 : i32
    %9 = vector.broadcast %c0_i32_3 : i32 to vector<256x1xi32>
    %10 = arith.cmpi ne, %8, %9 : vector<256x1xi32>
    %c0_i32_4 = arith.constant 0 : i32
    %11 = vector.broadcast %c0_i32_4 : i32 to vector<256x1xi32>
    %12 = arith.cmpi slt, %8, %11 : vector<256x1xi32>
    %c0_i32_5 = arith.constant 0 : i32
    %13 = arith.cmpi slt, %6, %c0_i32_5 : i32
    %14 = vector.broadcast %13 : i1 to vector<256x1xi1>
    %15 = vector.broadcast %14 : vector<256x1xi1> to vector<256x1xi1>
    %16 = arith.xori %12, %15 : vector<256x1xi1>
    %17 = arith.andi %16, %10 : vector<256x1xi1>
    %18 = vector.broadcast %6 : i32 to vector<256x1xi32>
    %19 = arith.addi %8, %18 : vector<256x1xi32>
    %20 = arith.select %17, %19, %8 : vector<256x1xi1>, vector<256x1xi32>
    %c1_i32_6 = arith.constant 1 : i32
    %21 = vector.broadcast %c1_i32_6 : i32 to vector<256x1xi32>
    %22 = arith.cmpi sge, %20, %21 : vector<256x1xi32>
    %c14_i32 = arith.constant 14 : i32
    %23 = vector.broadcast %c14_i32 : i32 to vector<256x1xi32>
    %24 = arith.cmpi sle, %20, %23 : vector<256x1xi32>
    %25 = vector.extract_strided_slice %3 {offsets = [0, 0], sizes = [256, 4], strides = [1, 1]} : vector<290x4xbf16> to vector<256x4xbf16>
    %cst_7 = arith.constant 0.000000e+00 : bf16
    %26 = vector.broadcast %cst_7 : bf16 to vector<256x4xbf16>
    %27 = vector.shape_cast %22 : vector<256x1xi1> to vector<256x1xi1>
    %28 = vector.broadcast %27 : vector<256x1xi1> to vector<256x4xi1>
    %29 = arith.select %28, %25, %26 : vector<256x4xi1>, vector<256x4xbf16>
    %30 = vector.extract_strided_slice %3 {offsets = [1, 0], sizes = [256, 4], strides = [1, 1]} : vector<290x4xbf16> to vector<256x4xbf16>
    %31 = vector.extract_strided_slice %3 {offsets = [2, 0], sizes = [256, 4], strides = [1, 1]} : vector<290x4xbf16> to vector<256x4xbf16>
    %cst_8 = arith.constant 0.000000e+00 : bf16
    %32 = vector.broadcast %cst_8 : bf16 to vector<256x4xbf16>
    %33 = vector.shape_cast %24 : vector<256x1xi1> to vector<256x1xi1>
    %34 = vector.broadcast %33 : vector<256x1xi1> to vector<256x4xi1>
    %35 = arith.select %34, %31, %32 : vector<256x4xi1>, vector<256x4xbf16>
    %36 = vector.extract_strided_slice %3 {offsets = [16, 0], sizes = [256, 4], strides = [1, 1]} : vector<290x4xbf16> to vector<256x4xbf16>
    %cst_9 = arith.constant 0.000000e+00 : bf16
    %37 = vector.broadcast %cst_9 : bf16 to vector<256x4xbf16>
    %38 = vector.shape_cast %22 : vector<256x1xi1> to vector<256x1xi1>
    %39 = vector.broadcast %38 : vector<256x1xi1> to vector<256x4xi1>
    %40 = arith.select %39, %36, %37 : vector<256x4xi1>, vector<256x4xbf16>
    %41 = vector.extract_strided_slice %3 {offsets = [17, 0], sizes = [256, 4], strides = [1, 1]} : vector<290x4xbf16> to vector<256x4xbf16>
    %42 = vector.extract_strided_slice %3 {offsets = [18, 0], sizes = [256, 4], strides = [1, 1]} : vector<290x4xbf16> to vector<256x4xbf16>
    %cst_10 = arith.constant 0.000000e+00 : bf16
    %43 = vector.broadcast %cst_10 : bf16 to vector<256x4xbf16>
    %44 = vector.shape_cast %24 : vector<256x1xi1> to vector<256x1xi1>
    %45 = vector.broadcast %44 : vector<256x1xi1> to vector<256x4xi1>
    %46 = arith.select %45, %42, %43 : vector<256x4xi1>, vector<256x4xbf16>
    %47 = vector.extract_strided_slice %3 {offsets = [32, 0], sizes = [256, 4], strides = [1, 1]} : vector<290x4xbf16> to vector<256x4xbf16>
    %cst_11 = arith.constant 0.000000e+00 : bf16
    %48 = vector.broadcast %cst_11 : bf16 to vector<256x4xbf16>
    %49 = vector.shape_cast %22 : vector<256x1xi1> to vector<256x1xi1>
    %50 = vector.broadcast %49 : vector<256x1xi1> to vector<256x4xi1>
    %51 = arith.select %50, %47, %48 : vector<256x4xi1>, vector<256x4xbf16>
    %52 = vector.extract_strided_slice %3 {offsets = [33, 0], sizes = [256, 4], strides = [1, 1]} : vector<290x4xbf16> to vector<256x4xbf16>
    %53 = vector.extract_strided_slice %3 {offsets = [34, 0], sizes = [256, 4], strides = [1, 1]} : vector<290x4xbf16> to vector<256x4xbf16>
    %cst_12 = arith.constant 0.000000e+00 : bf16
    %54 = vector.broadcast %cst_12 : bf16 to vector<256x4xbf16>
    %55 = vector.shape_cast %24 : vector<256x1xi1> to vector<256x1xi1>
    %56 = vector.broadcast %55 : vector<256x1xi1> to vector<256x4xi1>
    %57 = arith.select %56, %53, %54 : vector<256x4xi1>, vector<256x4xbf16>
    %58 = tpu.concatenate %29, %30, %35, %40, %41, %46, %51, %52, %57 in 1 : vector<256x4xbf16>, vector<256x4xbf16>, vector<256x4xbf16>, vector<256x4xbf16>, vector<256x4xbf16>, vector<256x4xbf16>, vector<256x4xbf16>, vector<256x4xbf16>, vector<256x4xbf16> -> vector<256x36xbf16>
    %c0_13 = arith.constant 0 : index
    %c0_14 = arith.constant 0 : index
    %59 = vector.load %arg2[%c0_13, %c0_14] : memref<36x4xbf16, #tpu.memory_space<vmem>>, vector<36x4xbf16>
    %cst_15 = arith.constant dense<0.000000e+00> : vector<256x4xf32>
    %60 = tpu.matmul %58, %59, %cst_15 {dimension_numbers = #tpu.dot_dimension_numbers<[1], [0], [0], [1], [0, 0, 1, 1], [], []>} : vector<256x36xbf16>, vector<36x4xbf16>, vector<256x4xf32> -> vector<256x4xf32>
    %cst_16 = arith.constant dense<0.000000e+00> : vector<4xf32>
    %61 = vector.multi_reduction <add>, %60, %cst_16 [0] : vector<256x4xf32> to vector<4xf32>
    %62 = vector.shape_cast %61 : vector<4xf32> to vector<1x4xf32>
    %63 = arith.mulf %60, %60 : vector<256x4xf32>
    %cst_17 = arith.constant dense<0.000000e+00> : vector<4xf32>
    %64 = vector.multi_reduction <add>, %63, %cst_17 [0] : vector<256x4xf32> to vector<4xf32>
    %65 = vector.shape_cast %64 : vector<4xf32> to vector<1x4xf32>
    %66 = tpu.concatenate %62, %65 in 0 : vector<1x4xf32>, vector<1x4xf32> -> vector<2x4xf32>
    %67 = vector.shape_cast %66 : vector<2x4xf32> to vector<1x2x4xf32>
    %c0_18 = arith.constant 0 : index
    %c0_19 = arith.constant 0 : index
    %c0_20 = arith.constant 0 : index
    %68 = vector.load %arg4[%c0_18, %c0_19, %c0_20] : memref<1x2x4xf32, #tpu.memory_space<vmem>>, vector<1x2x4xf32>
    tpu.vector_store %arg4[%c0_18, %c0_19, %c0_20], %67 {strides = array<i32>} : memref<1x2x4xf32, #tpu.memory_space<vmem>>, vector<1x2x4xf32>,
    %69 = vector.shape_cast %60 : vector<256x4xf32> to vector<1x16x16x4xf32>
    %70 = arith.truncf %69 : vector<1x16x16x4xf32> to vector<1x16x16x4xbf16>
    %c0_21 = arith.constant 0 : index
    %c0_22 = arith.constant 0 : index
    %c0_23 = arith.constant 0 : index
    %c0_24 = arith.constant 0 : index
    %71 = vector.load %arg3[%c0_21, %c0_22, %c0_23, %c0_24] : memref<1x16x16x4xbf16, #tpu.memory_space<vmem>>, vector<1x16x16x4xbf16>
    tpu.vector_store %arg3[%c0_21, %c0_22, %c0_23, %c0_24], %70 {strides = array<i32>} : memref<1x16x16x4xbf16, #tpu.memory_space<vmem>>, vector<1x16x16x4xbf16>,
    return
  }
  func.func @transform_0(%arg0: i32) -> (i32, i32, i32, i32) {
    %c0_i32 = arith.constant 0 : i32
    %c0_i32_0 = arith.constant 0 : i32
    %c0_i32_1 = arith.constant 0 : i32
    %c0_i32_2 = arith.constant 0 : i32
    return %arg0, %c0_i32, %c0_i32_0, %c0_i32_1 : i32, i32, i32, i32
  }
  func.func @transform_1(%arg0: i32) -> (i32, i32) {
    %c0_i32 = arith.constant 0 : i32
    %c0_i32_0 = arith.constant 0 : i32
    %c0_i32_1 = arith.constant 0 : i32
    return %c0_i32, %c0_i32_0 : i32, i32
  }
  func.func @transform_2(%arg0: i32) -> (i32, i32, i32, i32) {
    %c0_i32 = arith.constant 0 : i32
    %c0_i32_0 = arith.constant 0 : i32
    %c0_i32_1 = arith.constant 0 : i32
    %c0_i32_2 = arith.constant 0 : i32
    return %arg0, %c0_i32, %c0_i32_0, %c0_i32_1 : i32, i32, i32, i32
  }
  func.func @transform_3(%arg0: i32) -> (i32, i32, i32) {
    %c0_i32 = arith.constant 0 : i32
    %c0_i32_0 = arith.constant 0 : i32
    %c0_i32_1 = arith.constant 0 : i32
    return %arg0, %c0_i32, %c0_i32_0 : i32, i32, i32
  }
}

module attributes {stable_mosaic.version = 11 : i64} {
  func.func @bn_relu_conv2_stats_kernel(%arg0: i32, %arg1: memref<1x16x16x4xbf16, #tpu.memory_space<vmem>>, %arg2: memref<1x4xf32, #tpu.memory_space<vmem>>, %arg3: memref<1x4xf32, #tpu.memory_space<vmem>>, %arg4: memref<36x4xbf16, #tpu.memory_space<vmem>>, %arg5: memref<1x16x16x4xbf16, #tpu.memory_space<vmem>>, %arg6: memref<1x2x4xf32, #tpu.memory_space<vmem>>) attributes {dimension_semantics = [#tpu.dimension_semantics<parallel>], iteration_bounds = array<i64: 2>, scalar_prefetch = 0 : i64, scratch_operands = 0 : i64, tpu.core_type = #tpu.core_type<tc>, window_params = [{transform_indices = @transform_0, window_bounds = array<i64: 1, 16, 16, 4>}, {pipeline_mode = #tpu.pipeline_mode<synchronous>, transform_indices = @transform_1, window_bounds = array<i64: 1, 4>}, {pipeline_mode = #tpu.pipeline_mode<synchronous>, transform_indices = @transform_2, window_bounds = array<i64: 1, 4>}, {pipeline_mode = #tpu.pipeline_mode<synchronous>, transform_indices = @transform_3, window_bounds = array<i64: 36, 4>}, {transform_indices = @transform_4, window_bounds = array<i64: 1, 16, 16, 4>}, {transform_indices = @transform_5, window_bounds = array<i64: 1, 2, 4>}]} {
    %c0 = arith.constant 0 : index
    %c0_0 = arith.constant 0 : index
    %c0_1 = arith.constant 0 : index
    %c0_2 = arith.constant 0 : index
    %0 = vector.load %arg1[%c0, %c0_0, %c0_1, %c0_2] : memref<1x16x16x4xbf16, #tpu.memory_space<vmem>>, vector<1x16x16x4xbf16>
    %1 = vector.shape_cast %0 : vector<1x16x16x4xbf16> to vector<256x4xbf16>
    %2 = arith.extf %1 : vector<256x4xbf16> to vector<256x4xf32>
    %c0_3 = arith.constant 0 : index
    %c0_4 = arith.constant 0 : index
    %3 = vector.load %arg2[%c0_3, %c0_4] : memref<1x4xf32, #tpu.memory_space<vmem>>, vector<1x4xf32>
    %4 = vector.broadcast %3 : vector<1x4xf32> to vector<256x4xf32>
    %5 = arith.mulf %2, %4 : vector<256x4xf32>
    %c0_5 = arith.constant 0 : index
    %c0_6 = arith.constant 0 : index
    %6 = vector.load %arg3[%c0_5, %c0_6] : memref<1x4xf32, #tpu.memory_space<vmem>>, vector<1x4xf32>
    %7 = vector.broadcast %6 : vector<1x4xf32> to vector<256x4xf32>
    %8 = arith.addf %5, %7 : vector<256x4xf32>
    %cst = arith.constant 0.000000e+00 : f32
    %9 = vector.broadcast %cst : f32 to vector<256x4xf32>
    %10 = arith.maximumf %8, %9 : vector<256x4xf32>
    %11 = arith.truncf %10 : vector<256x4xf32> to vector<256x4xbf16>
    %cst_7 = arith.constant 0.000000e+00 : bf16
    %12 = vector.broadcast %cst_7 : bf16 to vector<17x4xbf16>
    %13 = tpu.concatenate %12, %11, %12 in 0 : vector<17x4xbf16>, vector<256x4xbf16>, vector<17x4xbf16> -> vector<290x4xbf16>
    %14 = tpu.iota {dimensions = array<i32: 0>} : vector<256x1xi32>
    %c16_i32 = arith.constant 16 : i32
    %c0_i32 = arith.constant 0 : i32
    %15 = arith.cmpi eq, %c16_i32, %c0_i32 : i32
    %c1_i32 = arith.constant 1 : i32
    %16 = arith.select %15, %c1_i32, %c16_i32 : i32
    %17 = vector.broadcast %16 : i32 to vector<256x1xi32>
    %18 = arith.remsi %14, %17 : vector<256x1xi32>
    %c0_i32_8 = arith.constant 0 : i32
    %19 = vector.broadcast %c0_i32_8 : i32 to vector<256x1xi32>
    %20 = arith.cmpi ne, %18, %19 : vector<256x1xi32>
    %c0_i32_9 = arith.constant 0 : i32
    %21 = vector.broadcast %c0_i32_9 : i32 to vector<256x1xi32>
    %22 = arith.cmpi slt, %18, %21 : vector<256x1xi32>
    %c0_i32_10 = arith.constant 0 : i32
    %23 = arith.cmpi slt, %16, %c0_i32_10 : i32
    %24 = vector.broadcast %23 : i1 to vector<256x1xi1>
    %25 = vector.broadcast %24 : vector<256x1xi1> to vector<256x1xi1>
    %26 = arith.xori %22, %25 : vector<256x1xi1>
    %27 = arith.andi %26, %20 : vector<256x1xi1>
    %28 = vector.broadcast %16 : i32 to vector<256x1xi32>
    %29 = arith.addi %18, %28 : vector<256x1xi32>
    %30 = arith.select %27, %29, %18 : vector<256x1xi1>, vector<256x1xi32>
    %c1_i32_11 = arith.constant 1 : i32
    %31 = vector.broadcast %c1_i32_11 : i32 to vector<256x1xi32>
    %32 = arith.cmpi sge, %30, %31 : vector<256x1xi32>
    %c14_i32 = arith.constant 14 : i32
    %33 = vector.broadcast %c14_i32 : i32 to vector<256x1xi32>
    %34 = arith.cmpi sle, %30, %33 : vector<256x1xi32>
    %35 = vector.extract_strided_slice %13 {offsets = [0, 0], sizes = [256, 4], strides = [1, 1]} : vector<290x4xbf16> to vector<256x4xbf16>
    %cst_12 = arith.constant 0.000000e+00 : bf16
    %36 = vector.broadcast %cst_12 : bf16 to vector<256x4xbf16>
    %37 = vector.shape_cast %32 : vector<256x1xi1> to vector<256x1xi1>
    %38 = vector.broadcast %37 : vector<256x1xi1> to vector<256x4xi1>
    %39 = arith.select %38, %35, %36 : vector<256x4xi1>, vector<256x4xbf16>
    %40 = vector.extract_strided_slice %13 {offsets = [1, 0], sizes = [256, 4], strides = [1, 1]} : vector<290x4xbf16> to vector<256x4xbf16>
    %41 = vector.extract_strided_slice %13 {offsets = [2, 0], sizes = [256, 4], strides = [1, 1]} : vector<290x4xbf16> to vector<256x4xbf16>
    %cst_13 = arith.constant 0.000000e+00 : bf16
    %42 = vector.broadcast %cst_13 : bf16 to vector<256x4xbf16>
    %43 = vector.shape_cast %34 : vector<256x1xi1> to vector<256x1xi1>
    %44 = vector.broadcast %43 : vector<256x1xi1> to vector<256x4xi1>
    %45 = arith.select %44, %41, %42 : vector<256x4xi1>, vector<256x4xbf16>
    %46 = vector.extract_strided_slice %13 {offsets = [16, 0], sizes = [256, 4], strides = [1, 1]} : vector<290x4xbf16> to vector<256x4xbf16>
    %cst_14 = arith.constant 0.000000e+00 : bf16
    %47 = vector.broadcast %cst_14 : bf16 to vector<256x4xbf16>
    %48 = vector.shape_cast %32 : vector<256x1xi1> to vector<256x1xi1>
    %49 = vector.broadcast %48 : vector<256x1xi1> to vector<256x4xi1>
    %50 = arith.select %49, %46, %47 : vector<256x4xi1>, vector<256x4xbf16>
    %51 = vector.extract_strided_slice %13 {offsets = [17, 0], sizes = [256, 4], strides = [1, 1]} : vector<290x4xbf16> to vector<256x4xbf16>
    %52 = vector.extract_strided_slice %13 {offsets = [18, 0], sizes = [256, 4], strides = [1, 1]} : vector<290x4xbf16> to vector<256x4xbf16>
    %cst_15 = arith.constant 0.000000e+00 : bf16
    %53 = vector.broadcast %cst_15 : bf16 to vector<256x4xbf16>
    %54 = vector.shape_cast %34 : vector<256x1xi1> to vector<256x1xi1>
    %55 = vector.broadcast %54 : vector<256x1xi1> to vector<256x4xi1>
    %56 = arith.select %55, %52, %53 : vector<256x4xi1>, vector<256x4xbf16>
    %57 = vector.extract_strided_slice %13 {offsets = [32, 0], sizes = [256, 4], strides = [1, 1]} : vector<290x4xbf16> to vector<256x4xbf16>
    %cst_16 = arith.constant 0.000000e+00 : bf16
    %58 = vector.broadcast %cst_16 : bf16 to vector<256x4xbf16>
    %59 = vector.shape_cast %32 : vector<256x1xi1> to vector<256x1xi1>
    %60 = vector.broadcast %59 : vector<256x1xi1> to vector<256x4xi1>
    %61 = arith.select %60, %57, %58 : vector<256x4xi1>, vector<256x4xbf16>
    %62 = vector.extract_strided_slice %13 {offsets = [33, 0], sizes = [256, 4], strides = [1, 1]} : vector<290x4xbf16> to vector<256x4xbf16>
    %63 = vector.extract_strided_slice %13 {offsets = [34, 0], sizes = [256, 4], strides = [1, 1]} : vector<290x4xbf16> to vector<256x4xbf16>
    %cst_17 = arith.constant 0.000000e+00 : bf16
    %64 = vector.broadcast %cst_17 : bf16 to vector<256x4xbf16>
    %65 = vector.shape_cast %34 : vector<256x1xi1> to vector<256x1xi1>
    %66 = vector.broadcast %65 : vector<256x1xi1> to vector<256x4xi1>
    %67 = arith.select %66, %63, %64 : vector<256x4xi1>, vector<256x4xbf16>
    %68 = tpu.concatenate %39, %40, %45, %50, %51, %56, %61, %62, %67 in 1 : vector<256x4xbf16>, vector<256x4xbf16>, vector<256x4xbf16>, vector<256x4xbf16>, vector<256x4xbf16>, vector<256x4xbf16>, vector<256x4xbf16>, vector<256x4xbf16>, vector<256x4xbf16> -> vector<256x36xbf16>
    %c0_18 = arith.constant 0 : index
    %c0_19 = arith.constant 0 : index
    %69 = vector.load %arg4[%c0_18, %c0_19] : memref<36x4xbf16, #tpu.memory_space<vmem>>, vector<36x4xbf16>
    %cst_20 = arith.constant dense<0.000000e+00> : vector<256x4xf32>
    %70 = tpu.matmul %68, %69, %cst_20 {dimension_numbers = #tpu.dot_dimension_numbers<[1], [0], [0], [1], [0, 0, 1, 1], [], []>} : vector<256x36xbf16>, vector<36x4xbf16>, vector<256x4xf32> -> vector<256x4xf32>
    %cst_21 = arith.constant dense<0.000000e+00> : vector<4xf32>
    %71 = vector.multi_reduction <add>, %70, %cst_21 [0] : vector<256x4xf32> to vector<4xf32>
    %72 = vector.shape_cast %71 : vector<4xf32> to vector<1x4xf32>
    %73 = arith.mulf %70, %70 : vector<256x4xf32>
    %cst_22 = arith.constant dense<0.000000e+00> : vector<4xf32>
    %74 = vector.multi_reduction <add>, %73, %cst_22 [0] : vector<256x4xf32> to vector<4xf32>
    %75 = vector.shape_cast %74 : vector<4xf32> to vector<1x4xf32>
    %76 = tpu.concatenate %72, %75 in 0 : vector<1x4xf32>, vector<1x4xf32> -> vector<2x4xf32>
    %77 = vector.shape_cast %76 : vector<2x4xf32> to vector<1x2x4xf32>
    %c0_23 = arith.constant 0 : index
    %c0_24 = arith.constant 0 : index
    %c0_25 = arith.constant 0 : index
    %78 = vector.load %arg6[%c0_23, %c0_24, %c0_25] : memref<1x2x4xf32, #tpu.memory_space<vmem>>, vector<1x2x4xf32>
    tpu.vector_store %arg6[%c0_23, %c0_24, %c0_25], %77 {strides = array<i32>} : memref<1x2x4xf32, #tpu.memory_space<vmem>>, vector<1x2x4xf32>,
    %79 = vector.shape_cast %70 : vector<256x4xf32> to vector<1x16x16x4xf32>
    %80 = arith.truncf %79 : vector<1x16x16x4xf32> to vector<1x16x16x4xbf16>
    %c0_26 = arith.constant 0 : index
    %c0_27 = arith.constant 0 : index
    %c0_28 = arith.constant 0 : index
    %c0_29 = arith.constant 0 : index
    %81 = vector.load %arg5[%c0_26, %c0_27, %c0_28, %c0_29] : memref<1x16x16x4xbf16, #tpu.memory_space<vmem>>, vector<1x16x16x4xbf16>
    tpu.vector_store %arg5[%c0_26, %c0_27, %c0_28, %c0_29], %80 {strides = array<i32>} : memref<1x16x16x4xbf16, #tpu.memory_space<vmem>>, vector<1x16x16x4xbf16>,
    return
  }
  func.func @transform_0(%arg0: i32) -> (i32, i32, i32, i32) {
    %c0_i32 = arith.constant 0 : i32
    %c0_i32_0 = arith.constant 0 : i32
    %c0_i32_1 = arith.constant 0 : i32
    %c0_i32_2 = arith.constant 0 : i32
    return %arg0, %c0_i32, %c0_i32_0, %c0_i32_1 : i32, i32, i32, i32
  }
  func.func @transform_1(%arg0: i32) -> (i32, i32) {
    %c0_i32 = arith.constant 0 : i32
    %c0_i32_0 = arith.constant 0 : i32
    %c0_i32_1 = arith.constant 0 : i32
    return %c0_i32, %c0_i32_0 : i32, i32
  }
  func.func @transform_2(%arg0: i32) -> (i32, i32) {
    %c0_i32 = arith.constant 0 : i32
    %c0_i32_0 = arith.constant 0 : i32
    %c0_i32_1 = arith.constant 0 : i32
    return %c0_i32, %c0_i32_0 : i32, i32
  }
  func.func @transform_3(%arg0: i32) -> (i32, i32) {
    %c0_i32 = arith.constant 0 : i32
    %c0_i32_0 = arith.constant 0 : i32
    %c0_i32_1 = arith.constant 0 : i32
    return %c0_i32, %c0_i32_0 : i32, i32
  }
  func.func @transform_4(%arg0: i32) -> (i32, i32, i32, i32) {
    %c0_i32 = arith.constant 0 : i32
    %c0_i32_0 = arith.constant 0 : i32
    %c0_i32_1 = arith.constant 0 : i32
    %c0_i32_2 = arith.constant 0 : i32
    return %arg0, %c0_i32, %c0_i32_0, %c0_i32_1 : i32, i32, i32, i32
  }
  func.func @transform_5(%arg0: i32) -> (i32, i32, i32) {
    %c0_i32 = arith.constant 0 : i32
    %c0_i32_0 = arith.constant 0 : i32
    %c0_i32_1 = arith.constant 0 : i32
    return %arg0, %c0_i32, %c0_i32_0 : i32, i32, i32
  }
}

</mosaic_0001>

<bundles_post_ra>
// kernel: basic_block.5
= control target key start
LH: loop header
LB: loop body
LE: loop exit
PB: predicated region body
PF: predicated region fallthrough
CT: control target
= control target key end

     0   :  { %s805_s15 = smov 0   ;;  %s1005_s0 = inlined_call_operand.vmem [shape: bf16[2,16,16,4], index: 0, kind: input, shape index: {}]   ;;  %s1006_s1 = inlined_call_operand.vmem [shape: bf16[2,16,16,4], index: 1, kind: input, shape index: {}]   ;;  %s1007_s2 = inlined_call_operand.vmem [shape: f32[1,4], index: 2, kind: input, shape index: {}]   ;;  %s1008_s3 = inlined_call_operand.vmem [shape: f32[1,4], index: 3, kind: input, shape index: {}]   ;;  %s1009_s4 = inlined_call_operand.vmem [shape: f32[2,16,16,4], index: 4, kind: output, shape index: {}]  }
   0x1 LB: > { %s588_s16 = sadd.s32 4294967295, %s778_s15   ;;  %p592_p0 = scmp.ge.s32.totalorder %s778_s15, 1  ;;  %s778_s15 = sphi %s805_s15, %s14_s15  }
   0x2   : > { %p172_p1 = scmp.lt.s32.totalorder %s778_s15, 3 }
   0x4   : > { %p173_p2 = pnand %p592_p0, %p172_p1 }
   0x5   : > { %p203_p3 = scmp.lt.s32.totalorder (!%p173_p2), %s588_s16, 1  ;;  %v829_v0 = vld [vmem:[%s1007_s2] ss:$0 sm:$0xff] (!%p173_p2)  ;;  %vm488_vm0 = vcmask (!%p173_p2), 31744  }
   0x6   : > { %176 = sbr.rel (%p173_p2) target bundleno = 71 (0x47), region = 36  ;;  %v840_v11 = vld [vmem:[%s1008_s3] ss:$0 sm:$0xff] (!%p173_p2) }
   0xd   : > { %s1011_s16 = smov (!%p203_p3, %s588_s16), 1 }
   0xe   : > { %s603_s17 = sshll.u32 %s1011_s16, 7  ;;  %s605_s28 = sshll.u32 %s1011_s16, 8 }
   0xf   : > { %s819_s20 = scalar_lea.vmem %s1005_s0, %s603_s17  ;;  %s824_s23 = scalar_lea.vmem %s1006_s1, %s603_s17 }
  0x10   : > { %v607_v1 = vld [vmem:[%s819_s20] sm:$0xff]   ;;  %v734_v3 = vld [vmem:[%s819_s20 + $0x8] sm:$0xff]   ;;  %v735_v9 = vld [vmem:[%s819_s20 + $0x10] sm:$0xff]   ;;  %s860_s5 = scalar_lea.vmem %s1009_s4, %s605_s28 }
  0x11   : > { %v671_v2 = vld [vmem:[%s824_s23] sm:$0xff]   ;;  %v608_v4 = vunpack.c.l.bf16 %v607_v1  ;;  %v609_v6 = vunpack.c.h.bf16 %v607_v1  ;;  %v749_v8 = vld [vmem:[%s824_s23 + $0x8] sm:$0xff]   ;;  %v750_v10 = vld [vmem:[%s824_s23 + $0x10] sm:$0xff]   ;;  %v612_v12 = vunpack.c.l.bf16 %v734_v3  ;;  %v613_v14 = vunpack.c.h.bf16 %v734_v3 }
  0x12   : > { %v672_v5 = vunpack.c.l.bf16 %v671_v2  ;;  %v673_v7 = vunpack.c.h.bf16 %v671_v2  ;;  %v676_v13 = vunpack.c.l.bf16 %v749_v8  ;;  %v677_v15 = vunpack.c.h.bf16 %v749_v8  ;;  %v736_v16 = vld [vmem:[%s819_s20 + $0x18] sm:$0xff]   ;;  %v737_v42 = vld [vmem:[%s819_s20 + $0x20] sm:$0xff]   ;;  %v738_v52 = vld [vmem:[%s819_s20 + $0x28] sm:$0xff]  }
  0x13   : > { %v353_v17 = vmul.f32 %v608_v4, %v829_v0  ;;  %v354_v18 = vmul.f32 %v609_v6, %v829_v0  ;;  %v616_v19 = vunpack.c.l.bf16 %v735_v9  ;;  %v680_v20 = vunpack.c.l.bf16 %v750_v10  ;;  %v751_v21 = vld [vmem:[%s824_s23 + $0x18] sm:$0xff]   ;;  %v752_v47 = vld [vmem:[%s824_s23 + $0x20] sm:$0xff]   ;;  %v753_v57 = vld [vmem:[%s824_s23 + $0x28] sm:$0xff]  }
  0x14   : > { %v355_v22 = vmul.f32 %v612_v12, %v829_v0  ;;  %v356_v23 = vmul.f32 %v613_v14, %v829_v0  ;;  %v617_v24 = vunpack.c.h.bf16 %v735_v9  ;;  %v681_v25 = vunpack.c.h.bf16 %v750_v10  ;;  %v739_v62 = vld [vmem:[%s819_s20 + $0x30] sm:$0xff]  }
  0x15   : > { %v392_v26 = vadd.f32 %v840_v11, %v353_v17  ;;  %v393_v27 = vadd.f32 %v840_v11, %v354_v18  ;;  %v357_v28 = vmul.f32 %v616_v19, %v829_v0  ;;  %v620_v29 = vunpack.c.l.bf16 %v736_v16  ;;  %v754_v4 = vld [vmem:[%s824_s23 + $0x30] sm:$0xff]   ;;  %v740_v18 = vld [vmem:[%s819_s20 + $0x38] sm:$0xff]  }
  0x16   : > { %v394_v30 = vadd.f32 %v840_v11, %v355_v22  ;;  %v395_v31 = vadd.f32 %v840_v11, %v356_v23  ;;  %v358_v32 = vmul.f32 %v617_v24, %v829_v0  ;;  %v684_v33 = vunpack.c.l.bf16 %v751_v21  ;;  %v755_v23 = vld [vmem:[%s824_s23 + $0x38] sm:$0xff]  }
  0x17   : > { %v424_v34 = vadd.f32 %v672_v5, %v392_v26  ;;  %v425_v35 = vadd.f32 %v673_v7, %v393_v27  ;;  %v396_v36 = vadd.f32 %v840_v11, %v357_v28  ;;  %v359_v37 = vmul.f32 %v620_v29, %v829_v0 }
  0x18   : > { %v426_v38 = vadd.f32 %v676_v13, %v394_v30  ;;  %v427_v39 = vadd.f32 %v677_v15, %v395_v31  ;;  %v397_v40 = vadd.f32 %v840_v11, %v358_v32  ;;  %v621_v41 = vunpack.c.h.bf16 %v736_v16  ;;  %v741_v32 = vld [vmem:[%s819_s20 + $0x40] sm:$0xff]  }
  0x19   : > { %v456_v43 = vmax.f32 %v424_v34, 0.0  ;;  %v457_v44 = vmax.f32 %v425_v35, 0.0  ;;  %v428_v45 = vadd.f32 %v680_v20, %v396_v36  ;;  %v398_v46 = vadd.f32 %v840_v11, %v359_v37  ;;  %v756_v37 = vld [vmem:[%s824_s23 + $0x40] sm:$0xff]  }
  0x1a   : > { %v458_v48 = vmax.f32 %v426_v38, 0.0  ;;  %v459_v49 = vmax.f32 %v427_v39, 0.0  ;;  %v429_v50 = vadd.f32 %v681_v25, %v397_v40  ;;  %v685_v51 = vunpack.c.h.bf16 %v751_v21 }
  0x1b   : > { %489 = vst.msk [vmem:[%s860_s5] sm:$0xff] %vm488_vm0, %v456_v43  ;;  %490 = vst.msk [vmem:[%s860_s5 + $0x8] sm:$0xff] %vm488_vm0, %v457_v44  ;;  %v460_v53 = vmax.f32 %v428_v45, 0.0  ;;  %v430_v54 = vadd.f32 %v684_v33, %v398_v46  ;;  %v360_v55 = vmul.f32 %v621_v41, %v829_v0  ;;  %v624_v56 = vunpack.c.l.bf16 %v737_v42  ;;  %v742_v46 = vld [vmem:[%s819_s20 + $0x48] sm:$0xff]  }
  0x1c   : > { %491 = vst.msk [vmem:[%s860_s5 + $0x10] sm:$0xff] %vm488_vm0, %v458_v48  ;;  %492 = vst.msk [vmem:[%s860_s5 + $0x18] sm:$0xff] %vm488_vm0, %v459_v49  ;;  %v461_v58 = vmax.f32 %v429_v50, 0.0  ;;  %v688_v59 = vunpack.c.l.bf16 %v752_v47  ;;  %v625_v60 = vunpack.c.h.bf16 %v737_v42  ;;  %v689_v61 = vunpack.c.h.bf16 %v752_v47  ;;  %v757_v47 = vld [vmem:[%s824_s23 + $0x48] sm:$0xff]  }
  0x1d   : > { %493 = vst.msk [vmem:[%s860_s5 + $0x20] sm:$0xff] %vm488_vm0, %v460_v53  ;;  %v462_v63 = vmax.f32 %v430_v54, 0.0  ;;  %v399_v1 = vadd.f32 %v840_v11, %v360_v55  ;;  %v361_v2 = vmul.f32 %v624_v56, %v829_v0  ;;  %v628_v3 = vunpack.c.l.bf16 %v738_v52  ;;  %v743_v56 = vld [vmem:[%s819_s20 + $0x50] sm:$0xff]  }
  0x1e   : > { %494 = vst.msk [vmem:[%s860_s5 + $0x28] sm:$0xff] %vm488_vm0, %v461_v58  ;;  %v362_v5 = vmul.f32 %v625_v60, %v829_v0  ;;  %v692_v6 = vunpack.c.l.bf16 %v753_v57  ;;  %v629_v7 = vunpack.c.h.bf16 %v738_v52  ;;  %v693_v8 = vunpack.c.h.bf16 %v753_v57 }
  0x1f   : > { %495 = vst.msk [vmem:[%s860_s5 + $0x30] sm:$0xff] %vm488_vm0, %v462_v63  ;;  %v431_v9 = vadd.f32 %v685_v51, %v399_v1  ;;  %v400_v10 = vadd.f32 %v840_v11, %v361_v2  ;;  %v363_v12 = vmul.f32 %v628_v3, %v829_v0  ;;  %v632_v13 = vunpack.c.l.bf16 %v739_v62 }
  0x20   : > { %v401_v14 = vadd.f32 %v840_v11, %v362_v5  ;;  %v364_v15 = vmul.f32 %v629_v7, %v829_v0  ;;  %v696_v16 = vunpack.c.l.bf16 %v754_v4  ;;  %v633_v17 = vunpack.c.h.bf16 %v739_v62 }
  0x21   : > { %v463_v19 = vmax.f32 %v431_v9, 0.0  ;;  %v432_v20 = vadd.f32 %v688_v59, %v400_v10  ;;  %v402_v21 = vadd.f32 %v840_v11, %v363_v12  ;;  %v365_v22 = vmul.f32 %v632_v13, %v829_v0  ;;  %v744_v12 = vld [vmem:[%s819_s20 + $0x58] sm:$0xff]  }
  0x22   : > { %v433_v24 = vadd.f32 %v689_v61, %v401_v14  ;;  %v403_v25 = vadd.f32 %v840_v11, %v364_v15  ;;  %v697_v26 = vunpack.c.h.bf16 %v754_v4  ;;  %v366_v27 = vmul.f32 %v633_v17, %v829_v0  ;;  %v758_v61 = vld [vmem:[%s824_s23 + $0x50] sm:$0xff]   ;;  %v759_v17 = vld [vmem:[%s824_s23 + $0x58] sm:$0xff]  }
  0x23   : > { %496 = vst.msk [vmem:[%s860_s5 + $0x38] sm:$0xff] %vm488_vm0, %v463_v19  ;;  %v464_v28 = vmax.f32 %v432_v20, 0.0  ;;  %v434_v29 = vadd.f32 %v692_v6, %v402_v21  ;;  %v404_v30 = vadd.f32 %v840_v11, %v365_v22  ;;  %v636_v31 = vunpack.c.l.bf16 %v740_v18 }
  0x24   : > { %v465_v33 = vmax.f32 %v433_v24, 0.0  ;;  %v435_v34 = vadd.f32 %v693_v8, %v403_v25  ;;  %v405_v35 = vadd.f32 %v840_v11, %v366_v27  ;;  %v700_v36 = vunpack.c.l.bf16 %v755_v23 }
  0x25   : > { %497 = vst.msk [vmem:[%s860_s5 + $0x40] sm:$0xff] %vm488_vm0, %v464_v28  ;;  %v466_v38 = vmax.f32 %v434_v29, 0.0  ;;  %v436_v39 = vadd.f32 %v696_v16, %v404_v30  ;;  %v367_v40 = vmul.f32 %v636_v31, %v829_v0  ;;  %v637_v41 = vunpack.c.h.bf16 %v740_v18  ;;  %v760_v31 = vld [vmem:[%s824_s23 + $0x60] sm:$0xff]  }
  0x26   : > { %498 = vst.msk [vmem:[%s860_s5 + $0x48] sm:$0xff] %vm488_vm0, %v465_v33  ;;  %v467_v42 = vmax.f32 %v435_v34, 0.0  ;;  %v437_v43 = vadd.f32 %v697_v26, %v405_v35  ;;  %v701_v44 = vunpack.c.h.bf16 %v755_v23  ;;  %v640_v45 = vunpack.c.l.bf16 %v741_v32  ;;  %v745_v26 = vld [vmem:[%s819_s20 + $0x60] sm:$0xff]  }
  0x27   : > { %499 = vst.msk [vmem:[%s860_s5 + $0x50] sm:$0xff] %vm488_vm0, %v466_v38  ;;  %v468_v48 = vmax.f32 %v436_v39, 0.0  ;;  %v406_v49 = vadd.f32 %v840_v11, %v367_v40  ;;  %v368_v50 = vmul.f32 %v637_v41, %v829_v0  ;;  %v704_v51 = vunpack.c.l.bf16 %v756_v37  ;;  %v746_v40 = vld [vmem:[%s819_s20 + $0x68] sm:$0xff]  }
  0x28   : > { %500 = vst.msk [vmem:[%s860_s5 + $0x58] sm:$0xff] %vm488_vm0, %v467_v42  ;;  %v469_v52 = vmax.f32 %v437_v43, 0.0  ;;  %v369_v53 = vmul.f32 %v640_v45, %v829_v0  ;;  %v641_v54 = vunpack.c.h.bf16 %v741_v32  ;;  %v705_v55 = vunpack.c.h.bf16 %v756_v37  ;;  %v761_v41 = vld [vmem:[%s824_s23 + $0x68] sm:$0xff]  }
  0x29   : > { %501 = vst.msk [vmem:[%s860_s5 + $0x60] sm:$0xff] %vm488_vm0, %v468_v48  ;;  %v438_v57 = vadd.f32 %v700_v36, %v406_v49  ;;  %v407_v58 = vadd.f32 %v840_v11, %v368_v50  ;;  %v644_v59 = vunpack.c.l.bf16 %v742_v46  ;;  %v708_v60 = vunpack.c.l.bf16 %v757_v47  ;;  %v747_v50 = vld [vmem:[%s819_s20 + $0x70] sm:$0xff]  }
  0x2a   : > { %502 = vst.msk [vmem:[%s860_s5 + $0x68] sm:$0xff] %vm488_vm0, %v469_v52  ;;  %v408_v62 = vadd.f32 %v840_v11, %v369_v53  ;;  %v370_v63 = vmul.f32 %v641_v54, %v829_v0  ;;  %v645_v1 = vunpack.c.h.bf16 %v742_v46  ;;  %v709_v2 = vunpack.c.h.bf16 %v757_v47 }
  0x2b   : > { %v470_v3 = vmax.f32 %v438_v57, 0.0  ;;  %v439_v4 = vadd.f32 %v701_v44, %v407_v58  ;;  %v371_v5 = vmul.f32 %v644_v59, %v829_v0  ;;  %v648_v6 = vunpack.c.l.bf16 %v743_v56  ;;  %v762_v59 = vld [vmem:[%s824_s23 + $0x70] sm:$0xff]  }
  0x2c   : > { %v440_v7 = vadd.f32 %v704_v51, %v408_v62  ;;  %v409_v8 = vadd.f32 %v840_v11, %v370_v63  ;;  %v372_v9 = vmul.f32 %v645_v1, %v829_v0  ;;  %v712_v10 = vunpack.c.l.bf16 %v758_v61 }
  0x2d   : > { %503 = vst.msk [vmem:[%s860_s5 + $0x70] sm:$0xff] %vm488_vm0, %v470_v3  ;;  %v471_v13 = vmax.f32 %v439_v4, 0.0  ;;  %v410_v14 = vadd.f32 %v840_v11, %v371_v5  ;;  %v373_v15 = vmul.f32 %v648_v6, %v829_v0  ;;  %v649_v16 = vunpack.c.h.bf16 %v743_v56  ;;  %v748_v5 = vld [vmem:[%s819_s20 + $0x78] sm:$0xff]  }
  0x2e   : > { %v472_v18 = vmax.f32 %v440_v7, 0.0  ;;  %v441_v19 = vadd.f32 %v705_v55, %v409_v8  ;;  %v411_v20 = vadd.f32 %v840_v11, %v372_v9  ;;  %v713_v21 = vunpack.c.h.bf16 %v758_v61 }
  0x2f   : > { %504 = vst.msk [vmem:[%s860_s5 + $0x78] sm:$0xff] %vm488_vm0, %v471_v13  ;;  %v442_v22 = vadd.f32 %v708_v60, %v410_v14  ;;  %v412_v23 = vadd.f32 %v840_v11, %v373_v15  ;;  %v374_v24 = vmul.f32 %v649_v16, %v829_v0  ;;  %v652_v25 = vunpack.c.l.bf16 %v744_v12 }
  0x30   : > { %505 = vst.msk [vmem:[%s860_s5 + $0x80] sm:$0xff] %vm488_vm0, %v472_v18  ;;  %v473_v27 = vmax.f32 %v441_v19, 0.0  ;;  %v443_v28 = vadd.f32 %v709_v2, %v411_v20  ;;  %v716_v29 = vunpack.c.l.bf16 %v759_v17  ;;  %v653_v30 = vunpack.c.h.bf16 %v744_v12 }
  0x31   : > { %v474_v32 = vmax.f32 %v442_v22, 0.0  ;;  %v444_v33 = vadd.f32 %v712_v10, %v412_v23  ;;  %v413_v34 = vadd.f32 %v840_v11, %v374_v24  ;;  %v375_v35 = vmul.f32 %v652_v25, %v829_v0  ;;  %v763_v10 = vld [vmem:[%s824_s23 + $0x78] sm:$0xff]  }
  0x32   : > { %506 = vst.msk [vmem:[%s860_s5 + $0x88] sm:$0xff] %vm488_vm0, %v473_v27  ;;  %v475_v36 = vmax.f32 %v443_v28, 0.0  ;;  %v717_v37 = vunpack.c.h.bf16 %v759_v17  ;;  %v376_v38 = vmul.f32 %v653_v30, %v829_v0  ;;  %v656_v39 = vunpack.c.l.bf16 %v745_v26 }
  0x33   : > { %507 = vst.msk [vmem:[%s860_s5 + $0x90] sm:$0xff] %vm488_vm0, %v474_v32  ;;  %v476_v42 = vmax.f32 %v444_v33, 0.0  ;;  %v445_v43 = vadd.f32 %v713_v21, %v413_v34  ;;  %v414_v44 = vadd.f32 %v840_v11, %v375_v35  ;;  %v720_v45 = vunpack.c.l.bf16 %v760_v31 }
  0x34   : > { %508 = vst.msk [vmem:[%s860_s5 + $0x98] sm:$0xff] %vm488_vm0, %v475_v36  ;;  %v415_v46 = vadd.f32 %v840_v11, %v376_v38  ;;  %v377_v47 = vmul.f32 %v656_v39, %v829_v0  ;;  %v657_v48 = vunpack.c.h.bf16 %v745_v26  ;;  %v721_v49 = vunpack.c.h.bf16 %v760_v31 }
  0x35   : > { %509 = vst.msk [vmem:[%s860_s5 + $0xa0] sm:$0xff] %vm488_vm0, %v476_v42  ;;  %v477_v51 = vmax.f32 %v445_v43, 0.0  ;;  %v446_v52 = vadd.f32 %v716_v29, %v414_v44  ;;  %v660_v53 = vunpack.c.l.bf16 %v746_v40  ;;  %v724_v54 = vunpack.c.l.bf16 %v761_v41 }
  0x36   : > { %v447_v55 = vadd.f32 %v717_v37, %v415_v46  ;;  %v416_v56 = vadd.f32 %v840_v11, %v377_v47  ;;  %v378_v57 = vmul.f32 %v657_v48, %v829_v0  ;;  %v661_v58 = vunpack.c.h.bf16 %v746_v40 }
  0x37   : > { %510 = vst.msk [vmem:[%s860_s5 + $0xa8] sm:$0xff] %vm488_vm0, %v477_v51  ;;  %v478_v60 = vmax.f32 %v446_v52, 0.0  ;;  %v379_v61 = vmul.f32 %v660_v53, %v829_v0  ;;  %v725_v62 = vunpack.c.h.bf16 %v761_v41  ;;  %v664_v63 = vunpack.c.l.bf16 %v747_v50 }
  0x38   : > { %v479_v1 = vmax.f32 %v447_v55, 0.0  ;;  %v448_v2 = vadd.f32 %v720_v45, %v416_v56  ;;  %v417_v3 = vadd.f32 %v840_v11, %v378_v57  ;;  %v380_v4 = vmul.f32 %v661_v58, %v829_v0 }
  0x39   : > { %511 = vst.msk [vmem:[%s860_s5 + $0xb0] sm:$0xff] %vm488_vm0, %v478_v60  ;;  %v418_v6 = vadd.f32 %v840_v11, %v379_v61  ;;  %v728_v7 = vunpack.c.l.bf16 %v762_v59  ;;  %v381_v8 = vmul.f32 %v664_v63, %v829_v0  ;;  %v665_v9 = vunpack.c.h.bf16 %v747_v50 }
  0x3a   : > { %512 = vst.msk [vmem:[%s860_s5 + $0xb8] sm:$0xff] %vm488_vm0, %v479_v1  ;;  %v480_v12 = vmax.f32 %v448_v2, 0.0  ;;  %v449_v13 = vadd.f32 %v721_v49, %v417_v3  ;;  %v419_v14 = vadd.f32 %v840_v11, %v380_v4  ;;  %v729_v15 = vunpack.c.h.bf16 %v762_v59 }
  0x3b   : > { %v450_v16 = vadd.f32 %v724_v54, %v418_v6  ;;  %v420_v17 = vadd.f32 %v840_v11, %v381_v8  ;;  %v382_v18 = vmul.f32 %v665_v9, %v829_v0  ;;  %v668_v19 = vunpack.c.l.bf16 %v748_v5 }
  0x3c   : > { %513 = vst.msk [vmem:[%s860_s5 + $0xc0] sm:$0xff] %vm488_vm0, %v480_v12  ;;  %v481_v20 = vmax.f32 %v449_v13, 0.0  ;;  %v451_v21 = vadd.f32 %v725_v62, %v419_v14  ;;  %v732_v22 = vunpack.c.l.bf16 %v763_v10  ;;  %v669_v23 = vunpack.c.h.bf16 %v748_v5 }
  0x3d   : > { %v482_v24 = vmax.f32 %v450_v16, 0.0  ;;  %v452_v25 = vadd.f32 %v728_v7, %v420_v17  ;;  %v421_v26 = vadd.f32 %v840_v11, %v382_v18  ;;  %v383_v27 = vmul.f32 %v668_v19, %v829_v0 }
  0x3e   : > { %514 = vst.msk [vmem:[%s860_s5 + $0xc8] sm:$0xff] %vm488_vm0, %v481_v20  ;;  %v483_v28 = vmax.f32 %v451_v21, 0.0  ;;  %v733_v29 = vunpack.c.h.bf16 %v763_v10  ;;  %v384_v30 = vmul.f32 %v669_v23, %v829_v0 }
  0x3f   : > { %515 = vst.msk [vmem:[%s860_s5 + $0xd0] sm:$0xff] %vm488_vm0, %v482_v24  ;;  %v484_v31 = vmax.f32 %v452_v25, 0.0  ;;  %v453_v32 = vadd.f32 %v729_v15, %v421_v26  ;;  %v422_v33 = vadd.f32 %v840_v11, %v383_v27 }
  0x40   : > { %516 = vst.msk [vmem:[%s860_s5 + $0xd8] sm:$0xff] %vm488_vm0, %v483_v28  ;;  %v423_v34 = vadd.f32 %v840_v11, %v384_v30 }
  0x41   : > { %517 = vst.msk [vmem:[%s860_s5 + $0xe0] sm:$0xff] %vm488_vm0, %v484_v31  ;;  %v485_v35 = vmax.f32 %v453_v32, 0.0  ;;  %v454_v36 = vadd.f32 %v732_v22, %v422_v33 }
  0x42   : > { %v455_v37 = vadd.f32 %v733_v29, %v423_v34 }
  0x43   : > { %518 = vst.msk [vmem:[%s860_s5 + $0xe8] sm:$0xff] %vm488_vm0, %v485_v35  ;;  %v486_v38 = vmax.f32 %v454_v36, 0.0 }
  0x44   : > { %v487_v39 = vmax.f32 %v455_v37, 0.0 }
  0x45   : > { %519 = vst.msk [vmem:[%s860_s5 + $0xf0] sm:$0xff] %vm488_vm0, %v486_v38 }
  0x46   : > { %520 = vst.msk [vmem:[%s860_s5 + $0xf8] sm:$0xff] %vm488_vm0, %v487_v39 }
  0x47 PF: > { %s14_s15 = sadd.s32 1, %s778_s15  }
  0x48   : > { %p11_p4 = scmp.ge.s32.totalorder %s14_s15, 4  }
  0x4a   :  { %13 = sbr.rel (!%p11_p4) target bundleno = 1 (0x1), region = 69 }

// kernel: basic_block.3
= control target key start
LH: loop header
LB: loop body
LE: loop exit
PB: predicated region body
PF: predicated region fallthrough
CT: control target
= control target key end

     0   :  { %s3224_s12 = smov 0   ;;  %s4839_s0 = inlined_call_operand.vmem [shape: bf16[2,16,16,4], index: 0, kind: input, shape index: {}]   ;;  %s4840_s1 = inlined_call_operand.vmem [shape: bf16[36,4], index: 1, kind: input, shape index: {}]   ;;  %s4841_s2 = inlined_call_operand.vmem [shape: bf16[2,16,16,4], index: 2, kind: output, shape index: {0}]   ;;  %s4842_s3 = inlined_call_operand.vmem [shape: f32[2,2,4], index: 3, kind: output, shape index: {1}]  }
   0x1 LB: > { %s2939_s13 = sadd.s32 4294967295, %s3192_s12   ;;  %p2943_p0 = scmp.ge.s32.totalorder %s3192_s12, 1  ;;  %s3192_s12 = sphi %s3224_s12, %s14_s12  }
   0x2   : > { %p140_p1 = scmp.lt.s32.totalorder %s3192_s12, 3 }
   0x4   : > { %p141_p2 = pnand %p2943_p0, %p140_p1 }
   0x6   : > { %144 = sbr.rel (%p141_p2) target bundleno = 637 (0x27d), region = 28 }
   0xd   : > { %p168_p3 = scmp.lt.s32.totalorder %s2939_s13, 1  ;;  %v446_v0 = vlaneseq  ;;  %vm3194_vm0 = vmmov 1   ;;  %vm4845_vm2 = vsmask.f32 256  ;;  %v4851_v4 = vmov 0   ;;  %s3196_s18 = smov 12  }
   0xe   : > { %vm992_vm1 = vmpackc.low %vm3194_vm0, %vm3194_vm0  ;;  %vm4846_vm3 = vcmask 1040384   ;;  %vm4844_vm9 = vsmask.f32 7424  ;;  %v3295_v41 = vrot.slane %v4851_v4, 1  ;;  %vm4843_vm0 = vcmask 1046528   ;;  %s3197_s19 = smov 24  }
   0xf   : > { %s5213_s13 = smov (!%p168_p3, %s2939_s13), 1  ;;  %v3234_v1 = vshrl.u32 %v446_v0, 7  ;;  %v3247_v5 = vsel %vm992_vm1, 65537, %v4851_v4  ;;  %vm443_vm8 = vmand %vm4846_vm3, %vm4845_vm2  ;;  %s3198_s20 = smov 4  }
  0x10   : > { %s3050_s14 = sshll.u32 %s5213_s13, 7  ;;  %4882 = vst [vmem:[#allocation2_spill] sm:$0xff] %v3295_v41  ;;  %s3199_s23 = smov 8  }
  0x11   : > { %v449_v2 = vadd.s32 16, %v3234_v1  ;;  %v483_v3 = vand.u32 15, %v3234_v1  ;;  %s3244_s17 = scalar_lea.vmem %s4839_s0, %s3050_s14  ;;  %v448_v6 = vadd.s32 8, %v3234_v1  ;;  %v450_v7 = vadd.s32 24, %v3234_v1  ;;  %s3200_s24 = smov 20  }
  0x12   : > { %v3167_v8 = vld [vmem:[%s3244_s17] sm:$0xff]   ;;  %v3168_v9 = vld [vmem:[%s3244_s17 + $0x8] sm:$0xff]   ;;  %v3254_v14 = vld [vmem:[%s3244_s17 + $0x78] sm:$0xff]   ;;  %v452_v28 = vadd.s32 40, %v3234_v1  ;;  %v454_v50 = vadd.s32 56, %v3234_v1  ;;  %v456_v58 = vadd.s32 72, %v3234_v1  ;;  %s4684_s7 = scalar_lea.vmem %s4841_s2, %s3050_s14 }
  0x13   : > { %v497_v10 = vand.u32 15, %v449_v2  ;;  %vm863_vm4 = vcmp.ge.s32.totalorder %v483_v3, 1  ;;  %v299_v11 = vshrl.u32 %v3167_v8, 16  ;;  %v306_v12 = vshrl.u32 %v3168_v9, 16  ;;  %v3171_v22 = vld [vmem:[%s3244_s17 + $0x10] sm:$0xff]   ;;  %v3172_v49 = vld [vmem:[%s3244_s17 + $0x18] sm:$0xff]  }
  0x14   : > { %v309_v13 = vshll.u32 %v3168_v9, 16  ;;  %vm1365_vm6 = vmpackc.low %vm863_vm4, %vm863_vm4  ;;  %v302_v15 = vshll.u32 %v3167_v8, 16  ;;  %v490_v17 = vand.u32 15, %v448_v6  ;;  %v418_v24 = vshrl.u32 %v3254_v14, 16  ;;  %s3201_s27 = smov 16   ;;  %s3202_s28 = smov 28  }
  0x15   : > { %vm865_vm5 = vcmp.ge.s32.totalorder %v497_v10, 1  ;;  %v1367_v16 = vsel %vm1365_vm6, 65537, %v4851_v4  ;;  %v301_v18 = vrot.slane %v299_v11, 7  ;;  %v308_v19 = vrot.slane %v306_v12, 7  ;;  %s3203_s29 = smov 32   ;;  %s2948_s8 = sshll.u32 %s5213_s13, 1 }
  0x16   : > { %vm991_vm7 = vmpackc.low %vm865_vm5, %vm865_vm5  ;;  %v2996_v21 = vcombine.low %v1367_v16, %v3247_v5  ;;  %v504_v27 = vand.u32 15, %v450_v7  ;;  %v3269_v30 = vrot.slane %v418_v24, 7  ;;  %v314_v32 = vshrl.u32 %v3171_v22, 16  ;;  %s181_s11 = scalar_lea.vmem %s4842_s3, %s2948_s8 }
  0x17   : > { %v1021_v20 = vsel %vm991_vm7, 65537, %v4851_v4  ;;  %v311_v25 = vor.u32 %v309_v13, %v308_v19  ;;  %v304_v26 = vor.u32 %v302_v15, %v301_v18  ;;  %v317_v35 = vshll.u32 %v3171_v22, 16 }
  0x18   : > { %v2965_v23 = vcombine.low %v1021_v20, %v3247_v5  ;;  %vm3271_vm11 = vcmp.ne.s16.totalorder %v2996_v21, 0  ;;  %vm896_vm12 = vcmp.le.s32.totalorder %v490_v17, 14  ;;  %v3284_v37 = vsel %vm443_vm8, %v3269_v30, 0  ;;  %v3179_v21 = vld [vmem:[%s4840_s1] sm:$0xff]  }
  0x19   : > { %v3276_v33 = vsel %vm4845_vm2, %v301_v18, %v311_v25  ;;  %v3278_v34 = vsel %vm443_vm8, 0, %v304_v26  ;;  %vm1191_vm13 = vmpackc.low %vm896_vm12, %vm896_vm12  ;;  %v3290_v39 = vrot.slane %v314_v32, 7  ;;  %vm898_vm14 = vcmp.le.s32.totalorder %v504_v27, 14  ;;  %3103 = vmatprep.subr.bf16.mxu0 %v3179_v21  ;;  %3141 = vmatprep.subr.bf16.mxu1 %v3179_v21 }
  0x1a   : > { %vm3265_vm10 = vcmp.ne.s16.totalorder %v2965_v23, 0  ;;  %v1373_v38 = vsel %vm3271_vm11, %v3278_v34, 0  ;;  %v1448_v40 = vshll.u32 %v3278_v34, 16  ;;  %v1223_v42 = vsel %vm1191_vm13, 65537, %v4851_v4  ;;  %vm1193_vm15 = vmpackc.low %vm898_vm14, %vm898_vm14  ;;  %3104 = vmatpush3.bf16.msra.mxu0 %v3179_v21  ;;  %3144 = vmatpush3.bf16.msra.mxu1 %v3179_v21 }
  0x1b   : > { %v1374_v36 = vsel %vm3265_vm10, %v3276_v33, 0  ;;  %1703 = vrot.lane.b32.xlu0 %v1373_v38, %s3196_s18  ;;  %v518_v43 = vand.u32 15, %v452_v28  ;;  %v319_v44 = vor.u32 %v317_v35, %v3290_v39  ;;  %v1407_v45 = vsel %vm3271_vm11, %v3276_v33, 0 }
  0x1c   : > { %1705 = vrot.lane.b32.xlu1 %v1374_v36, %s3196_s18  ;;  %v1450_v46 = vrot.slane %v1448_v40, 1  ;;  %v2980_v47 = vcombine.low %v3247_v5, %v1223_v42  ;;  %v1225_v48 = vsel %vm1193_vm15, 65537, %v4851_v4  ;;  %v1456_v54 = vshll.u32 %v3276_v33, 16  ;;  %v3180_v40 = vld [vmem:[%s4840_s1 + $0x8] sm:$0xff]  }
  0x1d   : > { %vm900_vm1 = vcmp.le.s32.totalorder %v518_v43, 14  ;;  %v3307_v51 = vsel %vm4845_vm2, %v308_v19, %v319_v44  ;;  %v2981_v52 = vcombine.low %v3247_v5, %v1225_v48  ;;  %v1452_v57 = vshrl.u32 %v3278_v34, 16  ;;  %3105 = vmatprep.subr.bf16.mxu0 %v3180_v40  ;;  %3142 = vmatprep.subr.bf16.mxu1 %v3180_v40 }
  0x1e   : > { %v1302_v53 = vrot.slane %v2980_v47, 7  ;;  %vm1195_vm4 = vmpackc.low %vm900_vm1, %vm900_vm1  ;;  %v1408_v55 = vsel %vm3265_vm10, %v3307_v51, 0  ;;  %v1451_v59 = vsel %vm4844_vm9, %v3295_v41, %v1450_v46  ;;  %v322_v63 = vshrl.u32 %v3172_v49, 16  ;;  %3106 = vmatpush3.bf16.msra.mxu0 %v3180_v40  ;;  %3145 = vmatpush3.bf16.msra.mxu1 %v3180_v40 }
  0x1f   : > { %1873 = vrot.lane.b32.xlu0 %v1407_v45, %s3197_s19  ;;  %v1227_v56 = vsel %vm1195_vm4, 65537, %v4851_v4  ;;  %v1303_v60 = vrot.slane %v2981_v52, 7  ;;  %v1458_v3 = vrot.slane %v1456_v54, 1  ;;  %v1460_v6 = vshrl.u32 %v3276_v33, 16 }
  0x20   : > { %1875 = vrot.lane.b32.xlu1 %v1408_v55, %s3197_s19  ;;  %vm1389_vm5 = vcmp.ne.s16.totalorder %v1302_v53, 0  ;;  %v2982_v61 = vcombine.low %v3247_v5, %v1227_v56  ;;  %v3329_v8 = vrot.slane %v322_v63, 7  ;;  %v325_v9 = vshll.u32 %v3172_v49, 16 }
  0x21   : > { %v1390_v62 = vsel %vm1389_vm5, %v3278_v34, 0  ;;  %v1304_v0 = vsel %vm4846_vm3, %v1302_v53, %v1303_v60  ;;  %v1454_v13 = vor.u32 %v1452_v57, %v1450_v46  ;;  %v1464_v20 = vshll.u32 %v3307_v51, 16 }
  0x22   : > { %v3325_v2 = vrot.slane %v2982_v61, 7  ;;  %vm1333_vm6 = vcmp.ne.s16.totalorder %v1304_v0, 0  ;;  %v1792_v7 = vrot.slane %v1390_v62, 1  ;;  %v327_v17 = vor.u32 %v325_v9, %v3329_v8 }
  0x23   : > { %1572 = vrot.lane.b32.xlu0 %v1451_v59, %s3198_s20  ;;  %v1349_v10 = vsel %vm1333_vm6, %v3278_v34, 0  ;;  %v1391_v11 = vsel %vm1333_vm6, %v3276_v33, 0  ;;  %v532_v25 = vand.u32 15, %v454_v50  ;;  %v451_v26 = vadd.s32 32, %v3234_v1  ;;  %v3173_v50 = vld [vmem:[%s3244_s17 + $0x20] sm:$0xff]  }
  0x24   : > { %v3337_v12 = vsel %vm4846_vm3, %v1303_v60, %v3325_v2  ;;  %v1623_v15 = vrot.slane %v1349_v10, 1  ;;  %v1793_v16 = vrot.slane %v1391_v11, 1  ;;  %v1459_v28 = vsel %vm4844_vm9, %v1454_v13, %v1458_v3 }
  0x25   : > { %vm1334_vm7 = vcmp.ne.s16.totalorder %v3337_v12, 0  ;;  %v3369_v32 = vsel %vm4845_vm2, %v3290_v39, %v327_v17  ;;  %v1462_v35 = vor.u32 %v1460_v6, %v1458_v3  ;;  %v1466_v36 = vrot.slane %v1464_v20, 1 }
  0x26   : > { %v3344_v18 = vsel %vm1334_vm7, %v3276_v33, 0  ;;  %v3349_v19 = vsel %vm1334_vm7, %v3307_v51, 0  ;;  %v1624_v22 = vsel %vm4843_vm0, %v3295_v41, %v1623_v15  ;;  %v1794_v23 = vsel %vm4843_vm0, %v1792_v7, %v1793_v16 }
  0x27   : > { %v1625_v24 = vrot.slane %v3344_v18, 1  ;;  %1655 = vrot.lane.b32.xlu1 %v1624_v22, %s3199_s23  ;;  %1825 = vrot.lane.b32.xlu0 %v1794_v23, %s3200_s24  ;;  %v1795_v31 = vrot.slane %v3349_v19, 1  ;;  %vm902_vm8 = vcmp.le.s32.totalorder %v532_v25, 14  ;;  %v546_v38 = vand.u32 15, %v456_v58  ;;  %v3174_v25 = vld [vmem:[%s3244_s17 + $0x28] sm:$0xff]  }
  0x28   : > { %v1468_v42 = vshrl.u32 %v3307_v51, 16  ;;  %v1423_v43 = vsel %vm1389_vm5, %v3276_v33, 0  ;;  %vm1197_vm11 = vmpackc.low %vm902_vm8, %vm902_vm8  ;;  %v1472_v39 = vshll.u32 %v3369_v32, 16  ;;  %v511_v45 = vand.u32 15, %v451_v26 }
  0x29   : > { %v1626_v27 = vsel %vm4843_vm0, %v1623_v15, %v1625_v24  ;;  %v1229_v44 = vsel %vm1197_vm11, 65537, %v4851_v4  ;;  %vm904_vm12 = vcmp.le.s32.totalorder %v546_v38, 14  ;;  %v1796_v46 = vsel %vm4843_vm0, %v1793_v16, %v1795_v31 }
  0x2a   : > { %v1424_v47 = vsel %vm1333_vm6, %v3307_v51, 0  ;;  %v2983_v48 = vcombine.low %v3247_v5, %v1229_v44  ;;  %vm1199_vm13 = vmpackc.low %vm904_vm12, %vm904_vm12  ;;  %v453_v49 = vadd.s32 48, %v3234_v1  ;;  %v1467_v52 = vsel %vm4844_vm9, %v1462_v35, %v1466_v36 }
  0x2b   : > { %1657 = vrot.lane.b32.xlu1 %v1626_v27, %s3199_s23  ;;  %1574 = vrot.lane.b32.xlu0 %v1459_v28, %s3198_s20  ;;  %v1231_v53 = vsel %vm1199_vm13, 65537, %v4851_v4  ;;  %v1470_v54 = vor.u32 %v1468_v42, %v1466_v36  ;;  %v1957_v55 = vrot.slane %v1423_v43, 1  ;;  %v1474_v58 = vrot.slane %v1472_v39, 1 }
  0x2c   : > { %v1307_v56 = vrot.slane %v2983_v48, 7  ;;  %v2984_v57 = vcombine.low %v3247_v5, %v1231_v53  ;;  %v1958_v59 = vrot.slane %v1424_v47, 1  ;;  %v3397_v60 = vsel %vm1334_vm7, %v3369_v32, 0 }
  0x2d   : > { %vm3399_vm14 = vcmp.ge.s32.totalorder %v511_v45, 1  ;;  %v525_v0 = vand.u32 15, %v453_v49  ;;  %v330_v3 = vshrl.u32 %v3173_v50, 16  ;;  %v1960_v7 = vrot.slane %v3397_v60, 1 }
  0x2e   : > { %v3405_v62 = vsel %vm4846_vm3, %v3325_v2, %v1307_v56  ;;  %v3407_v63 = vrot.slane %v2984_v57, 7  ;;  %v1959_v6 = vsel %vm4843_vm0, %v1957_v55, %v1958_v59  ;;  %vm993_vm1 = vmpackc.low %vm3399_vm14, %vm3399_vm14  ;;  %v1475_v2 = vsel %vm4844_vm9, %v1470_v54, %v1474_v58 }
  0x2f   : > { %1827 = vrot.lane.b32.xlu1 %v1796_v46, %s3200_s24  ;;  %1743 = vrot.lane.b32.xlu0 %v1459_v28, %s3201_s27  ;;  %vm1335_vm15 = vcmp.ne.s16.totalorder %v3405_v62, 0  ;;  %vm3422_vm4 = vcmp.ge.s32.totalorder %v525_v0, 1  ;;  %v332_v11 = vrot.slane %v330_v3, 7  ;;  %v333_v12 = vshll.u32 %v3173_v50, 16 }
  0x30   : > { %v3416_v9 = vsel %vm4846_vm3, %v1307_v56, %v3407_v63  ;;  %v1351_v13 = vsel %vm1335_vm15, %v3307_v51, 0  ;;  %v1023_v15 = vsel %vm993_vm1, 65537, %v4851_v4  ;;  %vm995_vm6 = vmpackc.low %vm3422_vm4, %vm3422_vm4  ;;  %v1961_v16 = vsel %vm4843_vm0, %v1958_v59, %v1960_v7 }
  0x31   : > { %vm1336_vm5 = vcmp.ne.s16.totalorder %v3416_v9, 0  ;;  %v1627_v17 = vrot.slane %v1351_v13, 1  ;;  %v335_v20 = vor.u32 %v333_v12, %v332_v11  ;;  %v458_v21 = vadd.s32 88, %v3234_v1 }
  0x32   : > { %v3443_v22 = vsel %vm1336_vm5, %v3369_v32, 0  ;;  %v2966_v23 = vcombine.low %v1023_v15, %v3247_v5  ;;  %v1025_v26 = vsel %vm995_vm6, 65537, %v4851_v4  ;;  %v460_v28 = vadd.s32 104, %v3234_v1 }
  0x33   : > { %1745 = vrot.lane.b32.xlu1 %v1467_v52, %s3201_s27  ;;  %1909 = vrot.lane.b32.xlu0 %v1467_v52, %s3202_s28  ;;  %v560_v27 = vand.u32 15, %v458_v21  ;;  %v1628_v35 = vsel %vm4843_vm0, %v1625_v24, %v1627_v17  ;;  %v1629_v36 = vrot.slane %v3443_v22, 1  ;;  %v3457_v38 = vsel %vm4845_vm2, %v3329_v8, %v335_v20  ;;  %v3175_v21 = vld [vmem:[%s3244_s17 + $0x30] sm:$0xff]  }
  0x34   : > { %vm3459_vm7 = vcmp.ne.s16.totalorder %v2966_v23, 0  ;;  %v2967_v42 = vcombine.low %v1025_v26, %v3247_v5  ;;  %v338_v43 = vshrl.u32 %v3174_v25, 16  ;;  %v574_v18 = vand.u32 15, %v460_v28 }
  0x35   : > { %vm3464_vm8 = vcmp.le.s32.totalorder %v560_v27, 14  ;;  %v1476_v24 = vshrl.u32 %v3369_v32, 16  ;;  %v1480_v8 = vshll.u32 %v3457_v38, 16  ;;  %v1630_v44 = vsel %vm4843_vm0, %v1627_v17, %v1629_v36 }
  0x36   : > { %v1375_v45 = vsel %vm3459_vm7, %v3307_v51, 0  ;;  %vm3478_vm11 = vcmp.ne.s16.totalorder %v2967_v42, 0  ;;  %v1393_v47 = vsel %vm1335_vm15, %v3369_v32, 0  ;;  %v3485_v48 = vrot.slane %v338_v43, 7  ;;  %vm1201_vm12 = vmpackc.low %vm3464_vm8, %vm3464_vm8 }
  0x37   : > { %1911 = vrot.lane.b32.xlu1 %v1475_v2, %s3202_s28  ;;  %1989 = vrot.lane.b32.xlu0 %v1959_v6, %s3203_s29  ;;  %v341_v49 = vshll.u32 %v3174_v25, 16  ;;  %vm3490_vm13 = vcmp.le.s32.totalorder %v574_v18, 14  ;;  %v1482_v53 = vrot.slane %v1480_v8, 1  ;;  %v1376_v54 = vsel %vm3478_vm11, %v3369_v32, 0 }
  0x38   : > { %v1797_v55 = vrot.slane %v1393_v47, 1  ;;  %v1233_v56 = vsel %vm1201_vm12, 65537, %v4851_v4  ;;  %v3503_v57 = vsel %vm1336_vm5, %v3457_v38, 0  ;;  %vm1203_vm14 = vmpackc.low %vm3490_vm13, %vm3490_vm13  ;;  %v455_v10 = vadd.s32 64, %v3234_v1 }
  0x39   : > { %v343_v59 = vor.u32 %v341_v49, %v3485_v48  ;;  %v2985_v61 = vcombine.low %v3247_v5, %v1233_v56  ;;  %v1799_v3 = vrot.slane %v3503_v57, 1  ;;  %v1235_v6 = vsel %vm1203_vm14, 65537, %v4851_v4  ;;  %v3176_v56 = vld [vmem:[%s3244_s17 + $0x38] sm:$0xff]  }
  0x3a   : > { %v1798_v0 = vsel %vm4843_vm0, %v1795_v31, %v1797_v55  ;;  %v1409_v19 = vsel %vm3459_vm7, %v3369_v32, 0  ;;  %v2986_v31 = vcombine.low %v3247_v5, %v1235_v6  ;;  %v457_v13 = vadd.s32 80, %v3234_v1 }
  0x3b   : > { %1576 = vrot.lane.b32.xlu1 %v1467_v52, %s3198_s20  ;;  %1991 = vrot.lane.b32.xlu0 %v1961_v16, %s3203_s29  ;;  %v1478_v52 = vor.u32 %v1476_v24, %v1474_v58  ;;  %v3520_v12 = vsel %vm4845_vm2, %v332_v11, %v343_v59  ;;  %v1800_v15 = vsel %vm4843_vm0, %v1797_v55, %v1799_v3  ;;  %v1484_v11 = vshrl.u32 %v3457_v38, 16 }
  0x3c   : > { %v1488_v16 = vshll.u32 %v3520_v12, 16  ;;  %v539_v17 = vand.u32 15, %v455_v10  ;;  %v1426_v20 = vsel %vm1335_vm15, %v3457_v38, 0  ;;  %v1410_v23 = vsel %vm3478_vm11, %v3457_v38, 0 }
  0x3d   : > { %v1483_v58 = vsel %vm4844_vm9, %v1478_v52, %v1482_v53  ;;  %v3547_v26 = vrot.slane %v2986_v31, 7  ;;  %v553_v27 = vand.u32 15, %v457_v13  ;;  %v1486_v28 = vor.u32 %v1484_v11, %v1482_v53 }
  0x3e   : > { %v1962_v62 = vrot.slane %v1426_v20, 1  ;;  %vm3549_vm15 = vcmp.ge.s32.totalorder %v539_v17, 1  ;;  %v3556_v43 = vsel %vm1336_vm5, %v3520_v12, 0  ;;  %v346_v39 = vshrl.u32 %v3175_v21, 16 }
  0x3f   : > { %1578 = vrot.lane.b32.xlu1 %v1475_v2, %s3198_s20  ;;  %1659 = vrot.lane.b32.xlu0 %v1628_v35, %s3199_s23  ;;  %v1490_v35 = vrot.slane %v1488_v16, 1  ;;  %vm997_vm4 = vmpackc.low %vm3549_vm15, %vm3549_vm15  ;;  %vm3568_vm6 = vcmp.ge.s32.totalorder %v553_v27, 1  ;;  %v1964_v8 = vrot.slane %v3556_v43, 1  ;;  %v349_v47 = vshll.u32 %v3175_v21, 16 }
  0x40   : > { %v1963_v24 = vsel %vm4843_vm0, %v1960_v7, %v1962_v62  ;;  %v1027_v49 = vsel %vm997_vm4, 65537, %v4851_v4  ;;  %vm999_vm8 = vmpackc.low %vm3568_vm6, %vm3568_vm6  ;;  %v462_v60 = vadd.s32 120, %v3234_v1  ;;  %v354_v31 = vshrl.u32 %v3176_v56, 16  ;;  %v3182_v16 = vld [vmem:[%s4840_s1 + $0x10] ss:$0 sps:$4 sm:$0x33]  }
  0x41   : > { %v1491_v9 = vsel %vm4844_vm9, %v1486_v28, %v1490_v35  ;;  %v1965_v7 = vsel %vm4843_vm0, %v1962_v62, %v1964_v8  ;;  %v2968_v53 = vcombine.low %v1027_v49, %v3247_v5  ;;  %v357_v21 = vshll.u32 %v3176_v56, 16 }
  0x42   : > { %v588_v59 = vand.u32 15, %v462_v60  ;;  %v3642_v20 = vrot.slane %v354_v31, 7  ;;  %vm2353_vm6 = vcmask 1041408  }
  0x43   : > { %1661 = vrot.lane.b32.xlu1 %v1630_v44, %s3199_s23  ;;  %1707 = vrot.lane.b32.xlu0 %v1375_v45, %s3196_s18  ;;  %v3580_v45 = vrot.slane %v346_v39, 7  ;;  %vm3610_vm12 = vcmp.ne.s16.totalorder %v2968_v53, 0 }
  0x44   : > { %vm3618_vm13 = vcmp.le.s32.totalorder %v588_v59, 14  ;;  %3147 = vmatprep.subr.msk.bf16.mxu0 %vm2353_vm6, %v3182_v16  ;;  %3148 = vmatprep.subr.msk.bf16.mxu1 %vm2353_vm6, %v3182_v16 }
  0x45   : > { %v351_v55 = vor.u32 %v349_v47, %v3580_v45  ;;  %vm1205_vm15 = vmpackc.low %vm3618_vm13, %vm3618_vm13 }
  0x46   : > { %v1237_v18 = vsel %vm1205_vm15, 65537, %v4851_v4 }
  0x47   : > { %1709 = vrot.lane.b32.xlu1 %v1376_v54, %s3196_s18  ;;  %1747 = vrot.lane.b32.xlu0 %v1475_v2, %s3201_s27  ;;  %v1311_v2 = vrot.slane %v2985_v61, 7  ;;  %v1029_v54 = vsel %vm999_vm8, 65537, %v4851_v4  ;;  %v464_v61 = vadd.s32 136, %v3234_v1  ;;  %v2987_v47 = vcombine.low %v3247_v5, %v1237_v18 }
  0x48   : > { %v2969_v10 = vcombine.low %v1029_v54, %v3247_v5 }
  0x49   : > { %v3545_v25 = vsel %vm4846_vm3, %v3407_v63, %v1311_v2  ;;  %v3563_v63 = vsel %vm4846_vm3, %v1311_v2, %v3547_v26  ;;  %v3616_v2 = vsel %vm4845_vm2, %v3485_v48, %v351_v55  ;;  %v602_v22 = vand.u32 15, %v464_v61 }
  0x4a   : > { %vm1337_vm1 = vcmp.ne.s16.totalorder %v3545_v25, 0  ;;  %vm1338_vm5 = vcmp.ne.s16.totalorder %v3563_v63, 0  ;;  %v1377_v48 = vsel %vm3610_vm12, %v3457_v38, 0  ;;  %vm3631_vm14 = vcmp.ne.s16.totalorder %v2969_v10, 0 }
  0x4b   : > { %1749 = vrot.lane.b32.xlu1 %v1483_v58, %s3201_s27  ;;  %1829 = vrot.lane.b32.xlu0 %v1798_v0, %s3200_s24  ;;  %v1353_v44 = vsel %vm1337_vm1, %v3457_v38, 0  ;;  %v3596_v52 = vsel %vm1338_vm5, %v3520_v12, 0  ;;  %v1496_v11 = vshll.u32 %v3616_v2, 16  ;;  %v1395_v17 = vsel %vm1337_vm1, %v3520_v12, 0 }
  0x4c   : > { %v1631_v50 = vrot.slane %v1353_v44, 1  ;;  %v1633_v6 = vrot.slane %v3596_v52, 1  ;;  %vm3647_vm4 = vcmp.le.s32.totalorder %v602_v22, 14  ;;  %v1378_v27 = vsel %vm3631_vm14, %v3520_v12, 0 }
  0x4d   : > { %v1498_v62 = vrot.slane %v1496_v11, 1  ;;  %v1801_v42 = vrot.slane %v1395_v17, 1  ;;  %v3659_v39 = vsel %vm1338_vm5, %v3616_v2, 0  ;;  %vm1207_vm8 = vmpackc.low %vm3647_vm4, %vm3647_vm4  ;;  %v2355_v44 = vsel %vm2353_vm6, %v3182_v16, 0 }
  0x4e   : > { %v1632_v0 = vsel %vm4843_vm0, %v1629_v36, %v1631_v50  ;;  %v1492_v36 = vshrl.u32 %v3520_v12, 16  ;;  %v1634_v13 = vsel %vm4843_vm0, %v1631_v50, %v1633_v6  ;;  %v459_v50 = vadd.s32 96, %v3234_v1  ;;  %3108 = vmatpush3.bf16.msra.mxu0 %v2355_v44  ;;  %3146 = vmatpush3.bf16.msra.mxu1 %v2355_v44 }
  0x4f   : > { %1831 = vrot.lane.b32.xlu1 %v1800_v15, %s3200_s24  ;;  %1877 = vrot.lane.b32.xlu0 %v1409_v19, %s3197_s19  ;;  %v1802_v60 = vsel %vm4843_vm0, %v1799_v3, %v1801_v42  ;;  %v1500_v53 = vshrl.u32 %v3616_v2, 16  ;;  %v1411_v3 = vsel %vm3610_vm12, %v3520_v12, 0  ;;  %v1315_v54 = vrot.slane %v2987_v47, 7 }
  0x50   : > { %v1494_v28 = vor.u32 %v1492_v36, %v1490_v35  ;;  %v1803_v35 = vrot.slane %v3659_v39, 1  ;;  %v1428_v56 = vsel %vm1337_vm1, %v3616_v2, 0  ;;  %v567_v59 = vand.u32 15, %v459_v50 }
  0x51   : > { %v461_v61 = vadd.s32 112, %v3234_v1  ;;  %v1412_v10 = vsel %vm3631_vm14, %v3616_v2, 0  ;;  %v1502_v31 = vor.u32 %v1500_v53, %v1498_v62  ;;  %v3708_v25 = vsel %vm4846_vm3, %v3547_v26, %v1315_v54 }
  0x52   : > { %v1499_v49 = vsel %vm4844_vm9, %v1494_v28, %v1498_v62  ;;  %v1804_v57 = vsel %vm4843_vm0, %v1801_v42, %v1803_v35  ;;  %vm3712_vm1 = vcmp.ge.s32.totalorder %v567_v59, 1  ;;  %vm1339_vm13 = vcmp.ne.s16.totalorder %v3708_v25, 0  ;;  %v3178_v42 = vld [vmem:[%s3244_s17 + $0x48] sm:$0xff]  }
  0x53   : > { %1879 = vrot.lane.b32.xlu1 %v1410_v23, %s3197_s19  ;;  %1913 = vrot.lane.b32.xlu0 %v1483_v58, %s3202_s28  ;;  %v581_v11 = vand.u32 15, %v461_v61  ;;  %v466_v28 = vadd.s32 152, %v3234_v1  ;;  %v468_v47 = vadd.s32 168, %v3234_v1  ;;  %v373_v61 = vshll.u32 %v3178_v42, 16 }
  0x54   : > { %v1115_v19 = vsel %vm3631_vm14, %v3457_v38, 0  ;;  %vm5035_vm14 = vcmask 130048  }
  0x55   : > { %vm3733_vm15 = vcmp.ge.s32.totalorder %v581_v11, 1  ;;  %v616_v50 = vand.u32 15, %v466_v28  ;;  %v474_v28 = vadd.s32 216, %v3234_v1 }
  0x56   : > { %vm1003_vm6 = vmpackc.low %vm3733_vm15, %vm3733_vm15 }
  0x57   : > { %1915 = vrot.lane.b32.xlu1 %v1491_v9, %s3202_s28  ;;  %1993 = vrot.lane.b32.xlu0 %v1963_v24, %s3203_s29  ;;  %v359_v24 = vor.u32 %v357_v21, %v3642_v20  ;;  %v1033_v53 = vsel %vm1003_vm6, 65537, %v4851_v4 }
  0x5b   : > { %1580 = vrot.lane.b32.xlu1 %v1483_v58, %s3198_s20  ;;  %1995 = vrot.lane.b32.xlu0 %v1965_v7, %s3203_s29  ;;  %v1239_v7 = vsel %vm1207_vm8, 65537, %v4851_v4  ;;  %v1966_v58 = vrot.slane %v1428_v56, 1 }
  0x5c   : > { %v2988_v55 = vcombine.low %v3247_v5, %v1239_v7 }
  0x5d   : > { %v1967_v26 = vsel %vm4843_vm0, %v1964_v8, %v1966_v58 }
  0x5e   : > { %v3710_v36 = vrot.slane %v2988_v55, 7 }
  0x5f   : > { %1582 = vrot.lane.b32.xlu1 %v1491_v9, %s3198_s20  ;;  %1663 = vrot.lane.b32.xlu0 %v1632_v0, %s3199_s23  ;;  %v3177_v0 = vld [vmem:[%s3244_s17 + $0x40] sm:$0xff]  }
  0x60   : > { %v362_v16 = vshrl.u32 %v3177_v0, 16  ;;  %v3725_v17 = vsel %vm4846_vm3, %v1315_v54, %v3710_v36  ;;  %v365_v8 = vshll.u32 %v3177_v0, 16 }
  0x61   : > { %vm1340_vm4 = vcmp.ne.s16.totalorder %v3725_v17, 0 }
  0x62   : > { %v3737_v43 = vrot.slane %v362_v16, 7 }
  0x63   : > { %1665 = vrot.lane.b32.xlu1 %v1634_v13, %s3199_s23  ;;  %1711 = vrot.lane.b32.xlu0 %v1377_v48, %s3196_s18 }
  0x64   : > { %v367_v44 = vor.u32 %v365_v8, %v3737_v43 }
  0x66   : > { %v3772_v55 = vsel %vm4845_vm2, %v3642_v20, %v367_v44 }
  0x67   : > { %1713 = vrot.lane.b32.xlu1 %v1378_v27, %s3196_s18  ;;  %1751 = vrot.lane.b32.xlu0 %v1491_v9, %s3201_s27  ;;  %v3678_v9 = vsel %vm4845_vm2, %v3580_v45, %v359_v24  ;;  %v1355_v27 = vsel %vm1339_vm13, %v3616_v2, 0  ;;  %4912 = vst [vmem:[#allocation4_spill] sm:$0xff] %v3772_v55 }
  0x68   : > { %4907 = vst [vmem:[#allocation3_spill] sm:$0xff] %v3678_v9  ;;  %v1504_v45 = vshll.u32 %v3678_v9, 16  ;;  %v3704_v22 = vsel %vm1338_vm5, %v3678_v9, 0  ;;  %vm1001_vm5 = vmpackc.low %vm3712_vm1, %vm3712_vm1  ;;  %v1635_v24 = vrot.slane %v1355_v27, 1  ;;  %vm3779_vm1 = vcmp.le.s32.totalorder %v616_v50, 14 }
  0x69   : > { %v1968_v63 = vrot.slane %v3704_v22, 1  ;;  %v1031_v62 = vsel %vm1001_vm5, 65537, %v4851_v4  ;;  %v1508_v52 = vshrl.u32 %v3678_v9, 16  ;;  %vm1209_vm5 = vmpackc.low %vm3779_vm1, %vm3779_vm1  ;;  %v1397_v11 = vsel %vm1339_vm13, %v3678_v9, 0 }
  0x6a   : > { %v1506_v13 = vrot.slane %v1504_v45, 1  ;;  %v2970_v7 = vcombine.low %v1031_v62, %v3247_v5  ;;  %v630_v45 = vand.u32 15, %v468_v47  ;;  %v1241_v27 = vsel %vm1209_vm5, 65537, %v4851_v4 }
  0x6b   : > { %1753 = vrot.lane.b32.xlu1 %v1499_v49, %s3201_s27  ;;  %1833 = vrot.lane.b32.xlu0 %v1802_v60, %s3200_s24  ;;  %v1969_v18 = vsel %vm4843_vm0, %v1966_v58, %v1968_v63  ;;  %v3760_v60 = vsel %vm1340_vm4, %v3678_v9, 0  ;;  %v3804_v58 = vld [vmem:[%s3244_s17 + $0x70] sm:$0xff]   ;;  %v1805_v62 = vrot.slane %v1397_v11, 1  ;;  %v465_v47 = vadd.s32 144, %v3234_v1 }
  0x6c   : > { %v3731_v21 = vsel %vm4844_vm9, %v1502_v31, %v1506_v13  ;;  %v4849_v54 = vrot.slane %v3760_v60, 1  ;;  %vm3774_vm8 = vcmp.ne.s16.totalorder %v2970_v7, 0  ;;  %vm3799_vm15 = vcmp.le.s32.totalorder %v630_v45, 14 }
  0x6d   : > { %v1510_v16 = vor.u32 %v1508_v52, %v1506_v13  ;;  %vm1211_vm1 = vmpackc.low %vm3799_vm15, %vm3799_vm15  ;;  %v410_v44 = vshrl.u32 %v3804_v58, 16  ;;  %v421_v7 = vshll.u32 %v3254_v14, 16  ;;  %v2989_v50 = vcombine.low %v3247_v5, %v1241_v27 }
  0x6e   : > { %v1638_v0 = vsel %vm4843_vm0, %v1635_v24, %v4849_v54  ;;  %v1806_v14 = vsel %vm4843_vm0, %v1803_v35, %v1805_v62  ;;  %v1516_v31 = vshrl.u32 %v3772_v55, 16  ;;  %v4939_v54 = vmov 0 }
  0x6f   : > { %1835 = vrot.lane.b32.xlu1 %v1804_v57, %s3200_s24  ;;  %1881 = vrot.lane.b32.xlu0 %v1411_v3, %s3197_s19  ;;  %v370_v57 = vshrl.u32 %v3178_v42, 16  ;;  %v1636_v3 = vsel %vm4843_vm0, %v1633_v6, %v1635_v24  ;;  %v1512_v6 = vshll.u32 %v3772_v55, 16  ;;  %v3828_v42 = vsel %vm1340_vm4, %v3772_v55, 0 }
  0x70   : > { %v476_v24 = vadd.s32 232, %v3234_v1  ;;  %v4848_v45 = vrot.slane %v3828_v42, 1  ;;  %v1319_v11 = vrot.slane %v2989_v50, 7 }
  0x71   : > { %v3788_v20 = vrot.slane %v370_v57, 7  ;;  %v1514_v23 = vrot.slane %v1512_v6, 1 }
  0x72   : > { %v686_v6 = vand.u32 15, %v476_v24  ;;  %v1808_v35 = vsel %vm4843_vm0, %v1805_v62, %v4848_v45  ;;  %v4936_v45 = vmov 0 }
  0x73   : > { %1883 = vrot.lane.b32.xlu1 %v1412_v10, %s3197_s19  ;;  %1917 = vrot.lane.b32.xlu0 %v1499_v49, %s3202_s28  ;;  %v1379_v10 = vsel %vm3774_vm8, %v3616_v2, 0  ;;  %v375_v8 = vor.u32 %v373_v61, %v3788_v20  ;;  %v3851_v61 = vrot.slane %v410_v44, 7 }
  0x75   : > { %v3849_v59 = vsel %vm4845_vm2, %v3737_v43, %v375_v8  ;;  %v1430_v8 = vsel %vm1339_vm13, %v3772_v55, 0 }
  0x76   : > { %4921 = vst [vmem:[#allocation5_spill] sm:$0xff] %v3849_v59  ;;  %v1520_v43 = vshll.u32 %v3849_v59, 16  ;;  %v1970_v50 = vrot.slane %v1430_v8, 1 }
  0x77   : > { %1919 = vrot.lane.b32.xlu1 %v3731_v21, %s3202_s28  ;;  %1997 = vrot.lane.b32.xlu0 %v1967_v26, %s3203_s29  ;;  %v463_v26 = vadd.s32 128, %v3234_v1 }
  0x79   : > { %v595_v57 = vand.u32 15, %v463_v26 }
  0x7b   : > { %1584 = vrot.lane.b32.xlu1 %v1499_v49, %s3198_s20  ;;  %1999 = vrot.lane.b32.xlu0 %v1969_v18, %s3203_s29  ;;  %v2971_v49 = vcombine.low %v1033_v53, %v3247_v5  ;;  %v3181_v18 = vld [vmem:[%s3244_s17 + $0x50] sm:$0xff]   ;;  %v1243_v53 = vsel %vm1211_vm1, 65537, %v4851_v4  ;;  %vm3856_vm5 = vcmp.ge.s32.totalorder %v595_v57, 1  ;;  %vm3881_vm1 = vcmp.le.s32.totalorder %v686_v6, 14 }
  0x7c   : > { %v378_v52 = vshrl.u32 %v3181_v18, 16  ;;  %vm1005_vm0 = vmpackc.low %vm3856_vm5, %vm3856_vm5 }
  0x7d   : > { %vm3806_vm6 = vcmp.ne.s16.totalorder %v2971_v49, 0  ;;  %v672_v49 = vand.u32 15, %v474_v28  ;;  %v381_v28 = vshll.u32 %v3181_v18, 16  ;;  %v3902_v18 = vsel %vm4846_vm3, %v3710_v36, %v1319_v11  ;;  %vm1219_vm5 = vmpackc.low %vm3881_vm1, %vm3881_vm1 }
  0x7e   : > { %v1380_v13 = vsel %vm3806_vm6, %v3678_v9, 0  ;;  %v3879_v27 = vrot.slane %v378_v52, 7  ;;  %v1414_v36 = vsel %vm3806_vm6, %v3772_v55, 0  ;;  %vm4858_vm13 = vcmp.ne.s16.totalorder %v3902_v18, 0 }
  0x7f   : > { %1586 = vrot.lane.b32.xlu1 %v3731_v21, %s3198_s20  ;;  %1667 = vrot.lane.b32.xlu0 %v1636_v3, %s3199_s23  ;;  %v3841_v3 = vsel %vm4844_vm9, %v1510_v16, %v1514_v23  ;;  %vm3870_vm15 = vcmp.le.s32.totalorder %v672_v49, 14  ;;  %v478_v49 = vadd.s32 248, %v3234_v1  ;;  %vm4931_vm1 = vsmask.f32 7424 }
  0x80   : > { %v383_v17 = vor.u32 %v381_v28, %v3879_v27  ;;  %v1357_v16 = vsel %vm4858_vm13, %v3772_v55, 0  ;;  %v1399_v29 = vsel %vm4858_vm13, %v3849_v59, 0 }
  0x83   : > { %1669 = vrot.lane.b32.xlu1 %v1638_v0, %s3199_s23  ;;  %1715 = vrot.lane.b32.xlu0 %v1379_v10, %s3196_s18  ;;  %v609_v0 = vand.u32 15, %v465_v47  ;;  %v423_v10 = vor.u32 %v421_v7, %v3269_v30  ;;  %v1413_v30 = vsel %vm3774_vm8, %v3678_v9, 0  ;;  %v1518_v47 = vor.u32 %v1516_v31, %v1514_v23 }
  0x84   : > { %v3909_v7 = vrot.slane %v1520_v43, 1  ;;  %v1035_v23 = vsel %vm1005_vm0, 65537, %v4851_v4  ;;  %vm4930_vm0 = vmpackc.low %vm3870_vm15, %vm3870_vm15 }
  0x85   : > { %vm3892_vm9 = vcmp.ge.s32.totalorder %v609_v0, 1  ;;  %v3898_v25 = vsel %vm4845_vm2, %v3851_v61, %v423_v10  ;;  %v1249_v0 = vsel %vm4930_vm0, 65537, %v4851_v4  ;;  %v1251_v10 = vsel %vm1219_vm5, 65537, %v4851_v4 }
  0x86   : > { %vm1007_vm2 = vmpackc.low %vm3892_vm9, %vm3892_vm9  ;;  %v1568_v52 = vshll.u32 %v3898_v25, 16  ;;  %vm4933_vm5 = vsmask.f32 256  ;;  %v2993_v8 = vcombine.low %v3247_v5, %v1249_v0  ;;  %v2994_v28 = vcombine.low %v3247_v5, %v1251_v10 }
  0x87   : > { %1717 = vrot.lane.b32.xlu1 %v1380_v13, %s3196_s18  ;;  %1755 = vrot.lane.b32.xlu0 %v3731_v21, %s3201_s27  ;;  %v2990_v21 = vcombine.low %v3247_v5, %v1243_v53  ;;  %v3914_v53 = vsel %vm1340_vm4, %v3849_v59, 0  ;;  %vm4932_vm4 = vcmask 1046528   ;;  %v3972_v22 = vsel %vm4933_vm5, %v3788_v20, %v383_v17 }
  0x88   : > { %v4847_v6 = vrot.slane %v3914_v53, 1  ;;  %v1971_v39 = vsel %vm4932_vm4, %v1968_v63, %v1970_v50  ;;  %4934 = vst [vmem:[#allocation6_spill] sm:$0xff] %v3972_v22  ;;  %v700_v63 = vand.u32 15, %v478_v49  ;;  %v3976_v13 = vrot.slane %v1568_v52, 1  ;;  %v3991_v52 = vld [vmem:[%s3244_s17 + $0x58] sm:$0xff]  }
  0x89   : > { %v3887_v24 = vrot.slane %v2990_v21, 7  ;;  %v1735_v44 = vshrl.u32 %v3898_v25, 16  ;;  %v1524_v17 = vshrl.u32 %v3849_v59, 16  ;;  %v1528_v49 = vshll.u32 %v3972_v22, 16 }
  0x8a   : > { %vm926_vm9 = vcmp.le.s32.totalorder %v700_v63, 14  ;;  %v1973_v20 = vsel %vm4932_vm4, %v1970_v50, %v4847_v6  ;;  %v1639_v10 = vrot.slane %v1357_v16, 1  ;;  %v4006_v21 = vrot.slane %v2993_v8, 7 }
  0x8b   : > { %1757 = vrot.lane.b32.xlu1 %v3841_v3, %s3201_s27  ;;  %1837 = vrot.lane.b32.xlu0 %v1806_v14, %s3200_s24  ;;  %v3933_v14 = vsel %vm4846_vm3, %v1319_v11, %v3887_v24  ;;  %v3954_v11 = vsel %vm4931_vm1, %v1518_v47, %v3909_v7  ;;  %vm4857_vm3 = vcmask 64512   ;;  %vm1221_vm1 = vmpackc.low %vm926_vm9, %vm926_vm9  ;;  %v1737_v0 = vor.u32 %v1735_v44, %v3976_v13 }
  0x8c   : > { %vm4853_vm15 = vcmp.ne.s16.totalorder %v3933_v14, 0  ;;  %v1329_v44 = vrot.slane %v2994_v28, 7  ;;  %vm4943_vm5 = vcmask 31744   ;;  %v386_v28 = vshrl.u32 %v3991_v52, 16 }
  0x8d   : > { %v3874_v26 = vpop.permute.xlu0 %1703  ;;  %vm4945_vm0 = vcmask 1046528   ;;  %vm4955_vm13 = vcmp.ne.s16.totalorder %v3933_v14, 0 }
  0x8e   : > { %v3885_v62 = vpop.permute.xlu1 %1705 }
  0x8f   : > { %1839 = vrot.lane.b32.xlu1 %v1808_v35, %s3200_s24  ;;  %1885 = vrot.lane.b32.xlu0 %v1413_v30, %s3197_s19  ;;  %v2972_v35 = vcombine.low %v1035_v23, %v3247_v5  ;;  %v1037_v30 = vsel %vm1007_vm2, 65537, %v4851_v4  ;;  %vm2102_vm2 = vcmask 97280   ;;  %v1739_v23 = vshll.u32 %v3284_v37, 16 }
  0x90   : > { %v2973_v47 = vcombine.low %v1037_v30, %v3247_v5  ;;  %v3997_v30 = vsel %vm4853_vm15, %v3849_v59, 0 }
  0x91   : > { %v3922_v57 = vpop.permute.xlu0 %1873  ;;  %v4000_v50 = vrot.slane %v1739_v23, 1  ;;  %vm4002_vm4 = vcmp.ne.s16.totalorder %v2972_v35, 0 }
  0x92   : > { %v3948_v31 = vpop.permute.xlu1 %1875  ;;  %v4937_v45 = vsel %vm4002_vm4, 4294967295, %v4936_v45  ;;  %vm4009_vm9 = vcmp.ne.s16.totalorder %v2973_v47, 0 }
  0x93   : > { %1887 = vrot.lane.b32.xlu1 %v1414_v36, %s3197_s19  ;;  %1921 = vrot.lane.b32.xlu0 %v3841_v3, %s3202_s28  ;;  %v470_v36 = vadd.s32 184, %v3234_v1  ;;  %4935 = vst [vmem:[#allocation7_spill] sm:$0xff] %v4000_v50  ;;  %4938 = vst [vmem:[#allocation8_spill] sm:$0xff] %v4937_v45  ;;  %v4940_v54 = vsel %vm4009_vm9, 4294967295, %v4939_v54  ;;  %v1382_v8 = vsel %vm4009_vm9, %v3849_v59, 0 }
  0x94   : > { %4941 = vst [vmem:[#allocation9_spill] sm:$0xff] %v4940_v54 }
  0x95   : > { %v1573_v43 = vpop.permute.xlu0 %1572  ;;  %v644_v9 = vand.u32 15, %v470_v36  ;;  %v4944_v36 = vrot.slane %v3760_v60, 1 }
  0x96   : > { %v2023_v35 = vsel %vm4943_vm5, 0, %v1573_v43  ;;  %v1381_v43 = vsel %vm4002_vm4, %v3772_v55, 0  ;;  %vm4946_vm5 = vcmask 1040384  }
  0x97   : > { %1923 = vrot.lane.b32.xlu1 %v3954_v11, %s3202_s28  ;;  %2001 = vrot.lane.b32.xlu0 %v1971_v39, %s3203_s29  ;;  %v1253_v39 = vsel %vm1221_vm1, 65537, %v4851_v4  ;;  %v472_v4 = vadd.s32 200, %v3234_v1  ;;  %vm4942_vm1 = vsmask.f32 7424  ;;  %v4041_v60 = vsel %vm4946_vm5, %v4006_v21, %v1329_v44 }
  0x98   : > { %v2995_v16 = vcombine.low %v3247_v5, %v1253_v39  ;;  %v4016_v23 = vsel %vm4942_vm1, %v1737_v0, %v4000_v50  ;;  %v1640_v39 = vsel %vm4945_vm0, %v4944_v36, %v1639_v10  ;;  %v1526_v0 = vor.u32 %v1524_v17, %v3909_v7  ;;  %vm4947_vm0 = vmmov %vm4946_vm5 }
  0x99   : > { %v1656_v63 = vpop.permute.xlu1 %1655  ;;  %v1826_v6 = vpop.permute.xlu0 %1825  ;;  %v4948_v17 = vsel %vm3265_vm10, %v3278_v34, 0  ;;  %vm4949_vm1 = vcmask 31744   ;;  %vm4053_vm15 = vcmp.le.s32.totalorder %v644_v9, 14  ;;  %vm4953_vm5 = vcmask 1046528  }
  0x9a   : > { %v4024_v47 = vrot.slane %v2995_v16, 7  ;;  %v4037_v16 = vrot.slane %v1528_v49, 1  ;;  %v2071_v7 = vsel %vm4857_vm3, %v2023_v35, %v1656_v63  ;;  %v658_v49 = vand.u32 15, %v472_v4 }
  0x9b   : > { %1588 = vrot.lane.b32.xlu1 %v3841_v3, %s3198_s20  ;;  %2003 = vrot.lane.b32.xlu0 %v1973_v20, %s3203_s29  ;;  %v389_v3 = vshll.u32 %v3991_v52, 16  ;;  %v4066_v34 = vrot.slane %v386_v28, 7  ;;  %v2104_v35 = vsel %vm2102_vm2, %v2071_v7, %v3874_v26  ;;  %v4095_v26 = vsel %vm4955_vm13, %v3972_v22, 0 }
  0x9c   : > { %v4045_v36 = vsel %vm4947_vm0, %v1329_v44, %v4024_v47  ;;  %v4952_v44 = vrot.slane %v3997_v30, 1  ;;  %vm4862_vm0 = vcmp.ne.s16.totalorder %v4041_v60, 0  ;;  %vm4963_vm13 = vcmask 1046528  }
  0x9d   : > { %v1658_v20 = vpop.permute.xlu1 %1657  ;;  %v1575_v41 = vpop.permute.xlu0 %1574  ;;  %vm4859_vm10 = vcmp.ne.s16.totalorder %v4045_v36, 0  ;;  %v4085_v28 = vsel %vm4862_vm0, %v3898_v25, 0  ;;  %vm4968_vm0 = vcmask 162816  }
  0x9e   : > { %v2026_v52 = vsel %vm4949_vm1, %v4948_v17, %v1575_v41  ;;  %v1642_v63 = vsel %vm4953_vm5, %v1639_v10, %v4952_v44  ;;  %vm4861_vm1 = vcmp.ne.s16.totalorder %v4024_v47, 0  ;;  %v4075_v4 = vsel %vm4859_vm10, %v3898_v25, 0  ;;  %vm1213_vm5 = vmpackc.low %vm4053_vm15, %vm4053_vm15 }
  0x9f   : > { %1590 = vrot.lane.b32.xlu1 %v3954_v11, %s3198_s20  ;;  %1671 = vrot.lane.b32.xlu0 %v1640_v39, %s3199_s23  ;;  %v2073_v41 = vsel %vm4857_vm3, %v2026_v52, %v1658_v20  ;;  %v1406_v20 = vsel %vm4861_vm1, %v3284_v37, 0  ;;  %vm4954_vm3 = vcmask 130048   ;;  %vm4097_vm10 = vcmp.le.s32.totalorder %v658_v49, 14 }
  0xa0   : > { %v1823_v7 = vrot.slane %v1406_v20, 1  ;;  %vm4958_vm15 = vcmask 162816   ;;  %v2106_v44 = vsel %vm2102_vm2, %v2073_v41, %v3885_v62  ;;  %v4961_v49 = vmov 0  }
  0xa1   : > { %v1828_v9 = vpop.permute.xlu1 %1827  ;;  %v1744_v10 = vpop.permute.xlu0 %1743  ;;  %v1245_v39 = vsel %vm1213_vm5, 65537, %v4961_v49  ;;  %v4864_v50 = vrot.slane %v4085_v28, 1  ;;  %v4962_v20 = vrot.slane %v4075_v4, 1  ;;  %vm4867_vm5 = vcmask 228352  }
  0xa2   : > { %v2137_v17 = vsel %vm4954_vm3, %v2104_v35, %v1744_v10  ;;  %v1809_v10 = vrot.slane %v1399_v29, 1  ;;  %vm4959_vm3 = vcmp.ne.s16.totalorder %v4045_v36, 0  ;;  %vm4966_vm1 = vcmask 195584  }
  0xa3   : > { %1673 = vrot.lane.b32.xlu1 %v1642_v63, %s3199_s23  ;;  %v2170_v52 = vsel %vm4958_vm15, %v2137_v17, %v1826_v6  ;;  %1719 = vrot.lane.b32.xlu0 %v1381_v43, %s3196_s18  ;;  %v4109_v35 = vsel %vm4959_vm3, %v3284_v37, 0  ;;  %v4116_v63 = vsel %vm4963_vm13, %v4962_v20, %v1823_v7  ;;  %v391_v43 = vor.u32 %v389_v3, %v4066_v34  ;;  %vm1215_vm15 = vmpackc.low %vm4097_vm10, %vm4097_vm10 }
  0xa4   : > { %4960 = vst [vmem:[#allocation10_spill] sm:$0xff] %v4109_v35  ;;  %4964 = vst [vmem:[#allocation11_spill] sm:$0xff] %v4116_v63  ;;  %v4863_v6 = vrot.slane %v4109_v35, 1  ;;  %vm4965_vm3 = vcmask 130048   ;;  %v2203_v17 = vsel %vm4966_vm1, %v2170_v52, %v3922_v57  ;;  %v4868_v3 = vrot.slane %v4095_v26, 1 }
  0xa5   : > { %v1746_v62 = vpop.permute.xlu1 %1745  ;;  %v1910_v41 = vpop.permute.xlu0 %1909  ;;  %vm4866_vm10 = vcmask 261120   ;;  %v2991_v55 = vcombine.low %v3247_v5, %v1245_v39  ;;  %vm4969_vm1 = vsmask.f32 7424  ;;  %v4970_v52 = vrot.slane %v3828_v42, 1 }
  0xa6   : > { %v2139_v29 = vsel %vm4965_vm3, %v2106_v44, %v1746_v62  ;;  %v4131_v7 = vsel %vm4963_vm13, %v4864_v50, %v4863_v6  ;;  %v4141_v57 = vsel %vm4969_vm1, %v1526_v0, %v4037_v16  ;;  %vm4971_vm3 = vmmov %vm4963_vm13  ;;  %vm4972_vm13 = vsmask.f32 256 }
  0xa7   : > { %4967 = vst [vmem:[#allocation12_spill] sm:$0xff] %v4131_v7  ;;  %v2172_v20 = vsel %vm4968_vm0, %v2139_v29, %v1828_v9  ;;  %1721 = vrot.lane.b32.xlu1 %v1382_v8, %s3196_s18  ;;  %1759 = vrot.lane.b32.xlu0 %v3954_v11, %s3201_s27  ;;  %v1810_v44 = vsel %vm4971_vm3, %v4970_v52, %v1809_v10  ;;  %v1247_v9 = vsel %vm1215_vm15, 65537, %v4961_v49  ;;  %v467_v8 = vadd.s32 160, %v3234_v1  ;;  %vm4974_vm15 = vmmov %vm4971_vm3 }
  0xa8   : > { %v2236_v11 = vsel %vm4867_vm5, %v2203_v17, %v1910_v41  ;;  %vm4865_vm0 = vcmask 293888   ;;  %v4151_v39 = vsel %vm4972_vm13, %v3879_v27, %v391_v43  ;;  %vm4973_vm1 = vcmask 195584   ;;  %v3184_v17 = vld [vmem:[%s3244_s17 + $0x60] sm:$0xff]  }
  0xa9   : > { %v1912_v62 = vpop.permute.xlu1 %1911  ;;  %v1990_v29 = vpop.permute.xlu0 %1989  ;;  %v2205_v0 = vsel %vm4973_vm1, %v2172_v20, %v3948_v31  ;;  %v1532_v52 = vshrl.u32 %v3972_v22, 16  ;;  %v1812_v41 = vsel %vm4974_vm15, %v1809_v10, %v4868_v3  ;;  %v1415_v27 = vsel %vm4002_vm4, %v3849_v59, 0  ;;  %v3185_v59 = vld [vmem:[%s3244_s17 + $0x68] sm:$0xff]  }
  0xaa   : > { %v2269_v42 = vsel %vm4866_vm10, %v2236_v11, %v1990_v29  ;;  %v1323_v43 = vrot.slane %v2991_v55, 7  ;;  %v2992_v31 = vcombine.low %v3247_v5, %v1247_v9  ;;  %v1536_v20 = vshll.u32 %v4151_v39, 16 }
  0xab   : > { %1761 = vrot.lane.b32.xlu1 %v4141_v57, %s3201_s27  ;;  %1841 = vrot.lane.b32.xlu0 %v1810_v44, %s3200_s24  ;;  %vm4975_vm3 = vcmp.ne.s16.totalorder %v3902_v18, 0  ;;  %v623_v11 = vand.u32 15, %v467_v8  ;;  %v469_v29 = vadd.s32 176, %v3234_v1  ;;  %v2238_v10 = vsel %vm4867_vm5, %v2205_v0, %v1912_v62 }
  0xac   : > { %3109 = vmatprep.mubr.msk.bf16.mxu0 %vm4865_vm0, %v2269_v42  ;;  %v1432_v44 = vsel %vm4975_vm3, %v3972_v22, 0  ;;  %v1416_v9 = vsel %vm4009_vm9, %v3972_v22, 0  ;;  %v1534_v42 = vor.u32 %v1532_v52, %v4037_v16  ;;  %vm4976_vm13 = vcmask 1040384  }
  0xad   : > { %v4175_v6 = vpop.permute.xlu1 %1576  ;;  %v1992_v50 = vpop.permute.xlu0 %1991  ;;  %v1974_v18 = vrot.slane %v1432_v44, 1  ;;  %v4186_v8 = vsel %vm4976_vm13, %v3887_v24, %v1323_v43  ;;  %v4188_v62 = vrot.slane %v2992_v31, 7  ;;  %v394_v0 = vshrl.u32 %v3184_v17, 16 }
  0xae   : > { %v2271_v55 = vsel %vm4866_vm10, %v2238_v10, %v1992_v50  ;;  %v1538_v50 = vrot.slane %v1536_v20, 1  ;;  %vm4977_vm1 = vcmp.ne.s16.totalorder %v3933_v14, 0  ;;  %vm4196_vm15 = vcmp.ge.s32.totalorder %v623_v11, 1 }
  0xaf   : > { %1843 = vrot.lane.b32.xlu1 %v1812_v41, %s3200_s24  ;;  %1889 = vrot.lane.b32.xlu0 %v1415_v27, %s3197_s19  ;;  %v4194_v10 = vsel %vm4977_vm1, %v4151_v39, 0  ;;  %v637_v52 = vand.u32 15, %v469_v29  ;;  %vm1343_vm3 = vcmp.ne.s16.totalorder %v4186_v8, 0  ;;  %v4980_v27 = vrot.slane %v3914_v53, 1 }
  0xb0   : > { %3110 = vmatmul.mubr.msk.bf16.vlgmr.msra.gmra.mrb[0].mxu0 %vm4865_vm0, %v2271_v55  ;;  %vm4981_vm13 = vcmask 1046528   ;;  %v4870_v31 = vrot.slane %v4194_v10, 1  ;;  %vm4982_vm1 = vcmask 1040384   ;;  %vm1009_vm0 = vmpackc.low %vm4196_vm15, %vm4196_vm15  ;;  %vm4983_vm10 = vsmask.f32 7424 }
  0xb1   : > { %v4200_v41 = vpop.permute.xlu1 %1578  ;;  %v1660_v24 = vpop.permute.xlu0 %1659  ;;  %v1975_v14 = vsel %vm4981_vm13, %v4980_v27, %v1974_v18  ;;  %v4212_v20 = vsel %vm4982_vm1, %v1323_v43, %v4188_v62  ;;  %v1539_v44 = vsel %vm4983_vm10, %v1534_v42, %v1538_v50  ;;  %vm4218_vm5 = vcmp.ge.s32.totalorder %v637_v52, 1 }
  0xb2   : > { %v4222_v29 = vrot.slane %v394_v0, 7  ;;  %v397_v53 = vshll.u32 %v3184_v17, 16  ;;  %v1359_v43 = vsel %vm1343_vm3, %v3972_v22, 0  ;;  %vm4876_vm13 = vcmp.ne.s16.totalorder %v4212_v20, 0  ;;  %vm1011_vm10 = vmpackc.low %vm4218_vm5, %vm4218_vm5 }
  0xb3   : > { %1891 = vrot.lane.b32.xlu1 %v1416_v9, %s3197_s19  ;;  %1925 = vrot.lane.b32.xlu0 %v4141_v57, %s3202_s28  ;;  %v1039_v16 = vsel %vm1009_vm0, 65537, %v4961_v49  ;;  %vm4986_vm15 = vcmask 1046528   ;;  %v1643_v42 = vrot.slane %v1359_v43, 1  ;;  %v4241_v3 = vsel %vm4876_vm13, %v4151_v39, 0 }
  0xb4   : > { %v1977_v17 = vsel %vm4986_vm15, %v1974_v18, %v4870_v31  ;;  %v399_v0 = vor.u32 %v397_v53, %v4222_v29  ;;  %v1041_v11 = vsel %vm1011_vm10, 65537, %v4961_v49  ;;  %v4987_v18 = vrot.slane %v3997_v30, 1  ;;  %vm4988_vm5 = vmmov %vm4986_vm15 }
  0xb5   : > { %v1662_v55 = vpop.permute.xlu1 %1661  ;;  %v1708_v9 = vpop.permute.xlu0 %1707  ;;  %v4874_v43 = vrot.slane %v4241_v3, 1  ;;  %vm4989_vm0 = vsmask.f32 256  ;;  %v402_v35 = vshrl.u32 %v3185_v59, 16  ;;  %v1540_v30 = vshrl.u32 %v4151_v39, 16  ;;  %vm4992_vm10 = vmmov %vm4988_vm5 }
  0xb6   : > { %v1644_v53 = vsel %vm4988_vm5, %v4987_v18, %v1643_v42  ;;  %v4255_v31 = vsel %vm4989_vm0, %v4066_v34, %v399_v0  ;;  %v1112_v34 = vsel %vm3459_vm7, %v3276_v33, 0  ;;  %v1401_v7 = vsel %vm1343_vm3, %v4151_v39, 0 }
  0xb7   : > { %1927 = vrot.lane.b32.xlu1 %v1539_v44, %s3202_s28  ;;  %2005 = vrot.lane.b32.xlu0 %v1975_v14, %s3203_s29  ;;  %v2974_v14 = vcombine.low %v1039_v16, %v3247_v5  ;;  %v1646_v0 = vsel %vm4992_vm10, %v1643_v42, %v4874_v43  ;;  %v4282_v40 = vrot.slane %v402_v35, 7  ;;  %v405_v33 = vshll.u32 %v3185_v59, 16 }
  0xb8   : > { %vm4995_vm7 = vcmask 31744   ;;  %v1113_v43 = vsel %vm3478_vm11, %v3307_v51, 0  ;;  %vm4996_vm5 = vcmask 64512   ;;  %v1813_v59 = vrot.slane %v1401_v7, 1 }
  0xb9   : > { %v1710_v52 = vpop.permute.xlu1 %1709  ;;  %v1748_v27 = vpop.permute.xlu0 %1747  ;;  %vm4257_vm1 = vcmp.ne.s16.totalorder %v2974_v14, 0  ;;  %v2029_v42 = vsel %vm4995_vm7, %v1112_v34, %v4175_v6  ;;  %v4298_v6 = vsel %vm4876_vm13, %v4255_v31, 0  ;;  %vm4997_vm11 = vcmask 130048   ;;  %vm4998_vm0 = vmmov %vm4995_vm7 }
  0xba   : > { %v1383_v14 = vsel %vm4257_vm1, %v3972_v22, 0  ;;  %v2075_v63 = vsel %vm4996_vm5, %v2029_v42, %v1660_v24  ;;  %v2032_v24 = vsel %vm4998_vm0, %v1113_v43, %v4200_v41  ;;  %vm4999_vm10 = vcmask 162816  }
  0xbb   : > { %1592 = vrot.lane.b32.xlu1 %v4141_v57, %s3198_s20  ;;  %2007 = vrot.lane.b32.xlu0 %v1977_v17, %s3203_s29  ;;  %v2975_v57 = vcombine.low %v1041_v11, %v3247_v5  ;;  %v1544_v17 = vshll.u32 %v4255_v31, 16  ;;  %v2108_v51 = vsel %vm2102_vm2, %v2075_v63, %v1708_v9  ;;  %vm5000_vm7 = vsmask.f32 7424 }
  0xbc   : > { %v1815_v63 = vrot.slane %v4298_v6, 1  ;;  %v2077_v9 = vsel %vm4996_vm5, %v2032_v24, %v1662_v55  ;;  %vm5001_vm13 = vcmask 195584   ;;  %v471_v41 = vadd.s32 192, %v3234_v1 }
  0xbd   : > { %v1750_v54 = vpop.permute.xlu1 %1749  ;;  %v1830_v16 = vpop.permute.xlu0 %1829  ;;  %vm4275_vm15 = vcmp.ne.s16.totalorder %v2975_v57, 0  ;;  %v1542_v57 = vor.u32 %v1540_v30, %v1538_v50  ;;  %v1546_v22 = vrot.slane %v1544_v17, 1  ;;  %v2141_v50 = vsel %vm4997_vm11, %v2108_v51, %v1748_v27 }
  0xbe   : > { %v1384_v35 = vsel %vm4275_vm15, %v4151_v39, 0  ;;  %v2174_v30 = vsel %vm4999_vm10, %v2141_v50, %v1830_v16  ;;  %v5002_v27 = vrot.slane %v4095_v26, 1  ;;  %vm5003_vm11 = vcmask 1046528  }
  0xbf   : > { %1594 = vrot.lane.b32.xlu1 %v1539_v44, %s3198_s20  ;;  %1675 = vrot.lane.b32.xlu0 %v1644_v53, %s3199_s23  ;;  %v4309_v7 = vsel %vm5000_vm7, %v1542_v57, %v1546_v22  ;;  %v2110_v43 = vsel %vm2102_vm2, %v2077_v9, %v1710_v52  ;;  %vm5004_vm0 = vcmask 228352   ;;  %vm5005_vm10 = vsmask.f32 256 }
  0xc0   : > { %vm5006_vm7 = vcmask 130048   ;;  %vm5007_vm5 = vcmask 261120   ;;  %v1816_v52 = vsel %vm5003_vm11, %v1813_v59, %v1815_v63  ;;  %v1548_v57 = vshrl.u32 %v4255_v31, 16 }
  0xc1   : > { %v1832_v11 = vpop.permute.xlu1 %1831  ;;  %v1878_v18 = vpop.permute.xlu0 %1877  ;;  %v2143_v55 = vsel %vm5006_vm7, %v2110_v43, %v1750_v54  ;;  %v473_v51 = vadd.s32 208, %v3234_v1  ;;  %vm5011_vm7 = vcmask 228352  }
  0xc2   : > { %v2207_v17 = vsel %vm5001_vm13, %v2174_v30, %v1878_v18  ;;  %vm5008_vm13 = vcmask 162816   ;;  %v1550_v30 = vor.u32 %v1548_v57, %v1546_v22 }
  0xc3   : > { %1677 = vrot.lane.b32.xlu1 %v1646_v0, %s3199_s23  ;;  %1723 = vrot.lane.b32.xlu0 %v1383_v14, %s3196_s18  ;;  %v407_v0 = vor.u32 %v405_v33, %v4282_v40  ;;  %v1814_v14 = vsel %vm5003_vm11, %v5002_v27, %v1813_v59  ;;  %v2176_v26 = vsel %vm5008_vm13, %v2143_v55, %v1832_v11  ;;  %v1434_v59 = vsel %vm1343_vm3, %v4255_v31, 0 }
  0xc4   : > { %vm5012_vm13 = vcmask 1040384  }
  0xc5   : > { %v1880_v46 = vpop.permute.xlu1 %1879  ;;  %v1914_v34 = vpop.permute.xlu0 %1913  ;;  %v4322_v42 = vsel %vm5005_vm10, %v4222_v29, %v407_v0  ;;  %v1417_v29 = vsel %vm4257_vm1, %v4151_v39, 0  ;;  %vm5010_vm10 = vcmask 293888   ;;  %v4354_v9 = vsel %vm5012_vm13, %v4188_v62, %v4006_v21 }
  0xc6   : > { %v2240_v16 = vsel %vm5004_vm0, %v2207_v17, %v1914_v34  ;;  %vm5009_vm0 = vcmask 195584   ;;  %v1552_v11 = vshll.u32 %v4322_v42, 16  ;;  %vm5013_vm11 = vmmov %vm5010_vm10  ;;  %v1978_v17 = vrot.slane %v1434_v59, 1 }
  0xc7   : > { %1725 = vrot.lane.b32.xlu1 %v1384_v35, %s3196_s18  ;;  %1763 = vrot.lane.b32.xlu0 %v1539_v44, %s3201_s27  ;;  %v2209_v54 = vsel %vm5009_vm0, %v2176_v26, %v1880_v46  ;;  %v651_v35 = vand.u32 15, %v471_v41  ;;  %v1418_v46 = vsel %vm4275_vm15, %v4255_v31, 0  ;;  %vm5016_vm0 = vcmp.ne.s16.totalorder %v4212_v20, 0 }
  0xc8   : > { %v1554_v8 = vrot.slane %v1552_v11, 1  ;;  %v4364_v22 = vsel %vm5016_vm0, %v4322_v42, 0  ;;  %v413_v21 = vshll.u32 %v3804_v58, 16  ;;  %vm5019_vm13 = vcmask 1046528  }
  0xc9   : > { %v1916_v44 = vpop.permute.xlu1 %1915  ;;  %v1994_v33 = vpop.permute.xlu0 %1993  ;;  %vm4357_vm3 = vcmp.ge.s32.totalorder %v651_v35, 1  ;;  %vm5022_vm0 = vmmov %vm5019_vm13 }
  0xca   : > { %v2273_v18 = vsel %vm5007_vm5, %v2240_v16, %v1994_v33  ;;  %v2242_v34 = vsel %vm5011_vm7, %v2209_v54, %v1916_v44  ;;  %vm1013_vm7 = vmpackc.low %vm4357_vm3, %vm4357_vm3  ;;  %v5018_v16 = vrot.slane %v4194_v10, 1  ;;  %v1980_v44 = vrot.slane %v4364_v22, 1 }
  0xcb   : > { %1765 = vrot.lane.b32.xlu1 %v4309_v7, %s3201_s27  ;;  %1845 = vrot.lane.b32.xlu0 %v1814_v14, %s3200_s24  ;;  %v665_v14 = vand.u32 15, %v473_v51  ;;  %v1043_v26 = vsel %vm1013_vm7, 65537, %v4961_v49  ;;  %v415_v10 = vor.u32 %v413_v21, %v3851_v61  ;;  %vm5023_vm7 = vcmp.ne.s16.totalorder %v4041_v60, 0 }
  0xcc   : > { %3113 = vmatprep.mubr.msk.bf16.mxu0 %vm5010_vm10, %v2273_v18  ;;  %vm4877_vm10 = vcmp.ne.s16.totalorder %v4354_v9, 0  ;;  %v1979_v20 = vsel %vm5019_vm13, %v5018_v16, %v1978_v17  ;;  %v4399_v11 = vsel %vm5023_vm7, %v4322_v42, 0  ;;  %v2976_v35 = vcombine.low %v1043_v26, %v3247_v5 }
  0xcd   : > { %v1581_v0 = vpop.permute.xlu1 %1580  ;;  %v1996_v50 = vpop.permute.xlu0 %1995  ;;  %v1361_v18 = vsel %vm4877_vm10, %v4255_v31, 0  ;;  %v5024_v61 = vrot.slane %v4241_v3, 1  ;;  %vm5026_vm13 = vsmask.f32 256  ;;  %v1556_v3 = vshrl.u32 %v4322_v42, 16 }
  0xce   : > { %v2275_v24 = vsel %vm5007_vm5, %v2242_v34, %v1996_v50  ;;  %vm5017_vm5 = vsmask.f32 7424  ;;  %v1649_v50 = vrot.slane %v4399_v11, 1  ;;  %v4412_v59 = vsel %vm5026_vm13, %v4282_v40, %v415_v10 }
  0xcf   : > { %1847 = vrot.lane.b32.xlu1 %v1816_v52, %s3200_s24  ;;  %1893 = vrot.lane.b32.xlu0 %v1417_v29, %s3197_s19  ;;  %v1555_v62 = vsel %vm5017_vm5, %v1550_v30, %v1554_v8  ;;  %v1981_v52 = vsel %vm5022_vm0, %v1978_v17, %v1980_v44  ;;  %v1647_v29 = vrot.slane %v1361_v18, 1  ;;  %vm5025_vm5 = vmmov %vm5022_vm0  ;;  %v1560_v17 = vshll.u32 %v4412_v59, 16 }
  0xd0   : > { %3114 = vmatmul.mubr.msk.bf16.gmra.mrb[4].mxu0 %vm5013_vm11, %v2275_v24  ;;  %vm4379_vm11 = vcmp.ge.s32.totalorder %v665_v14, 1  ;;  %v1114_v40 = vsel %vm3610_vm12, %v3369_v32, 0  ;;  %v1403_v33 = vsel %vm4877_vm10, %v4322_v42, 0  ;;  %vm5032_vm7 = vcmask 31744  }
  0xd1   : > { %v1583_v41 = vpop.permute.xlu1 %1582  ;;  %v1664_v43 = vpop.permute.xlu0 %1663  ;;  %vm1015_vm3 = vmpackc.low %vm4379_vm11, %vm4379_vm11  ;;  %v1648_v34 = vsel %vm5025_vm5, %v5024_v61, %v1647_v29  ;;  %vm4414_vm11 = vcmp.ne.s16.totalorder %v2976_v35, 0  ;;  %v2035_v32 = vsel %vm5032_vm7, %v1114_v40, %v1581_v0  ;;  %v1558_v18 = vor.u32 %v1556_v3, %v1554_v8 }
  0xd2   : > { %v1045_v51 = vsel %vm1015_vm3, 65537, %v4961_v49  ;;  %vm5029_vm3 = vmmov %vm5022_vm0  ;;  %v1385_v14 = vsel %vm4414_vm11, %v4255_v31, 0  ;;  %v1562_v26 = vrot.slane %v1560_v17, 1  ;;  %vm5033_vm12 = vcmask 64512  }
  0xd3   : > { %1895 = vrot.lane.b32.xlu1 %v1418_v46, %s3197_s19  ;;  %1929 = vrot.lane.b32.xlu0 %v4309_v7, %s3202_s28  ;;  %v1650_v27 = vsel %vm5029_vm3, %v1647_v29, %v1649_v50  ;;  %v2079_v10 = vsel %vm5033_vm12, %v2035_v32, %v1664_v43  ;;  %v1817_v29 = vrot.slane %v1403_v33, 1  ;;  %vm5034_vm5 = vcmp.ne.s16.totalorder %v4041_v60, 0  ;;  %vm5036_vm13 = vmmov %vm5032_vm7 }
  0xd4   : > { %v4452_v0 = vsel %vm5034_vm5, %v4412_v59, 0  ;;  %v2038_v8 = vsel %vm5036_vm13, %v1115_v19, %v1583_v41  ;;  %vm5037_vm3 = vcmask 162816   ;;  %vm5038_vm7 = vsmask.f32 7424 }
  0xd5   : > { %v1666_v58 = vpop.permute.xlu1 %1665  ;;  %v1712_v55 = vpop.permute.xlu0 %1711  ;;  %v1563_v61 = vsel %vm5038_vm7, %v1558_v18, %v1562_v26  ;;  %v1819_v60 = vrot.slane %v4452_v0, 1  ;;  %vm5039_vm5 = vcmask 195584   ;;  %vm5040_vm10 = vcmask 1046528  }
  0xd6   : > { %v2112_v38 = vsel %vm2102_vm2, %v2079_v10, %v1712_v55  ;;  %v475_v41 = vadd.s32 224, %v3234_v1  ;;  %vm5042_vm13 = vcmask 130048   ;;  %vm5044_vm7 = vcmask 162816  }
  0xd7   : > { %1931 = vrot.lane.b32.xlu1 %v1555_v62, %s3202_s28  ;;  %2009 = vrot.lane.b32.xlu0 %v1979_v20, %s3203_s29  ;;  %v1419_v6 = vsel %vm4414_vm11, %v4322_v42, 0 }
  0xd9   : > { %v1714_v57 = vpop.permute.xlu1 %1713  ;;  %v1752_v54 = vpop.permute.xlu0 %1751 }
  0xdb   : > { %1596 = vrot.lane.b32.xlu1 %v4309_v7, %s3198_s20  ;;  %2011 = vrot.lane.b32.xlu0 %v1981_v52, %s3203_s29  ;;  %v2977_v7 = vcombine.low %v1045_v51, %v3247_v5  ;;  %v2145_v51 = vsel %vm5035_vm14, %v2112_v38, %v1752_v54  ;;  %v1818_v54 = vsel %vm5040_vm10, %v1815_v63, %v1817_v29  ;;  %vm5041_vm14 = vcmask 228352   ;;  %vm5045_vm10 = vmmov %vm5039_vm5 }
  0xdc   : > { %v1564_v63 = vshrl.u32 %v4412_v59, 16 }
  0xdd   : > { %v1754_v24 = vpop.permute.xlu1 %1753  ;;  %v1834_v46 = vpop.permute.xlu0 %1833  ;;  %vm4432_vm0 = vcmp.ne.s16.totalorder %v2977_v7, 0 }
  0xde   : > { %v1386_v52 = vsel %vm4432_vm0, %v4322_v42, 0  ;;  %v2178_v43 = vsel %vm5037_vm3, %v2145_v51, %v1834_v46  ;;  %vm5043_vm3 = vcmask 261120   ;;  %v1566_v18 = vor.u32 %v1564_v63, %v1562_v26 }
  0xdf   : > { %1598 = vrot.lane.b32.xlu1 %v1555_v62, %s3198_s20  ;;  %1679 = vrot.lane.b32.xlu0 %v1648_v34, %s3199_s23  ;;  %v2081_v34 = vsel %vm5033_vm12, %v2038_v8, %v1666_v58  ;;  %vm5046_vm12 = vcmask 1046528   ;;  %v1420_v10 = vsel %vm4432_vm0, %v4412_v59, 0 }
  0xe0   : > { %v2114_v46 = vsel %vm2102_vm2, %v2081_v34, %v1714_v57 }
  0xe1   : > { %v1836_v21 = vpop.permute.xlu1 %1835  ;;  %v1882_v16 = vpop.permute.xlu0 %1881  ;;  %v2147_v17 = vsel %vm5042_vm13, %v2114_v46, %v1754_v24  ;;  %v1820_v24 = vsel %vm5046_vm12, %v1817_v29, %v1819_v60  ;;  %vm5048_vm13 = vcmp.ne.s16.totalorder %v4354_v9, 0 }
  0xe2   : > { %v2211_v55 = vsel %vm5039_vm5, %v2178_v43, %v1882_v16  ;;  %v2180_v58 = vsel %vm5044_vm7, %v2147_v17, %v1836_v21  ;;  %vm5047_vm5 = vcmask 293888   ;;  %v1436_v32 = vsel %vm5048_vm13, %v4412_v59, 0 }
  0xe3   : > { %1681 = vrot.lane.b32.xlu1 %v1650_v27, %s3199_s23  ;;  %1727 = vrot.lane.b32.xlu0 %v1385_v14, %s3196_s18  ;;  %v679_v27 = vand.u32 15, %v475_v41  ;;  %v477_v14 = vadd.s32 240, %v3234_v1  ;;  %vm5049_vm7 = vmmov %vm5047_vm5  ;;  %v1982_v1 = vrot.slane %v1436_v32, 1 }
  0xe5   : > { %v1884_v15 = vpop.permute.xlu1 %1883  ;;  %v1918_v35 = vpop.permute.xlu0 %1917 }
  0xe6   : > { %v2244_v7 = vsel %vm5041_vm14, %v2211_v55, %v1918_v35  ;;  %v2213_v57 = vsel %vm5045_vm10, %v2180_v58, %v1884_v15  ;;  %vm891_vm10 = vcmp.ge.s32.totalorder %v679_v27, 1 }
  0xe7   : > { %1729 = vrot.lane.b32.xlu1 %v1386_v52, %s3196_s18  ;;  %1767 = vrot.lane.b32.xlu0 %v1555_v62, %s3201_s27  ;;  %v693_v52 = vand.u32 15, %v477_v14  ;;  %vm1017_vm12 = vmpackc.low %vm891_vm10, %vm891_vm10  ;;  %v5069_v14 = vrot.slane %v4075_v4, 1 }
  0xe8   : > { %v1047_v8 = vsel %vm1017_vm12, 65537, %v4961_v49 }
  0xe9   : > { %v1920_v3 = vpop.permute.xlu1 %1919  ;;  %v1998_v62 = vpop.permute.xlu0 %1997  ;;  %vm893_vm13 = vcmp.ge.s32.totalorder %v693_v52, 1 }
  0xea   : > { %v2277_v40 = vsel %vm5043_vm3, %v2244_v7, %v1998_v62  ;;  %v2246_v21 = vsel %vm5041_vm14, %v2213_v57, %v1920_v3  ;;  %vm5051_vm14 = vcmask 1046528  }
  0xeb   : > { %1769 = vrot.lane.b32.xlu1 %v1563_v61, %s3201_s27  ;;  %1849 = vrot.lane.b32.xlu0 %v1818_v54, %s3200_s24  ;;  %v1983_v26 = vsel %vm5051_vm14, %v1980_v44, %v1982_v1  ;;  %vm5054_vm10 = vmmov %vm5051_vm14 }
  0xec   : > { %3117 = vmatprep.mubr.msk.bf16.mxu0 %vm5047_vm5, %v2277_v40  ;;  %vm5050_vm5 = vsmask.f32 7424  ;;  %vm5056_vm12 = vmmov %vm5054_vm10 }
  0xed   : > { %v1585_v16 = vpop.permute.xlu1 %1584  ;;  %v2000_v33 = vpop.permute.xlu0 %1999  ;;  %v1571_v9 = vsel %vm5050_vm5, %v1566_v18, %v3976_v13  ;;  %v5053_v13 = vrot.slane %v4085_v28, 1  ;;  %vm5055_vm5 = vcmp.ne.s16.totalorder %v4024_v47, 0 }
  0xee   : > { %v2279_v19 = vsel %vm5043_vm3, %v2246_v21, %v2000_v33  ;;  %vm5052_vm3 = vcmp.ne.s16.totalorder %v4045_v36, 0  ;;  %v1364_v55 = vsel %vm5055_vm5, %v3898_v25, 0  ;;  %v2978_v36 = vcombine.low %v1047_v8, %v3247_v5 }
  0xef   : > { %1851 = vrot.lane.b32.xlu1 %v1820_v24, %s3200_s24  ;;  %1897 = vrot.lane.b32.xlu0 %v1419_v6, %s3197_s19  ;;  %v1363_v51 = vsel %vm5052_vm3, %v4412_v59, 0  ;;  %v1985_v22 = vsel %vm5054_vm10, %v1982_v1, %v5053_v13  ;;  %v1653_v41 = vrot.slane %v1364_v55, 1  ;;  %v5080_v13 = vld [vmem:[#allocation2_spill] sm:$0xff] }
  0xf0   : > { %3118 = vmatmul.mubr.msk.bf16.gmra.mrb[8].mxu0 %vm5049_vm7, %v2279_v19  ;;  %vm1019_vm7 = vmpackc.low %vm893_vm13, %vm893_vm13  ;;  %v1651_v43 = vrot.slane %v1363_v51, 1  ;;  %vm4522_vm14 = vcmp.ne.s16.totalorder %v2978_v36, 0 }
  0xf1   : > { %v1587_v29 = vpop.permute.xlu1 %1586  ;;  %v1668_v38 = vpop.permute.xlu0 %1667  ;;  %v1049_v54 = vsel %vm1019_vm7, 65537, %v4961_v49  ;;  %v1116_v49 = vsel %vm3774_vm8, %v3520_v12, 0  ;;  %vm5059_vm13 = vmmov %vm5054_vm10  ;;  %vm5062_vm7 = vcmask 31744   ;;  %v1117_v12 = vsel %vm3806_vm6, %v3616_v2, 0 }
  0xf2   : > { %v1652_v28 = vsel %vm5056_vm12, %v1649_v50, %v1651_v43  ;;  %v2979_v47 = vcombine.low %v1049_v54, %v3247_v5  ;;  %v1654_v11 = vsel %vm5059_vm13, %v1651_v43, %v1653_v41  ;;  %v1387_v50 = vsel %vm4522_vm14, %v4412_v59, 0  ;;  %vm5065_vm5 = vmmov %vm5062_vm7 }
  0xf3   : > { %1899 = vrot.lane.b32.xlu1 %v1420_v10, %s3197_s19  ;;  %1933 = vrot.lane.b32.xlu0 %v1563_v61, %s3202_s28  ;;  %v2041_v5 = vsel %vm5062_vm7, %v1116_v49, %v1585_v16  ;;  %vm5063_vm8 = vcmask 64512   ;;  %vm5064_vm10 = vcmask 130048   ;;  %v2044_v24 = vsel %vm5065_vm5, %v1117_v12, %v1587_v29 }
  0xf4   : > { %vm4536_vm3 = vcmp.ne.s16.totalorder %v2979_v47, 0  ;;  %v2083_v56 = vsel %vm5063_vm8, %v2041_v5, %v1668_v38  ;;  %vm5066_vm12 = vcmask 162816   ;;  %vm5067_vm6 = vmmov %vm5063_vm8  ;;  %vm5068_vm13 = vcmask 195584  }
  0xf5   : > { %v1670_v15 = vpop.permute.xlu1 %1669  ;;  %v1716_v35 = vpop.permute.xlu0 %1715  ;;  %v1388_v40 = vsel %vm4536_vm3, %v3898_v25, 0  ;;  %vm5070_vm7 = vcmask 1046528   ;;  %vm5071_vm8 = vcmask 228352   ;;  %vm5072_vm5 = vcmask 261120  }
  0xf6   : > { %v2116_v58 = vsel %vm2102_vm2, %v2083_v56, %v1716_v35  ;;  %v2085_v2 = vsel %vm5067_vm6, %v2044_v24, %v1670_v15  ;;  %v1822_v21 = vsel %vm5070_vm7, %v1819_v60, %v5069_v14  ;;  %vm5073_vm6 = vmmov %vm5068_vm13  ;;  %v1421_v0 = vsel %vm4522_vm14, %v3898_v25, 0  ;;  %v5079_v25 = vld [vmem:[#allocation7_spill] sm:$0xff] }
  0xf7   : > { %1935 = vrot.lane.b32.xlu1 %v1571_v9, %s3202_s28  ;;  %2013 = vrot.lane.b32.xlu0 %v1983_v26, %s3203_s29  ;;  %v1905_v60 = vshrl.u32 %v3284_v37, 16  ;;  %vm5075_vm7 = vmmov %vm5071_vm8  ;;  %v5077_v26 = vld [vmem:[#allocation11_spill] sm:$0xff]  ;;  %v1422_v15 = vsel %vm4536_vm3, %v3284_v37, 0  ;;  %v5082_v37 = vld [vmem:[#allocation12_spill] sm:$0xff] }
  0xf9   : > { %v1718_v44 = vpop.permute.xlu1 %1717  ;;  %v1756_v34 = vpop.permute.xlu0 %1755  ;;  %v1907_v35 = vor.u32 %v1905_v60, %v5079_v25  ;;  %v5106_v25 = vld [vmem:[#allocation5_spill] sm:$0xff] }
  0xfa   : > { %v2149_v57 = vsel %vm5064_vm10, %v2116_v58, %v1756_v34  ;;  %v2118_v16 = vsel %vm2102_vm2, %v2085_v2, %v1718_v44  ;;  %v5083_v34 = vld [vmem:[#allocation10_spill] sm:$0xff] }
  0xfb   : > { %1600 = vrot.lane.b32.xlu1 %v1563_v61, %s3198_s20  ;;  %2015 = vrot.lane.b32.xlu0 %v1985_v22, %s3203_s29  ;;  %v5084_v55 = vrot.slane %v5083_v34, 1 }
  0xfd   : > { %v1758_v46 = vpop.permute.xlu1 %1757  ;;  %v1838_v7 = vpop.permute.xlu0 %1837 }
  0xfe   : > { %v2182_v27 = vsel %vm5066_vm12, %v2149_v57, %v1838_v7  ;;  %v2151_v18 = vsel %vm5064_vm10, %v2118_v16, %v1758_v46  ;;  %v5086_v46 = vld [vmem:[#allocation3_spill] sm:$0xff] }
  0xff   : > { %1602 = vrot.lane.b32.xlu1 %v1571_v9, %s3198_s20  ;;  %1683 = vrot.lane.b32.xlu0 %v1652_v28, %s3199_s23  ;;  %v1118_v47 = vsel %vm4002_vm4, %v5086_v46, 0 }
 0x101   : > { %v1840_v61 = vpop.permute.xlu1 %1839  ;;  %v1886_v62 = vpop.permute.xlu0 %1885 }
 0x102   : > { %v2215_v48 = vsel %vm5068_vm13, %v2182_v27, %v1886_v62  ;;  %v2184_v1 = vsel %vm5066_vm12, %v2151_v18, %v1840_v61  ;;  %vm5074_vm13 = vcmask 293888   ;;  %vm5085_vm12 = vcmask 1046528   ;;  %v5089_v61 = vld [vmem:[#allocation4_spill] sm:$0xff] }
 0x103   : > { %1685 = vrot.lane.b32.xlu1 %v1654_v11, %s3199_s23  ;;  %1731 = vrot.lane.b32.xlu0 %v1387_v50, %s3196_s18  ;;  %vm5078_vm10 = vmmov %vm5074_vm13  ;;  %v1988_v36 = vsel %vm5085_vm12, %v5084_v55, %v5080_v13  ;;  %v1119_v5 = vsel %vm4009_vm9, %v5089_v61, 0  ;;  %vm5097_vm12 = vcmask 228352  }
 0x105   : > { %v1888_v6 = vpop.permute.xlu1 %1887  ;;  %v1922_v63 = vpop.permute.xlu0 %1921 }
 0x106   : > { %v2248_v33 = vsel %vm5071_vm8, %v2215_v48, %v1922_v63  ;;  %v2217_v4 = vsel %vm5073_vm6, %v2184_v1, %v1888_v6  ;;  %vm5076_vm8 = vmmov %vm5072_vm5  ;;  %vm5088_vm6 = vcmask 31744  }
 0x107   : > { %1733 = vrot.lane.b32.xlu1 %v1388_v40, %s3196_s18  ;;  %1771 = vrot.lane.b32.xlu0 %v1571_v9, %s3201_s27 }
 0x109   : > { %v1924_v32 = vpop.permute.xlu1 %1923  ;;  %v2002_v19 = vpop.permute.xlu0 %2001 }
 0x10a   : > { %v2281_v10 = vsel %vm5072_vm5, %v2248_v33, %v2002_v19  ;;  %v2250_v52 = vsel %vm5075_vm7, %v2217_v4, %v1924_v32  ;;  %vm5081_vm5 = vsmask.f32 7424  ;;  %vm5092_vm7 = vcmask 130048  }
 0x10b   : > { %1773 = vrot.lane.b32.xlu1 %v4016_v23, %s3201_s27  ;;  %1853 = vrot.lane.b32.xlu0 %v1822_v21, %s3200_s24  ;;  %v1908_v22 = vsel %vm5081_vm5, %v1907_v35, %v5080_v13  ;;  %vm5096_vm5 = vcmask 195584   ;;  %vm5098_vm9 = vmmov %vm5092_vm7  ;;  %v1120_v35 = vsel %vm4257_vm1, %v5106_v25, 0 }
 0x10c   : > { %3121 = vmatprep.mubr.msk.bf16.mxu0 %vm5074_vm13, %v2281_v10  ;;  %vm5091_vm13 = vcmask 64512  }
 0x10d   : > { %v1589_v29 = vpop.permute.xlu1 %1588  ;;  %v2004_v38 = vpop.permute.xlu0 %2003  ;;  %vm5095_vm4 = vmmov %vm5091_vm13 }
 0x10e   : > { %v2283_v9 = vsel %vm5076_vm8, %v2250_v52, %v2004_v38  ;;  %v2047_v50 = vsel %vm5088_vm6, %v1118_v47, %v1589_v29  ;;  %vm5093_vm8 = vmmov %vm5088_vm6  ;;  %vm5099_vm6 = vcmask 261120  }
 0x10f   : > { %1855 = vrot.lane.b32.xlu1 %v5077_v26, %s3200_s24  ;;  %1901 = vrot.lane.b32.xlu0 %v1421_v0, %s3197_s19 }
 0x110   : > { %3122 = vmatmul.mubr.msk.bf16.gmra.mrb[12].mxu0 %vm5078_vm10, %v2283_v9  ;;  %vm5094_vm10 = vcmask 162816  }
 0x111   : > { %v1591_v51 = vpop.permute.xlu1 %1590  ;;  %v1672_v8 = vpop.permute.xlu0 %1671 }
 0x112   : > { %v2087_v12 = vsel %vm5091_vm13, %v2047_v50, %v1672_v8  ;;  %v2050_v63 = vsel %vm5093_vm8, %v1119_v5, %v1591_v51  ;;  %vm5100_vm13 = vmmov %vm5094_vm10 }
 0x113   : > { %1903 = vrot.lane.b32.xlu1 %v1422_v15, %s3197_s19  ;;  %1937 = vrot.lane.b32.xlu0 %v4016_v23, %s3202_s28  ;;  %vm5102_vm8 = vmmov %vm5096_vm5 }
 0x115   : > { %v1674_v43 = vpop.permute.xlu1 %1673  ;;  %v1720_v44 = vpop.permute.xlu0 %1719 }
 0x116   : > { %v2120_v56 = vsel %vm2102_vm2, %v2087_v12, %v1720_v44  ;;  %v2089_v24 = vsel %vm5095_vm4, %v2050_v63, %v1674_v43  ;;  %vm5104_vm4 = vmmov %vm5099_vm6 }
 0x117   : > { %1939 = vrot.lane.b32.xlu1 %v1908_v22, %s3202_s28  ;;  %2017 = vrot.lane.b32.xlu0 %v5082_v37, %s3203_s29  ;;  %v5108_v22 = vld [vmem:[#allocation6_spill] sm:$0xff] }
 0x118   : > { %v1121_v43 = vsel %vm4275_vm15, %v5108_v22, 0 }
 0x119   : > { %v1722_v54 = vpop.permute.xlu1 %1721  ;;  %v1760_v28 = vpop.permute.xlu0 %1759 }
 0x11a   : > { %v2153_v6 = vsel %vm5092_vm7, %v2120_v56, %v1760_v28  ;;  %v2122_v2 = vsel %vm2102_vm2, %v2089_v24, %v1722_v54  ;;  %vm5101_vm7 = vcmask 293888  }
 0x11b   : > { %2019 = vrot.lane.b32.xlu1 %v1988_v36, %s3203_s29 }
 0x11d   : > { %v1762_v23 = vpop.permute.xlu1 %1761  ;;  %v1842_v41 = vpop.permute.xlu0 %1841 }
 0x11e   : > { %v2186_v57 = vsel %vm5094_vm10, %v2153_v6, %v1842_v41  ;;  %v2155_v16 = vsel %vm5098_vm9, %v2122_v2, %v1762_v23  ;;  %vm5103_vm10 = vmmov %vm5097_vm12  ;;  %vm5109_vm9 = vcmask 64512   ;;  %v1122_v2 = vsel %vm4414_vm11, %v4151_v39, 0 }
 0x11f   : > { %vm5113_vm1 = vmmov %vm5109_vm9 }
 0x121   : > { %v1844_v49 = vpop.permute.xlu1 %1843  ;;  %v1890_v11 = vpop.permute.xlu0 %1889 }
 0x122   : > { %v2219_v27 = vsel %vm5096_vm5, %v2186_v57, %v1890_v11  ;;  %v2188_v32 = vsel %vm5100_vm13, %v2155_v16, %v1844_v49  ;;  %vm5105_vm5 = vmmov %vm5101_vm7  ;;  %v1123_v16 = vsel %vm4432_vm0, %v4255_v31, 0 }
 0x125   : > { %v1892_v40 = vpop.permute.xlu1 %1891  ;;  %v1926_v58 = vpop.permute.xlu0 %1925 }
 0x126   : > { %v2252_v48 = vsel %vm5097_vm12, %v2219_v27, %v1926_v58  ;;  %v2221_v19 = vsel %vm5102_vm8, %v2188_v32, %v1892_v40  ;;  %vm5107_vm12 = vcmask 31744  }
 0x127   : > { %vm5111_vm13 = vmmov %vm5107_vm12 }
 0x129   : > { %v1928_v14 = vpop.permute.xlu1 %1927  ;;  %v2006_v21 = vpop.permute.xlu0 %2005 }
 0x12a   : > { %v2285_v33 = vsel %vm5099_vm6, %v2252_v48, %v2006_v21  ;;  %v2254_v18 = vsel %vm5103_vm10, %v2221_v19, %v1928_v14  ;;  %vm5110_vm6 = vcmask 130048  }
 0x12b   : > { %3125 = vmatprep.mubr.msk.bf16.mxu1 %vm5101_vm7, %v2285_v33  ;;  %vm5112_vm7 = vcmask 162816   ;;  %vm5114_vm15 = vmmov %vm5110_vm6 }
 0x12d   : > { %v1593_v10 = vpop.permute.xlu1 %1592  ;;  %v2008_v1 = vpop.permute.xlu0 %2007 }
 0x12e   : > { %v2287_v4 = vsel %vm5104_vm4, %v2254_v18, %v2008_v1  ;;  %v2053_v13 = vsel %vm5107_vm12, %v1120_v35, %v1593_v10  ;;  %vm5116_vm12 = vcmask 293888  }
 0x12f   : > { %3126 = vmatmul.mubr.msk.bf16.vlgmr.msra.gmra.mrb[0].mxu1 %vm5105_vm5, %v2287_v4  ;;  %vm5115_vm5 = vmmov %vm5112_vm7 }
 0x131   : > { %v1595_v0 = vpop.permute.xlu1 %1594  ;;  %v1676_v60 = vpop.permute.xlu0 %1675 }
 0x132   : > { %v2091_v44 = vsel %vm5109_vm9, %v2053_v13, %v1676_v60  ;;  %v2056_v54 = vsel %vm5111_vm13, %v1121_v43, %v1595_v0  ;;  %vm5117_vm9 = vmmov %vm5102_vm8 }
 0x133   : > { %vm5119_vm13 = vmmov %vm5104_vm4 }
 0x135   : > { %v1678_v52 = vpop.permute.xlu1 %1677  ;;  %v1724_v29 = vpop.permute.xlu0 %1723 }
 0x136   : > { %v2124_v37 = vsel %vm2102_vm2, %v2091_v44, %v1724_v29  ;;  %v2093_v28 = vsel %vm5113_vm1, %v2056_v54, %v1678_v52  ;;  %vm5121_vm1 = vcmask 31744  }
 0x139   : > { %v1726_v38 = vpop.permute.xlu1 %1725  ;;  %v1764_v9 = vpop.permute.xlu0 %1763 }
 0x13a   : > { %v2157_v36 = vsel %vm5110_vm6, %v2124_v37, %v1764_v9  ;;  %v2126_v41 = vsel %vm2102_vm2, %v2093_v28, %v1726_v38  ;;  %vm5118_vm6 = vmmov %vm5103_vm10 }
 0x13d   : > { %v1766_v26 = vpop.permute.xlu1 %1765  ;;  %v1846_v15 = vpop.permute.xlu0 %1845 }
 0x13e   : > { %v2190_v45 = vsel %vm5112_vm7, %v2157_v36, %v1846_v15  ;;  %v2159_v47 = vsel %vm5114_vm15, %v2126_v41, %v1766_v26  ;;  %vm5120_vm7 = vmmov %vm5116_vm12  ;;  %v1125_v36 = vsel %vm4536_vm3, %v4412_v59, 0 }
 0x141   : > { %v1848_v51 = vpop.permute.xlu1 %1847  ;;  %v1894_v8 = vpop.permute.xlu0 %1893 }
 0x142   : > { %v2223_v23 = vsel %vm5102_vm8, %v2190_v45, %v1894_v8  ;;  %v2192_v11 = vsel %vm5115_vm5, %v2159_v47, %v1848_v51  ;;  %vm5122_vm8 = vcmask 64512  }
 0x143   : > { %vm5126_vm11 = vmmov %vm5122_vm8 }
 0x145   : > { %v1896_v34 = vpop.permute.xlu1 %1895  ;;  %v1930_v55 = vpop.permute.xlu0 %1929 }
 0x146   : > { %v2256_v53 = vsel %vm5103_vm10, %v2223_v23, %v1930_v55  ;;  %v2225_v50 = vsel %vm5117_vm9, %v2192_v11, %v1896_v34  ;;  %vm5123_vm10 = vmmov %vm5114_vm15  ;;  %v1124_v55 = vsel %vm4522_vm14, %v4322_v42, 0  ;;  %vm5138_vm14 = vcmask 64512  }
 0x147   : > { %vm5124_vm15 = vmmov %vm5121_vm1 }
 0x148   : > { %vm5129_vm0 = vmmov %vm5123_vm10 }
 0x149   : > { %v1932_v46 = vpop.permute.xlu1 %1931  ;;  %v2010_v7 = vpop.permute.xlu0 %2009  ;;  %vm5139_vm3 = vmmov %vm5138_vm14 }
 0x14a   : > { %v2289_v49 = vsel %vm5104_vm4, %v2256_v53, %v2010_v7  ;;  %v2258_v61 = vsel %vm5118_vm6, %v2225_v50, %v1932_v46  ;;  %vm5125_vm4 = vmmov %vm5115_vm5 }
 0x14b   : > { %3129 = vmatprep.mubr.msk.bf16.mxu1 %vm5116_vm12, %v2289_v49  ;;  %vm5127_vm5 = vmmov %vm5117_vm9 }
 0x14c   : > { %vm5128_vm12 = vmmov %vm5118_vm6 }
 0x14d   : > { %v1597_v62 = vpop.permute.xlu1 %1596  ;;  %v2012_v5 = vpop.permute.xlu0 %2011  ;;  %vm5130_vm9 = vmmov %vm5119_vm13 }
 0x14e   : > { %v2291_v12 = vsel %vm5119_vm13, %v2258_v61, %v2012_v5  ;;  %v2059_v21 = vsel %vm5121_vm1, %v1122_v2, %v1597_v62  ;;  %vm5131_vm6 = vmmov %vm5125_vm4 }
 0x14f   : > { %3130 = vmatmul.mubr.msk.bf16.gmra.mrb[4].mxu1 %vm5120_vm7, %v2291_v12  ;;  %vm5132_vm13 = vmmov %vm5120_vm7 }
 0x150   : > { %vm5133_vm7 = vmmov %vm5127_vm5 }
 0x151   : > { %v1599_v56 = vpop.permute.xlu1 %1598  ;;  %v1680_v40 = vpop.permute.xlu0 %1679  ;;  %vm5134_vm1 = vmmov %vm5128_vm12 }
 0x152   : > { %v2095_v33 = vsel %vm5122_vm8, %v2059_v21, %v1680_v40  ;;  %v2062_v1 = vsel %vm5124_vm15, %v1123_v16, %v1599_v56  ;;  %vm5135_vm8 = vmmov %vm5130_vm9 }
 0x155   : > { %v1682_v58 = vpop.permute.xlu1 %1681  ;;  %v1728_v6 = vpop.permute.xlu0 %1727 }
 0x156   : > { %v2128_v32 = vsel %vm2102_vm2, %v2095_v33, %v1728_v6  ;;  %v2097_v30 = vsel %vm5126_vm11, %v2062_v1, %v1682_v58  ;;  %vm5137_vm11 = vmmov %vm5124_vm15 }
 0x159   : > { %v1730_v63 = vpop.permute.xlu1 %1729  ;;  %v1768_v57 = vpop.permute.xlu0 %1767 }
 0x15a   : > { %v2161_v10 = vsel %vm5123_vm10, %v2128_v32, %v1768_v57  ;;  %v2130_v0 = vsel %vm2102_vm2, %v2097_v30, %v1730_v63  ;;  %vm5136_vm10 = vmmov %vm5132_vm13 }
 0x15d   : > { %v1770_v24 = vpop.permute.xlu1 %1769  ;;  %v1850_v27 = vpop.permute.xlu0 %1849 }
 0x15e   : > { %v2194_v39 = vsel %vm5125_vm4, %v2161_v10, %v1850_v27  ;;  %v2163_v52 = vsel %vm5129_vm0, %v2130_v0, %v1770_v24  ;;  %vm2820_vm4 = vcmask 27648  }
 0x161   : > { %v1852_v48 = vpop.permute.xlu1 %1851  ;;  %v1898_v14 = vpop.permute.xlu0 %1897 }
 0x162   : > { %v2227_v4 = vsel %vm5127_vm5, %v2194_v39, %v1898_v14  ;;  %v2196_v38 = vsel %vm5131_vm6, %v2163_v52, %v1852_v48  ;;  %vm5140_vm5 = vmmov %vm5129_vm0 }
 0x163   : > { %vm5142_vm0 = vmmov %vm5137_vm11 }
 0x165   : > { %v1900_v19 = vpop.permute.xlu1 %1899  ;;  %v1934_v18 = vpop.permute.xlu0 %1933 }
 0x166   : > { %v2260_v31 = vsel %vm5128_vm12, %v2227_v4, %v1934_v18  ;;  %v2229_v9 = vsel %vm5133_vm7, %v2196_v38, %v1900_v19  ;;  %vm5141_vm12 = vmmov %vm5131_vm6 }
 0x167   : > { %vm5145_vm6 = vmmov %vm5133_vm7 }
 0x168   : > { %vm5147_vm7 = vmmov %vm5142_vm0 }
 0x169   : > { %v1936_v20 = vpop.permute.xlu1 %1935  ;;  %v2014_v60 = vpop.permute.xlu0 %2013 }
 0x16a   : > { %v2293_v29 = vsel %vm5130_vm9, %v2260_v31, %v2014_v60  ;;  %v2262_v26 = vsel %vm5134_vm1, %v2229_v9, %v1936_v20  ;;  %vm5143_vm9 = vmmov %vm5142_vm0 }
 0x16b   : > { %3133 = vmatprep.mubr.msk.bf16.mxu1 %vm5132_vm13, %v2293_v29  ;;  %vm5146_vm13 = vmmov %vm5142_vm0 }
 0x16d   : > { %v1601_v15 = vpop.permute.xlu1 %1600  ;;  %v2016_v25 = vpop.permute.xlu0 %2015 }
 0x16e   : > { %v2295_v35 = vsel %vm5135_vm8, %v2262_v26, %v2016_v25  ;;  %v2065_v28 = vsel %vm5124_vm15, %v1124_v55, %v1601_v15  ;;  %vm5148_vm8 = vmmov %vm5142_vm0 }
 0x16f   : > { %3134 = vmatmul.mubr.msk.bf16.gmra.mrb[8].mxu1 %vm5136_vm10, %v2295_v35  ;;  %vm5149_vm10 = vmmov %vm5141_vm12 }
 0x170   : > { %vm5150_vm15 = vmmov %vm5142_vm0 }
 0x171   : > { %v1603_v51 = vpop.permute.xlu1 %1602  ;;  %v1684_v8 = vpop.permute.xlu0 %1683 }
 0x172   : > { %v2068_v3 = vsel %vm5137_vm11, %v1125_v36, %v1603_v51  ;;  %v2099_v42 = vsel %vm5138_vm14, %v2065_v28, %v1684_v8  ;;  %vm5151_vm11 = vcmask 261120   ;;  %vm5152_vm14 = vmmov %vm5145_vm6 }
 0x175   : > { %v1686_v13 = vpop.permute.xlu1 %1685  ;;  %v1732_v22 = vpop.permute.xlu0 %1731 }
 0x176   : > { %v2101_v41 = vsel %vm5139_vm3, %v2068_v3, %v1686_v13  ;;  %v2132_v53 = vsel %vm2102_vm2, %v2099_v42, %v1732_v22  ;;  %vm5153_vm3 = vmmov %vm5142_vm0 }
 0x179   : > { %v1734_v43 = vpop.permute.xlu1 %1733  ;;  %v1772_v44 = vpop.permute.xlu0 %1771 }
 0x17a   : > { %v2134_v49 = vsel %vm2102_vm2, %v2101_v41, %v1734_v43  ;;  %v2165_v11 = vsel %vm5140_vm5, %v2132_v53, %v1772_v44  ;;  %vm5144_vm2 = vmmov %vm5140_vm5  ;;  %vm5154_vm5 = vcmask 293888  }
 0x17d   : > { %v1774_v37 = vpop.permute.xlu1 %1773  ;;  %v1854_v34 = vpop.permute.xlu0 %1853 }
 0x17e   : > { %v2198_v5 = vsel %vm5141_vm12, %v2165_v11, %v1854_v34  ;;  %v2167_v24 = vsel %vm5144_vm2, %v2134_v49, %v1774_v37  ;;  %vm5155_vm12 = vmmov %vm5134_vm1 }
 0x17f   : > { %vm5157_vm2 = vmmov %vm5154_vm5 }
 0x181   : > { %v1856_v54 = vpop.permute.xlu1 %1855  ;;  %v1902_v45 = vpop.permute.xlu0 %1901 }
 0x182   : > { %v2231_v27 = vsel %vm5145_vm6, %v2198_v5, %v1902_v45  ;;  %v2200_v18 = vsel %vm5149_vm10, %v2167_v24, %v1856_v54  ;;  %vm5158_vm6 = vmmov %vm5142_vm0 }
 0x183   : > { %v3111_v23 = vpop.f32.mrb[0].mxu0  ;;  %vm5163_vm10 = vmmov %vm5142_vm0 }
 0x184   : > { %v3054_v17 = vpack.c.bf16 %v3111_v23, %v3111_v23  ;;  %v2391_v59 = vpop.f32.mrb[1].mxu0  ;;  %v2589_v58 = vmul.f32 %v3111_v23, %v3111_v23  ;;  %v2521_v2 = vsel %vm5146_vm13, %v3111_v23, 0.0  ;;  %vm5159_vm13 = vmmov %vm5142_vm0 }
 0x185   : > { %v1904_v46 = vpop.permute.xlu1 %1903  ;;  %v3052_v7 = vpack.c.bf16 %v2391_v59, %v2391_v59  ;;  %v3112_v47 = vpop.f32.mrb[2].mxu0  ;;  %v2587_v50 = vmul.f32 %v2391_v59, %v2391_v59  ;;  %v2518_v12 = vsel %vm5142_vm0, %v2391_v59, 0.0 }
 0x186   : > { %2823 = vst.msk [vmem:[%s4684_s7 + $0x8] sm:$0xf] %vm2820_vm4, %v3054_v17  ;;  %v1938_v61 = vpop.permute.xlu0 %1937  ;;  %v2394_v62 = vpop.f32.mrb[3].mxu0  ;;  %v3055_v56 = vpack.c.bf16 %v3112_v47, %v3112_v47  ;;  %v2590_v48 = vmul.f32 %v3112_v47, %v3112_v47  ;;  %v2523_v10 = vsel %vm5150_vm15, %v3112_v47, 0.0  ;;  %v2233_v30 = vsel %vm5152_vm14, %v2200_v18, %v1904_v46  ;;  %vm5164_vm15 = vmmov %vm5142_vm0 }
 0x187   : > { %2821 = vst.msk [vmem:[%s4684_s7] sm:$0xf] %vm2820_vm4, %v3052_v7  ;;  %v2519_v40 = vsel %vm5143_vm9, %v2394_v62, 0.0  ;;  %v2588_v63 = vmul.f32 %v2394_v62, %v2394_v62  ;;  %v3053_v57 = vpack.c.bf16 %v2394_v62, %v2394_v62  ;;  %v2619_v21 = vsel %vm5147_vm7, %v2587_v50, 0.0  ;;  %vm5156_vm9 = vmmov %vm5151_vm11 }
 0x188   : > { %v2520_v6 = vadd.f32 %v2519_v40, %v2518_v12  ;;  %2824 = vst.msk [vmem:[%s4684_s7 + $0xc] sm:$0xf] %vm2820_vm4, %v3055_v56  ;;  %v2264_v16 = vsel %vm5134_vm1, %v2231_v27, %v1938_v61  ;;  %v2622_v4 = vsel %vm5153_vm3, %v2589_v58, 0.0  ;;  %v2624_v52 = vsel %vm5142_vm0, %v2590_v48, 0.0  ;;  %vm5160_vm7 = vmmov %vm5142_vm0 }
 0x189   : > { %v1940_v14 = vpop.permute.xlu1 %1939  ;;  %v2620_v32 = vsel %vm5148_vm8, %v2588_v63, 0.0  ;;  %2822 = vst.msk [vmem:[%s4684_s7 + $0x4] sm:$0xf] %vm2820_vm4, %v3053_v57  ;;  %vm5161_vm1 = vmmov %vm5142_vm0 }
 0x18a   : > { %v2522_v33 = vadd.f32 %v2521_v2, %v2520_v6  ;;  %v2018_v19 = vpop.permute.xlu0 %2017  ;;  %v2621_v1 = vadd.f32 %v2620_v32, %v2619_v21  ;;  %v2266_v31 = vsel %vm5155_vm12, %v2233_v30, %v1940_v14  ;;  %vm5162_vm8 = vmmov %vm5142_vm0 }
 0x18b   : > { %v2297_v39 = vsel %vm5151_vm11, %v2264_v16, %v2018_v19  ;;  %vm5165_vm11 = vmmov %vm5142_vm0 }
 0x18c   : > { %3137 = vmatprep.mubr.msk.bf16.mxu1 %vm5154_vm5, %v2297_v39  ;;  %v2524_v0 = vadd.f32 %v2523_v10, %v2522_v33  ;;  %v2623_v20 = vadd.f32 %v2622_v4, %v2621_v1  ;;  %vm5166_vm14 = vmmov %vm5142_vm0 }
 0x18d   : > { %v2020_v60 = vpop.permute.xlu1 %2019  ;;  %vm5167_vm3 = vmmov %vm5142_vm0 }
 0x18e   : > { %v2299_v29 = vsel %vm5156_vm9, %v2266_v31, %v2020_v60  ;;  %v2625_v38 = vadd.f32 %v2624_v52, %v2623_v20  ;;  %vm5168_vm5 = vmmov %vm5142_vm0 }
 0x18f   : > { %3138 = vmatmul.mubr.msk.bf16.gmra.mrb[12].mxu1 %vm5157_vm2, %v2299_v29  ;;  %vm5169_vm12 = vmmov %vm5142_vm0 }
 0x190   : > { %vm5170_vm9 = vmmov %vm5142_vm0 }
 0x191   : > { %vm5171_vm2 = vmmov %vm5142_vm0 }
 0x1a3   : > { %v3115_v9 = vpop.f32.mrb[4].mxu0 }
 0x1a4   : > { %v3058_v26 = vpack.c.bf16 %v3115_v9, %v3115_v9  ;;  %v2407_v15 = vpop.f32.mrb[5].mxu0  ;;  %v2593_v13 = vmul.f32 %v3115_v9, %v3115_v9  ;;  %v2529_v28 = vsel %vm5161_vm1, %v3115_v9, 0.0  ;;  %vm5175_vm1 = vmmov %vm5142_vm0 }
 0x1a5   : > { %v2525_v25 = vsel %vm5158_vm6, %v2407_v15, 0.0  ;;  %v2591_v35 = vmul.f32 %v2407_v15, %v2407_v15  ;;  %v3056_v51 = vpack.c.bf16 %v2407_v15, %v2407_v15  ;;  %v3116_v8 = vpop.f32.mrb[6].mxu0  ;;  %vm5172_vm6 = vmmov %vm5142_vm0 }
 0x1a6   : > { %2827 = vst.msk [vmem:[%s4684_s7 + $0x18] sm:$0xf] %vm2820_vm4, %v3058_v26  ;;  %v2526_v22 = vadd.f32 %v2525_v25, %v2524_v0  ;;  %v2410_v43 = vpop.f32.mrb[7].mxu0  ;;  %v3059_v37 = vpack.c.bf16 %v3116_v8, %v3116_v8  ;;  %v2594_v23 = vmul.f32 %v3116_v8, %v3116_v8  ;;  %v2630_v59 = vsel %vm5163_vm10, %v2593_v13, 0.0  ;;  %vm5177_vm10 = vmmov %vm5142_vm0 }
 0x1a7   : > { %v2626_v44 = vsel %vm5159_vm13, %v2591_v35, 0.0  ;;  %2825 = vst.msk [vmem:[%s4684_s7 + $0x10] sm:$0xf] %vm2820_vm4, %v3056_v51  ;;  %v2527_v34 = vsel %vm5160_vm7, %v2410_v43, 0.0  ;;  %v2592_v55 = vmul.f32 %v2410_v43, %v2410_v43  ;;  %v3057_v45 = vpack.c.bf16 %v2410_v43, %v2410_v43  ;;  %vm5173_vm13 = vmmov %vm5142_vm0 }
 0x1a8   : > { %v2627_v36 = vadd.f32 %v2626_v44, %v2625_v38  ;;  %v2528_v54 = vadd.f32 %v2527_v34, %v2526_v22  ;;  %2828 = vst.msk [vmem:[%s4684_s7 + $0x1c] sm:$0xf] %vm2820_vm4, %v3059_v37  ;;  %v2531_v41 = vsel %vm5164_vm15, %v3116_v8, 0.0  ;;  %v2632_v7 = vsel %vm5165_vm11, %v2594_v23, 0.0  ;;  %vm5174_vm7 = vmmov %vm5142_vm0 }
 0x1a9   : > { %v2628_v3 = vsel %vm5162_vm8, %v2592_v55, 0.0  ;;  %2826 = vst.msk [vmem:[%s4684_s7 + $0x14] sm:$0xf] %vm2820_vm4, %v3057_v45  ;;  %vm5176_vm8 = vmmov %vm5142_vm0 }
 0x1aa   : > { %v2530_v42 = vadd.f32 %v2529_v28, %v2528_v54  ;;  %v2629_v17 = vadd.f32 %v2628_v3, %v2627_v36  ;;  %vm5178_vm15 = vmmov %vm5142_vm0 }
 0x1ab   : > { %vm5179_vm11 = vmmov %vm5142_vm0 }
 0x1ac   : > { %v2631_v53 = vadd.f32 %v2630_v59, %v2629_v17  ;;  %v2532_v46 = vadd.f32 %v2531_v41, %v2530_v42 }
 0x1ae   : > { %v2633_v47 = vadd.f32 %v2632_v7, %v2631_v53 }
 0x1c3   : > { %v3119_v49 = vpop.f32.mrb[8].mxu0 }
 0x1c4   : > { %v3062_v11 = vpack.c.bf16 %v3119_v49, %v3119_v49  ;;  %v2423_v50 = vpop.f32.mrb[9].mxu0  ;;  %v2597_v56 = vmul.f32 %v3119_v49, %v3119_v49  ;;  %v2537_v14 = vsel %vm5169_vm12, %v3119_v49, 0.0  ;;  %vm5183_vm12 = vmmov %vm5142_vm0 }
 0x1c5   : > { %v2533_v61 = vsel %vm5166_vm14, %v2423_v50, 0.0  ;;  %v2595_v62 = vmul.f32 %v2423_v50, %v2423_v50  ;;  %v3060_v5 = vpack.c.bf16 %v2423_v50, %v2423_v50  ;;  %v3120_v12 = vpop.f32.mrb[10].mxu0  ;;  %vm5180_vm14 = vmmov %vm5142_vm0 }
 0x1c6   : > { %2831 = vst.msk [vmem:[%s4684_s7 + $0x28] sm:$0xf] %vm2820_vm4, %v3062_v11  ;;  %v2534_v40 = vadd.f32 %v2533_v61, %v2532_v46  ;;  %v2426_v58 = vpop.f32.mrb[11].mxu0  ;;  %v3063_v63 = vpack.c.bf16 %v3120_v12, %v3120_v12  ;;  %v2598_v21 = vmul.f32 %v3120_v12, %v3120_v12  ;;  %v2638_v19 = vsel %vm5170_vm9, %v2597_v56, 0.0  ;;  %vm5184_vm9 = vmmov %vm5142_vm0 }
 0x1c7   : > { %v2634_v6 = vsel %vm5167_vm3, %v2595_v62, 0.0  ;;  %2829 = vst.msk [vmem:[%s4684_s7 + $0x20] sm:$0xf] %vm2820_vm4, %v3060_v5  ;;  %v2535_v57 = vsel %vm5168_vm5, %v2426_v58, 0.0  ;;  %v2596_v24 = vmul.f32 %v2426_v58, %v2426_v58  ;;  %v3061_v48 = vpack.c.bf16 %v2426_v58, %v2426_v58  ;;  %vm5181_vm3 = vmmov %vm5142_vm0 }
 0x1c8   : > { %v2635_v27 = vadd.f32 %v2634_v6, %v2633_v47  ;;  %v2536_v2 = vadd.f32 %v2535_v57, %v2534_v40  ;;  %2832 = vst.msk [vmem:[%s4684_s7 + $0x2c] sm:$0xf] %vm2820_vm4, %v3063_v63  ;;  %v2539_v18 = vsel %vm5171_vm2, %v3120_v12, 0.0  ;;  %v2640_v39 = vsel %vm5172_vm6, %v2598_v21, 0.0  ;;  %vm5182_vm5 = vmmov %vm5142_vm0 }
 0x1c9   : > { %v2636_v16 = vsel %vm5142_vm0, %v2596_v24, 0.0  ;;  %2830 = vst.msk [vmem:[%s4684_s7 + $0x24] sm:$0xf] %vm2820_vm4, %v3061_v48  ;;  %vm5185_vm2 = vmmov %vm5142_vm0 }
 0x1ca   : > { %v2538_v33 = vadd.f32 %v2537_v14, %v2536_v2  ;;  %v2637_v32 = vadd.f32 %v2636_v16, %v2635_v27  ;;  %vm5186_vm6 = vmmov %vm5142_vm0 }
 0x1cc   : > { %v2639_v10 = vadd.f32 %v2638_v19, %v2637_v32  ;;  %v2540_v1 = vadd.f32 %v2539_v18, %v2538_v33 }
 0x1ce   : > { %v2641_v30 = vadd.f32 %v2640_v39, %v2639_v10 }
 0x1e3   : > { %v3123_v4 = vpop.f32.mrb[12].mxu0 }
 0x1e4   : > { %v3066_v0 = vpack.c.bf16 %v3123_v4, %v3123_v4  ;;  %v2439_v31 = vpop.f32.mrb[13].mxu0  ;;  %v2601_v38 = vmul.f32 %v3123_v4, %v3123_v4  ;;  %v2545_v43 = vsel %vm5176_vm8, %v3123_v4, 0.0  ;;  %vm5190_vm8 = vmmov %vm5142_vm0 }
 0x1e5   : > { %v2541_v20 = vsel %vm5173_vm13, %v2439_v31, 0.0  ;;  %v2599_v60 = vmul.f32 %v2439_v31, %v2439_v31  ;;  %v3064_v52 = vpack.c.bf16 %v2439_v31, %v2439_v31  ;;  %v3124_v29 = vpop.f32.mrb[14].mxu0  ;;  %vm5187_vm13 = vmmov %vm5142_vm0 }
 0x1e6   : > { %2835 = vst.msk [vmem:[%s4684_s7 + $0x38] sm:$0xf] %vm2820_vm4, %v3066_v0  ;;  %v2542_v9 = vadd.f32 %v2541_v20, %v2540_v1  ;;  %v2442_v26 = vpop.f32.mrb[15].mxu0  ;;  %v3067_v25 = vpack.c.bf16 %v3124_v29, %v3124_v29  ;;  %v2602_v44 = vmul.f32 %v3124_v29, %v3124_v29  ;;  %v2646_v36 = vsel %vm5178_vm15, %v2601_v38, 0.0  ;;  %vm5192_vm15 = vmmov %vm5142_vm0 }
 0x1e7   : > { %v2642_v15 = vsel %vm5174_vm7, %v2599_v60, 0.0  ;;  %2833 = vst.msk [vmem:[%s4684_s7 + $0x30] sm:$0xf] %vm2820_vm4, %v3064_v52  ;;  %v2543_v35 = vsel %vm5175_vm1, %v2442_v26, 0.0  ;;  %v2600_v51 = vmul.f32 %v2442_v26, %v2442_v26  ;;  %v3065_v22 = vpack.c.bf16 %v2442_v26, %v2442_v26  ;;  %vm5188_vm7 = vmmov %vm5142_vm0 }
 0x1e8   : > { %v2643_v8 = vadd.f32 %v2642_v15, %v2641_v30  ;;  %v2544_v13 = vadd.f32 %v2543_v35, %v2542_v9  ;;  %2836 = vst.msk [vmem:[%s4684_s7 + $0x3c] sm:$0xf] %vm2820_vm4, %v3067_v25  ;;  %v2547_v54 = vsel %vm5179_vm11, %v3124_v29, 0.0  ;;  %v2648_v23 = vsel %vm5180_vm14, %v2602_v44, 0.0  ;;  %vm5189_vm1 = vmmov %vm5142_vm0 }
 0x1e9   : > { %v2644_v37 = vsel %vm5177_vm10, %v2600_v51, 0.0  ;;  %2834 = vst.msk [vmem:[%s4684_s7 + $0x34] sm:$0xf] %vm2820_vm4, %v3065_v22  ;;  %vm5191_vm10 = vmmov %vm5142_vm0 }
 0x1ea   : > { %v2546_v34 = vadd.f32 %v2545_v43, %v2544_v13  ;;  %v2645_v55 = vadd.f32 %v2644_v37, %v2643_v8  ;;  %vm5193_vm11 = vmmov %vm5142_vm0 }
 0x1eb   : > { %vm5194_vm14 = vmmov %vm5142_vm0 }
 0x1ec   : > { %v2647_v45 = vadd.f32 %v2646_v36, %v2645_v55  ;;  %v2548_v28 = vadd.f32 %v2547_v54, %v2546_v34 }
 0x1ee   : > { %v2649_v3 = vadd.f32 %v2648_v23, %v2647_v45 }
 0x202   : > { %v3127_v42 = vpop.f32.mrb[0].mxu1 }
 0x203   : > { %v3070_v17 = vpack.c.bf16 %v3127_v42, %v3127_v42  ;;  %v2455_v59 = vpop.f32.mrb[1].mxu1  ;;  %v2605_v47 = vmul.f32 %v3127_v42, %v3127_v42  ;;  %v2553_v58 = vsel %vm5142_vm0, %v3127_v42, 0.0 }
 0x204   : > { %v2549_v41 = vsel %vm5181_vm3, %v2455_v59, 0.0  ;;  %v2603_v53 = vmul.f32 %v2455_v59, %v2455_v59  ;;  %v3068_v46 = vpack.c.bf16 %v2455_v59, %v2455_v59  ;;  %v3128_v7 = vpop.f32.mrb[2].mxu1  ;;  %vm5195_vm3 = vmmov %vm5142_vm0 }
 0x205   : > { %2839 = vst.msk [vmem:[%s4684_s7 + $0x48] sm:$0xf] %vm2820_vm4, %v3070_v17  ;;  %v2550_v49 = vadd.f32 %v2549_v41, %v2548_v28  ;;  %v2458_v11 = vpop.f32.mrb[3].mxu1  ;;  %v3071_v61 = vpack.c.bf16 %v3128_v7, %v3128_v7  ;;  %v2606_v6 = vmul.f32 %v3128_v7, %v3128_v7  ;;  %v2654_v27 = vsel %vm5185_vm2, %v2605_v47, 0.0  ;;  %vm5199_vm2 = vmmov %vm5142_vm0 }
 0x206   : > { %v2650_v50 = vsel %vm5182_vm5, %v2603_v53, 0.0  ;;  %2837 = vst.msk [vmem:[%s4684_s7 + $0x40] sm:$0xf] %vm2820_vm4, %v3068_v46  ;;  %v2551_v62 = vsel %vm5183_vm12, %v2458_v11, 0.0  ;;  %v2604_v5 = vmul.f32 %v2458_v11, %v2458_v11  ;;  %v3069_v40 = vpack.c.bf16 %v2458_v11, %v2458_v11  ;;  %vm5196_vm5 = vmmov %vm5142_vm0 }
 0x207   : > { %v2651_v12 = vadd.f32 %v2650_v50, %v2649_v3  ;;  %v2552_v56 = vadd.f32 %v2551_v62, %v2550_v49  ;;  %2840 = vst.msk [vmem:[%s4684_s7 + $0x4c] sm:$0xf] %vm2820_vm4, %v3071_v61  ;;  %v2555_v2 = vsel %vm5186_vm6, %v3128_v7, 0.0  ;;  %v2656_v21 = vsel %vm5187_vm13, %v2606_v6, 0.0  ;;  %vm5197_vm12 = vmmov %vm5142_vm0 }
 0x208   : > { %v2652_v63 = vsel %vm5184_vm9, %v2604_v5, 0.0  ;;  %2838 = vst.msk [vmem:[%s4684_s7 + $0x44] sm:$0xf] %vm2820_vm4, %v3069_v40  ;;  %vm5198_vm9 = vmmov %vm5142_vm0 }
 0x209   : > { %v2554_v57 = vadd.f32 %v2553_v58, %v2552_v56  ;;  %v2653_v24 = vadd.f32 %v2652_v63, %v2651_v12  ;;  %vm5200_vm6 = vmmov %vm5142_vm0 }
 0x20a   : > { %vm5201_vm13 = vmmov %vm5142_vm0 }
 0x20b   : > { %v2655_v48 = vadd.f32 %v2654_v27, %v2653_v24  ;;  %v2556_v14 = vadd.f32 %v2555_v2, %v2554_v57 }
 0x20d   : > { %v2657_v16 = vadd.f32 %v2656_v21, %v2655_v48 }
 0x222   : > { %v3131_v33 = vpop.f32.mrb[4].mxu1 }
 0x223   : > { %v3074_v32 = vpack.c.bf16 %v3131_v33, %v3131_v33  ;;  %v2471_v19 = vpop.f32.mrb[5].mxu1  ;;  %v2609_v30 = vmul.f32 %v3131_v33, %v3131_v33  ;;  %v2561_v26 = vsel %vm5191_vm10, %v3131_v33, 0.0  ;;  %vm5205_vm10 = vmmov %vm5142_vm0 }
 0x224   : > { %v2557_v18 = vsel %vm5188_vm7, %v2471_v19, 0.0  ;;  %v2607_v10 = vmul.f32 %v2471_v19, %v2471_v19  ;;  %v3072_v1 = vpack.c.bf16 %v2471_v19, %v2471_v19  ;;  %v3132_v39 = vpop.f32.mrb[6].mxu1  ;;  %vm5202_vm7 = vmmov %vm5142_vm0 }
 0x225   : > { %2843 = vst.msk [vmem:[%s4684_s7 + $0x58] sm:$0xf] %vm2820_vm4, %v3074_v32  ;;  %v2558_v4 = vadd.f32 %v2557_v18, %v2556_v14  ;;  %v2474_v0 = vpop.f32.mrb[7].mxu1  ;;  %v3075_v20 = vpack.c.bf16 %v3132_v39, %v3132_v39  ;;  %v2610_v15 = vmul.f32 %v3132_v39, %v3132_v39  ;;  %v2662_v8 = vsel %vm5193_vm11, %v2609_v30, 0.0  ;;  %vm5207_vm11 = vmmov %vm5142_vm0 }
 0x226   : > { %v2658_v31 = vsel %vm5189_vm1, %v2607_v10, 0.0  ;;  %2841 = vst.msk [vmem:[%s4684_s7 + $0x50] sm:$0xf] %vm2820_vm4, %v3072_v1  ;;  %v2559_v60 = vsel %vm5190_vm8, %v2474_v0, 0.0  ;;  %v2608_v52 = vmul.f32 %v2474_v0, %v2474_v0  ;;  %v3073_v9 = vpack.c.bf16 %v2474_v0, %v2474_v0  ;;  %vm5203_vm1 = vmmov %vm5142_vm0 }
 0x227   : > { %v2659_v29 = vadd.f32 %v2658_v31, %v2657_v16  ;;  %v2560_v38 = vadd.f32 %v2559_v60, %v2558_v4  ;;  %2844 = vst.msk [vmem:[%s4684_s7 + $0x5c] sm:$0xf] %vm2820_vm4, %v3075_v20  ;;  %v2563_v13 = vsel %vm5194_vm14, %v3132_v39, 0.0  ;;  %v2664_v44 = vsel %vm5195_vm3, %v2610_v15, 0.0  ;;  %vm5204_vm8 = vmmov %vm5142_vm0 }
 0x228   : > { %v2660_v25 = vsel %vm5192_vm15, %v2608_v52, 0.0  ;;  %2842 = vst.msk [vmem:[%s4684_s7 + $0x54] sm:$0xf] %vm2820_vm4, %v3073_v9  ;;  %vm5206_vm15 = vmmov %vm5142_vm0 }
 0x229   : > { %v2562_v35 = vadd.f32 %v2561_v26, %v2560_v38  ;;  %v2661_v51 = vadd.f32 %v2660_v25, %v2659_v29  ;;  %vm5208_vm14 = vmmov %vm5142_vm0 }
 0x22a   : > { %vm5209_vm3 = vmmov %vm5142_vm0 }
 0x22b   : > { %v2663_v22 = vadd.f32 %v2662_v8, %v2661_v51  ;;  %v2564_v43 = vadd.f32 %v2563_v13, %v2562_v35 }
 0x22d   : > { %v2665_v37 = vadd.f32 %v2664_v44, %v2663_v22 }
 0x242   : > { %v3135_v34 = vpop.f32.mrb[8].mxu1 }
 0x243   : > { %v3078_v55 = vpack.c.bf16 %v3135_v34, %v3135_v34  ;;  %v2487_v36 = vpop.f32.mrb[9].mxu1  ;;  %v2613_v3 = vmul.f32 %v3135_v34, %v3135_v34  ;;  %v2569_v11 = vsel %vm5198_vm9, %v3135_v34, 0.0 }
 0x244   : > { %v2565_v54 = vsel %vm5196_vm5, %v2487_v36, 0.0  ;;  %v2611_v45 = vmul.f32 %v2487_v36, %v2487_v36  ;;  %v3076_v28 = vpack.c.bf16 %v2487_v36, %v2487_v36  ;;  %v3136_v23 = vpop.f32.mrb[10].mxu1  ;;  %vm5210_vm5 = vmmov %vm5142_vm0 }
 0x245   : > { %2847 = vst.msk [vmem:[%s4684_s7 + $0x68] sm:$0xf] %vm2820_vm4, %v3078_v55  ;;  %v2566_v42 = vadd.f32 %v2565_v54, %v2564_v43  ;;  %v2490_v17 = vpop.f32.mrb[11].mxu1  ;;  %v3079_v41 = vpack.c.bf16 %v3136_v23, %v3136_v23  ;;  %v2614_v50 = vmul.f32 %v3136_v23, %v3136_v23  ;;  %v2670_v12 = vsel %vm5200_vm6, %v2613_v3, 0.0 }
 0x246   : > { %v2666_v59 = vsel %vm5197_vm12, %v2611_v45, 0.0  ;;  %2845 = vst.msk [vmem:[%s4684_s7 + $0x60] sm:$0xf] %vm2820_vm4, %v3076_v28  ;;  %v2567_v53 = vsel %vm5142_vm0, %v2490_v17, 0.0  ;;  %v2612_v46 = vmul.f32 %v2490_v17, %v2490_v17  ;;  %v3077_v49 = vpack.c.bf16 %v2490_v17, %v2490_v17 }
 0x247   : > { %v2667_v7 = vadd.f32 %v2666_v59, %v2665_v37  ;;  %v2568_v47 = vadd.f32 %v2567_v53, %v2566_v42  ;;  %2848 = vst.msk [vmem:[%s4684_s7 + $0x6c] sm:$0xf] %vm2820_vm4, %v3079_v41  ;;  %v2571_v56 = vsel %vm5201_vm13, %v3136_v23, 0.0  ;;  %v2672_v6 = vsel %vm5202_vm7, %v2614_v50, 0.0 }
 0x248   : > { %v2668_v61 = vsel %vm5199_vm2, %v2612_v46, 0.0  ;;  %2846 = vst.msk [vmem:[%s4684_s7 + $0x64] sm:$0xf] %vm2820_vm4, %v3077_v49  ;;  %vm5211_vm12 = vcmask 1040384  }
 0x249   : > { %v2570_v62 = vadd.f32 %v2569_v11, %v2568_v47  ;;  %v2669_v5 = vadd.f32 %v2668_v61, %v2667_v7 }
 0x24b   : > { %v2671_v40 = vadd.f32 %v2670_v12, %v2669_v5  ;;  %v2572_v58 = vadd.f32 %v2571_v56, %v2570_v62 }
 0x24d   : > { %v2673_v63 = vadd.f32 %v2672_v6, %v2671_v40 }
 0x262   : > { %v3139_v57 = vpop.f32.mrb[12].mxu1 }
 0x263   : > { %v3082_v24 = vpack.c.bf16 %v3139_v57, %v3139_v57  ;;  %v2503_v27 = vpop.f32.mrb[13].mxu1  ;;  %v2617_v16 = vmul.f32 %v3139_v57, %v3139_v57  ;;  %v2577_v0 = vsel %vm5206_vm15, %v3139_v57, 0.0 }
 0x264   : > { %v2573_v2 = vsel %vm5203_vm1, %v2503_v27, 0.0  ;;  %v2615_v48 = vmul.f32 %v2503_v27, %v2503_v27  ;;  %v3080_v14 = vpack.c.bf16 %v2503_v27, %v2503_v27  ;;  %v3140_v21 = vpop.f32.mrb[14].mxu1 }
 0x265   : > { %2851 = vst.msk [vmem:[%s4684_s7 + $0x78] sm:$0xf] %vm2820_vm4, %v3082_v24  ;;  %v2574_v33 = vadd.f32 %v2573_v2, %v2572_v58  ;;  %v2506_v32 = vpop.f32.mrb[15].mxu1  ;;  %v3083_v18 = vpack.c.bf16 %v3140_v21, %v3140_v21  ;;  %v2618_v31 = vmul.f32 %v3140_v21, %v3140_v21  ;;  %v2678_v29 = vsel %vm5208_vm14, %v2617_v16, 0.0 }
 0x266   : > { %v2674_v19 = vsel %vm5204_vm8, %v2615_v48, 0.0  ;;  %2849 = vst.msk [vmem:[%s4684_s7 + $0x70] sm:$0xf] %vm2820_vm4, %v3080_v14  ;;  %v2575_v10 = vsel %vm5205_vm10, %v2506_v32, 0.0  ;;  %v2616_v1 = vmul.f32 %v2506_v32, %v2506_v32  ;;  %v3081_v4 = vpack.c.bf16 %v2506_v32, %v2506_v32 }
 0x267   : > { %v2675_v39 = vadd.f32 %v2674_v19, %v2673_v63  ;;  %v2576_v30 = vadd.f32 %v2575_v10, %v2574_v33  ;;  %2852 = vst.msk [vmem:[%s4684_s7 + $0x7c] sm:$0xf] %vm2820_vm4, %v3083_v18  ;;  %v2579_v38 = vsel %vm5209_vm3, %v3140_v21, 0.0  ;;  %v2680_v15 = vsel %vm5210_vm5, %v2618_v31, 0.0 }
 0x268   : > { %v2676_v20 = vsel %vm5207_vm11, %v2616_v1, 0.0  ;;  %2850 = vst.msk [vmem:[%s4684_s7 + $0x74] sm:$0xf] %vm2820_vm4, %v3081_v4  ;;  %vm2690_vm4 = vcmask 25600  }
 0x269   : > { %v2578_v60 = vadd.f32 %v2577_v0, %v2576_v30  ;;  %v2677_v52 = vadd.f32 %v2676_v20, %v2675_v39 }
 0x26b   : > { %v2580_v9 = vadd.f32 %v2579_v38, %v2578_v60  ;;  %v2679_v26 = vadd.f32 %v2678_v29, %v2677_v52 }
 0x26d   : > { %v2581_v25 = vrot.slane %v2580_v9, 4  ;;  %v2681_v35 = vadd.f32 %v2680_v15, %v2679_v26 }
 0x26f   : > { %v2582_v51 = vadd.f32 %v2581_v25, %v2580_v9  ;;  %v2682_v8 = vrot.slane %v2681_v35, 4 }
 0x271   : > { %v2583_v13 = vrot.slane %v2582_v51, 2  ;;  %v2683_v22 = vadd.f32 %v2682_v8, %v2681_v35 }
 0x273   : > { %v2584_v43 = vadd.f32 %v2583_v13, %v2582_v51  ;;  %v2684_v44 = vrot.slane %v2683_v22, 2 }
 0x275   : > { %v2585_v37 = vrot.slane %v2584_v43, 1  ;;  %v2685_v34 = vadd.f32 %v2684_v44, %v2683_v22 }
 0x277   : > { %v2686_v55 = vrot.slane %v2685_v34, 1  ;;  %v2586_v36 = vadd.f32 %v2585_v37, %v2584_v43 }
 0x279   : > { %v2687_v54 = vadd.f32 %v2686_v55, %v2685_v34 }
 0x27b   : > { %v2689_v45 = vsel %vm5211_vm12, %v2586_v36, %v2687_v54 }
 0x27c   : > { %2691 = vst.msk [vmem:[%s181_s11] sm:$0x3] %vm2690_vm4, %v2689_v45 }
 0x27d PF: > { %s14_s12 = sadd.s32 1, %s3192_s12  }
 0x27e   : > { %p11_p4 = scmp.ge.s32.totalorder %s14_s12, 4  }
 0x280   :  { %13 = sbr.rel (!%p11_p4) target bundleno = 1 (0x1), region = 70 }

// kernel: basic_block.4
= control target key start
LH: loop header
LB: loop body
LE: loop exit
PB: predicated region body
PF: predicated region fallthrough
CT: control target
= control target key end

     0   :  { %s3417_s18 = smov 0   ;;  %s5299_s0 = inlined_call_operand.vmem [shape: bf16[2,16,16,4], index: 0, kind: input, shape index: {}]   ;;  %s5300_s1 = inlined_call_operand.vmem [shape: f32[1,4], index: 1, kind: input, shape index: {}]   ;;  %s5301_s2 = inlined_call_operand.vmem [shape: f32[1,4], index: 2, kind: input, shape index: {}]   ;;  %s5302_s3 = inlined_call_operand.vmem [shape: bf16[36,4], index: 3, kind: input, shape index: {}]   ;;  %s5303_s4 = inlined_call_operand.vmem [shape: bf16[2,16,16,4], index: 4, kind: output, shape index: {0}]   ;;  %s5304_s5 = inlined_call_operand.vmem [shape: f32[2,2,4], index: 5, kind: output, shape index: {1}]  }
   0x1 LB: > { %s3071_s19 = sadd.s32 4294967295, %s3375_s18   ;;  %p3075_p0 = scmp.ge.s32.totalorder %s3375_s18, 1  ;;  %s3375_s18 = sphi %s3417_s18, %s16_s18  }
   0x2   : > { %p190_p1 = scmp.lt.s32.totalorder %s3375_s18, 3 }
   0x4   : > { %p191_p2 = pnand %p3075_p0, %p190_p1 }
   0x6   : > { %194 = sbr.rel (%p191_p2) target bundleno = 652 (0x28c), region = 36 }
   0xd   : > { %p222_p3 = scmp.lt.s32.totalorder %s3071_s19, 1  ;;  %v578_v0 = vlaneseq  ;;  %v3444_v6 = vld [vmem:[%s5300_s1] ss:$0 sm:$0xff]  ;;  %vm3377_vm1 = vmmov 1   ;;  %v5312_v26 = vmov 0   ;;  %vm5305_vm7 = vcmask 1040384  }
   0xe   : > { %v3450_v13 = vld [vmem:[%s5301_s2] ss:$0 sm:$0xff]  ;;  %vm1124_vm2 = vmpackc.low %vm3377_vm1, %vm3377_vm1  ;;  %vm5306_vm6 = vsmask.f32 256  ;;  %s3379_s28 = smov 12   ;;  %vm5319_vm15 = vcmask 1046528  }
   0xf   : > { %s5709_s19 = smov (!%p222_p3, %s3071_s19), 1  ;;  %v3427_v1 = vshrl.u32 %v578_v0, 7  ;;  %v3473_v28 = vsel %vm1124_vm2, 65537, %v5312_v26  ;;  %vm3499_vm9 = vmand %vm5305_vm7, %vm5306_vm6  ;;  %s3380_s29 = smov 24  }
  0x10   : > { %s3168_s20 = sshll.u32 %s5709_s19, 7  ;;  %s3381_s30 = smov 20  }
  0x11   : > { %v581_v2 = vadd.s32 16, %v3427_v1  ;;  %v615_v3 = vand.u32 15, %v3427_v1  ;;  %s3437_s23 = scalar_lea.vmem %s5299_s0, %s3168_s20  ;;  %v580_v37 = vadd.s32 8, %v3427_v1  ;;  %v582_v42 = vadd.s32 24, %v3427_v1  ;;  %s3382_s8 = smov 8  }
  0x12   : > { %v3203_v4 = vld [vmem:[%s3437_s23] sm:$0xff]   ;;  %v3266_v5 = vld [vmem:[%s3437_s23 + $0x8] sm:$0xff]   ;;  %v3280_v12 = vld [vmem:[%s3437_s23 + $0x78] sm:$0xff]   ;;  %v584_v61 = vadd.s32 40, %v3427_v1  ;;  %s3383_s9 = smov 32   ;;  %s3384_s12 = smov 4  }
  0x13   : > { %v629_v7 = vand.u32 15, %v581_v2  ;;  %v3204_v8 = vunpack.c.l.bf16 %v3203_v4  ;;  %v3205_v9 = vunpack.c.h.bf16 %v3203_v4  ;;  %v3208_v10 = vunpack.c.l.bf16 %v3266_v5  ;;  %v3267_v41 = vld [vmem:[%s3437_s23 + $0x10] sm:$0xff]   ;;  %s3385_s13 = smov 16   ;;  %s3386_s14 = smov 28  }
  0x14   : > { %v3209_v11 = vunpack.c.h.bf16 %v3266_v5  ;;  %v3264_v15 = vunpack.c.l.bf16 %v3280_v12  ;;  %vm3456_vm3 = vcmp.ge.s32.totalorder %v615_v3, 1  ;;  %v3265_v21 = vunpack.c.h.bf16 %v3280_v12  ;;  %s5141_s26 = scalar_lea.vmem %s5303_s4, %s3168_s20  ;;  %s3080_s20 = sshll.u32 %s5709_s19, 1 }
  0x15   : > { %vm3452_vm0 = vcmp.ge.s32.totalorder %v629_v7, 1  ;;  %v310_v17 = vmul.f32 %v3204_v8, %v3444_v6  ;;  %v311_v18 = vmul.f32 %v3205_v9, %v3444_v6  ;;  %v312_v19 = vmul.f32 %v3208_v10, %v3444_v6  ;;  %vm1497_vm5 = vmpackc.low %vm3456_vm3, %vm3456_vm3 }
  0x16   : > { %v313_v20 = vmul.f32 %v3209_v11, %v3444_v6  ;;  %vm1123_vm4 = vmpackc.low %vm3452_vm0, %vm3452_vm0  ;;  %v340_v29 = vmul.f32 %v3264_v15, %v3444_v6  ;;  %v341_v30 = vmul.f32 %v3265_v21, %v3444_v6  ;;  %v1499_v40 = vsel %vm1497_vm5, 65537, %v5312_v26 }
  0x17   : > { %v349_v22 = vadd.f32 %v3450_v13, %v310_v17  ;;  %v350_v23 = vadd.f32 %v3450_v13, %v311_v18  ;;  %v351_v24 = vadd.f32 %v3450_v13, %v312_v19  ;;  %v1153_v27 = vsel %vm1123_vm4, 65537, %v5312_v26 }
  0x18   : > { %v352_v25 = vadd.f32 %v3450_v13, %v313_v20  ;;  %v379_v35 = vadd.f32 %v3450_v13, %v340_v29  ;;  %v380_v36 = vadd.f32 %v3450_v13, %v341_v30  ;;  %v3083_v43 = vcombine.low %v1153_v27, %v3473_v28 }
  0x19   : > { %v381_v31 = vmax.f32 %v349_v22, 0.0  ;;  %v382_v32 = vmax.f32 %v350_v23, 0.0  ;;  %v383_v33 = vmax.f32 %v351_v24, 0.0  ;;  %v3114_v51 = vcombine.low %v1499_v40, %v3473_v28 }
  0x1a   : > { %v384_v34 = vmax.f32 %v352_v25, 0.0  ;;  %v411_v44 = vmax.f32 %v379_v35, 0.0  ;;  %v412_v45 = vmax.f32 %v380_v36, 0.0  ;;  %v3212_v52 = vunpack.c.l.bf16 %v3267_v41 }
  0x1b   : > { %v413_v38 = vpack.c.bf16 %v382_v32, %v381_v31  ;;  %v622_v53 = vand.u32 15, %v580_v37  ;;  %v3213_v56 = vunpack.c.h.bf16 %v3267_v41  ;;  %v636_v57 = vand.u32 15, %v582_v42 }
  0x1c   : > { %v414_v39 = vpack.c.bf16 %v384_v34, %v383_v33  ;;  %v3487_v50 = vpack.c.bf16 %v412_v45, %v411_v44  ;;  %vm3492_vm8 = vcmp.ne.s16.totalorder %v3083_v43, 0  ;;  %v314_v0 = vmul.f32 %v3212_v52, %v3444_v6 }
  0x1d   : > { %v431_v46 = vshrl.u32 %v413_v38, 16  ;;  %v434_v49 = vshll.u32 %v413_v38, 16  ;;  %v315_v2 = vmul.f32 %v3213_v56, %v3444_v6  ;;  %vm3509_vm10 = vcmp.ne.s16.totalorder %v3114_v51, 0 }
  0x1e   : > { %v438_v47 = vshrl.u32 %v414_v39, 16  ;;  %v441_v48 = vshll.u32 %v414_v39, 16  ;;  %v550_v59 = vshrl.u32 %v3487_v50, 16  ;;  %vm3513_vm11 = vcmp.le.s32.totalorder %v622_v53, 14  ;;  %v3268_v39 = vld [vmem:[%s3437_s23 + $0x18] sm:$0xff]  }
  0x1f   : > { %v433_v54 = vrot.slane %v431_v46, 7  ;;  %vm3517_vm12 = vcmp.le.s32.totalorder %v636_v57, 14  ;;  %v353_v10 = vadd.f32 %v3450_v13, %v314_v0  ;;  %v354_v11 = vadd.f32 %v3450_v13, %v315_v2  ;;  %vm1323_vm13 = vmpackc.low %vm3513_vm11, %vm3513_vm11 }
  0x20   : > { %v3490_v55 = vrot.slane %v438_v47, 7  ;;  %v3507_v3 = vrot.slane %v550_v59, 7  ;;  %vm1325_vm14 = vmpackc.low %vm3517_vm12, %vm3517_vm12  ;;  %v1355_v18 = vsel %vm1323_vm13, 65537, %v5312_v26  ;;  %v650_v20 = vand.u32 15, %v584_v61 }
  0x21   : > { %v436_v63 = vor.u32 %v434_v49, %v433_v54  ;;  %v385_v16 = vmax.f32 %v353_v10, 0.0  ;;  %v386_v17 = vmax.f32 %v354_v11, 0.0  ;;  %v1357_v19 = vsel %vm1325_vm14, 65537, %v5312_v26 }
  0x22   : > { %v443_v62 = vor.u32 %v441_v48, %v3490_v55  ;;  %v3539_v14 = vsel %vm3499_vm9, %v3507_v3, 0  ;;  %v3098_v23 = vcombine.low %v3473_v28, %v1355_v18  ;;  %v3099_v24 = vcombine.low %v3473_v28, %v1357_v19  ;;  %v3364_v19 = vld [vmem:[%s5302_s3] sm:$0xff]  }
  0x23   : > { %v3526_v9 = vsel %vm3499_vm9, 0, %v436_v63  ;;  %v415_v21 = vpack.c.bf16 %v386_v17, %v385_v16  ;;  %v3557_v25 = vrot.slane %v5312_v26, 1  ;;  %vm1032_vm0 = vcmp.le.s32.totalorder %v650_v20, 14  ;;  %3300 = vmatprep.subr.bf16.mxu0 %v3364_v19  ;;  %3338 = vmatprep.subr.bf16.mxu1 %v3364_v19 }
  0x24   : > { %v3522_v8 = vsel %vm5306_vm6, %v433_v54, %v443_v62  ;;  %v1505_v15 = vsel %vm3509_vm10, %v3526_v9, 0  ;;  %v1434_v30 = vrot.slane %v3098_v23, 7  ;;  %v1435_v31 = vrot.slane %v3099_v24, 7  ;;  %vm1327_vm1 = vmpackc.low %vm1032_vm0, %vm1032_vm0  ;;  %v3269_v24 = vld [vmem:[%s3437_s23 + $0x20] sm:$0xff]   ;;  %3301 = vmatpush3.bf16.msra.mxu0 %v3364_v19  ;;  %3341 = vmatpush3.bf16.msra.mxu1 %v3364_v19 }
  0x25   : > { %v1506_v12 = vsel %vm3492_vm8, %v3522_v8, 0  ;;  %1835 = vrot.lane.b32.xlu0 %v1505_v15, %s3379_s28  ;;  %v1539_v22 = vsel %vm3509_vm10, %v3522_v8, 0  ;;  %5353 = vst [vmem:[#allocation2_spill] sm:$0xff] %v3557_v25  ;;  %v446_v27 = vshrl.u32 %v415_v21, 16  ;;  %v449_v29 = vshll.u32 %v415_v21, 16 }
  0x26   : > { %1837 = vrot.lane.b32.xlu1 %v1506_v12, %s3379_s28  ;;  %v1359_v32 = vsel %vm1327_vm1, 65537, %v5312_v26  ;;  %v3562_v33 = vadd.s32 56, %v3427_v1  ;;  %v3565_v34 = vadd.s32 72, %v3427_v1  ;;  %v3568_v35 = vadd.s32 32, %v3427_v1 }
  0x27   : > { %v3570_v36 = vrot.slane %v446_v27, 7  ;;  %v1436_v37 = vsel %vm5305_vm7, %v1434_v30, %v1435_v31  ;;  %vm1521_vm2 = vcmp.ne.s16.totalorder %v1434_v30, 0  ;;  %v3100_v38 = vcombine.low %v3473_v28, %v1359_v32 }
  0x28   : > { %vm5309_vm3 = vsmask.f32 7424  ;;  %vm1465_vm4 = vcmp.ne.s16.totalorder %v1436_v37, 0  ;;  %v1522_v40 = vsel %vm1521_vm2, %v3526_v9, 0  ;;  %v1555_v41 = vsel %vm1521_vm2, %v3522_v8, 0 }
  0x29   : > { %2005 = vrot.lane.b32.xlu0 %v1539_v22, %s3380_s29  ;;  %v1580_v42 = vshll.u32 %v3526_v9, 16  ;;  %v451_v43 = vor.u32 %v449_v29, %v3570_v36  ;;  %v3581_v44 = vsel %vm1465_vm4, %v3522_v8, 0  ;;  %v1924_v45 = vrot.slane %v1522_v40, 1 }
  0x2a   : > { %v1481_v46 = vsel %vm1465_vm4, %v3526_v9, 0  ;;  %v1925_v47 = vrot.slane %v3581_v44, 1  ;;  %v3586_v49 = vrot.slane %v3100_v38, 7  ;;  %v3216_v51 = vunpack.c.l.bf16 %v3268_v39 }
  0x2b   : > { %v1755_v48 = vrot.slane %v1481_v46, 1  ;;  %v3590_v52 = vsel %vm5306_vm6, %v3490_v55, %v451_v43  ;;  %v2089_v53 = vrot.slane %v1555_v41, 1  ;;  %v1588_v54 = vshll.u32 %v3522_v8, 16  ;;  %v3365_v41 = vld [vmem:[%s5302_s3 + $0x8] sm:$0xff]  }
  0x2c   : > { %v3217_v56 = vunpack.c.h.bf16 %v3268_v39  ;;  %v1540_v57 = vsel %vm3492_vm8, %v3590_v52, 0  ;;  %v1926_v59 = vsel %vm5319_vm15, %v1924_v45, %v1925_v47  ;;  %v3599_v60 = vsel %vm1465_vm4, %v3590_v52, 0  ;;  %3302 = vmatprep.subr.bf16.mxu0 %v3365_v41  ;;  %3339 = vmatprep.subr.bf16.mxu1 %v3365_v41 }
  0x2d   : > { %v1584_v61 = vshrl.u32 %v3526_v9, 16  ;;  %2007 = vrot.lane.b32.xlu1 %v1540_v57, %s3380_s29  ;;  %1957 = vrot.lane.b32.xlu0 %v1926_v59, %s3381_s30  ;;  %v2090_v55 = vrot.slane %v3599_v60, 1  ;;  %v3607_v62 = vsel %vm5305_vm7, %v1435_v31, %v3586_v49  ;;  %v1582_v63 = vrot.slane %v1580_v42, 1 }
  0x2e   : > { %v1592_v0 = vshrl.u32 %v3522_v8, 16  ;;  %v1756_v2 = vsel %vm5319_vm15, %v3557_v25, %v1755_v48  ;;  %vm1466_vm5 = vcmp.ne.s16.totalorder %v3607_v62, 0  ;;  %v316_v4 = vmul.f32 %v3216_v51, %v3444_v6  ;;  %3303 = vmatpush3.bf16.msra.mxu0 %v3365_v41  ;;  %3342 = vmatpush3.bf16.msra.mxu1 %v3365_v41 }
  0x2f   : > { %v317_v5 = vmul.f32 %v3217_v56, %v3444_v6  ;;  %v2091_v7 = vsel %vm5319_vm15, %v2089_v53, %v2090_v55  ;;  %v3621_v10 = vsel %vm1466_vm5, %v3522_v8, 0  ;;  %v3626_v11 = vsel %vm1466_vm5, %v3590_v52, 0 }
  0x30   : > { %v1590_v12 = vrot.slane %v1588_v54, 1  ;;  %v1757_v15 = vrot.slane %v3621_v10, 1  ;;  %v1586_v16 = vor.u32 %v1584_v61, %v1582_v63  ;;  %v355_v17 = vadd.f32 %v3450_v13, %v316_v4  ;;  %v3270_v54 = vld [vmem:[%s3437_s23 + $0x28] sm:$0xff]  }
  0x31   : > { %v356_v18 = vadd.f32 %v3450_v13, %v317_v5  ;;  %1787 = vrot.lane.b32.xlu1 %v1756_v2, %s3382_s8  ;;  %2121 = vrot.lane.b32.xlu0 %v2091_v7, %s3383_s9  ;;  %v1927_v20 = vrot.slane %v3626_v11, 1  ;;  %v1596_v21 = vshll.u32 %v3590_v52, 16  ;;  %v664_v22 = vand.u32 15, %v3562_v33 }
  0x32   : > { %v678_v23 = vand.u32 15, %v3565_v34  ;;  %v1758_v27 = vsel %vm5319_vm15, %v1755_v48, %v1757_v15  ;;  %v1583_v29 = vsel %vm5309_vm3, %v3557_v25, %v1582_v63  ;;  %v387_v30 = vmax.f32 %v355_v17, 0.0 }
  0x33   : > { %v388_v31 = vmax.f32 %v356_v18, 0.0  ;;  %v1594_v32 = vor.u32 %v1592_v0, %v1590_v12  ;;  %vm3646_vm9 = vcmp.le.s32.totalorder %v664_v22, 14  ;;  %v1591_v34 = vsel %vm5309_vm3, %v1586_v16, %v1590_v12 }
  0x34   : > { %vm3650_vm10 = vcmp.le.s32.totalorder %v678_v23, 14  ;;  %vm1329_vm11 = vmpackc.low %vm3646_vm9, %vm3646_vm9  ;;  %v3220_v39 = vunpack.c.l.bf16 %v3269_v24  ;;  %v3221_v40 = vunpack.c.h.bf16 %v3269_v24  ;;  %v1928_v42 = vsel %vm5319_vm15, %v1925_v47, %v1927_v20 }
  0x35   : > { %v416_v38 = vpack.c.bf16 %v388_v31, %v387_v30  ;;  %1789 = vrot.lane.b32.xlu1 %v1758_v27, %s3382_s8  ;;  %1704 = vrot.lane.b32.xlu0 %v1583_v29, %s3384_s12  ;;  %v1598_v43 = vrot.slane %v1596_v21, 1  ;;  %v1361_v44 = vsel %vm1329_vm11, 65537, %v5312_v26  ;;  %vm1331_vm12 = vmpackc.low %vm3650_vm10, %vm3650_vm10  ;;  %v643_v45 = vand.u32 15, %v3568_v35 }
  0x36   : > { %v3101_v51 = vcombine.low %v3473_v28, %v1361_v44  ;;  %v1363_v53 = vsel %vm1331_vm12, 65537, %v5312_v26  ;;  %v585_v56 = vadd.s32 48, %v3427_v1  ;;  %v318_v57 = vmul.f32 %v3220_v39, %v3444_v6 }
  0x37   : > { %v454_v46 = vshrl.u32 %v416_v38, 16  ;;  %v457_v48 = vshll.u32 %v416_v38, 16  ;;  %v3102_v47 = vcombine.low %v3473_v28, %v1363_v53  ;;  %v1600_v35 = vshrl.u32 %v3590_v52, 16 }
  0x38   : > { %v1439_v61 = vrot.slane %v3101_v51, 7  ;;  %v319_v63 = vmul.f32 %v3221_v40, %v3444_v6  ;;  %v1599_v0 = vsel %vm5309_vm3, %v1594_v32, %v1598_v43  ;;  %vm3684_vm13 = vcmp.ge.s32.totalorder %v643_v45, 1 }
  0x39   : > { %v3677_v59 = vrot.slane %v454_v46, 7  ;;  %1959 = vrot.lane.b32.xlu1 %v1928_v42, %s3381_s30  ;;  %1706 = vrot.lane.b32.xlu0 %v1591_v34, %s3384_s12  ;;  %v3224_v4 = vunpack.c.l.bf16 %v3270_v54  ;;  %v3693_v12 = vrot.slane %v3102_v47, 7  ;;  %v357_v16 = vadd.f32 %v3450_v13, %v318_v57  ;;  %vm1125_vm0 = vmpackc.low %vm3684_vm13, %vm3684_vm13 }
  0x3a   : > { %v3691_v7 = vsel %vm5305_vm7, %v3586_v49, %v1439_v61  ;;  %v657_v17 = vand.u32 15, %v585_v56  ;;  %v358_v18 = vadd.f32 %v3450_v13, %v319_v63  ;;  %v1602_v21 = vor.u32 %v1600_v35, %v1598_v43  ;;  %v3271_v35 = vld [vmem:[%s3437_s23 + $0x30] sm:$0xff]  }
  0x3b   : > { %v459_v5 = vor.u32 %v457_v48, %v3677_v59  ;;  %vm1467_vm14 = vcmp.ne.s16.totalorder %v3691_v7, 0  ;;  %v3225_v23 = vunpack.c.h.bf16 %v3270_v54  ;;  %v3720_v29 = vsel %vm5305_vm7, %v1439_v61, %v3693_v12 }
  0x3c   : > { %v1483_v27 = vsel %vm1467_vm14, %v3590_v52, 0  ;;  %v389_v62 = vmax.f32 %v357_v16, 0.0  ;;  %vm3722_vm1 = vcmp.ge.s32.totalorder %v657_v17, 1  ;;  %v390_v32 = vmax.f32 %v358_v18, 0.0 }
  0x3d   : > { %v3700_v19 = vsel %vm5306_vm6, %v3570_v36, %v459_v5  ;;  %1877 = vrot.lane.b32.xlu1 %v1599_v0, %s3385_s13  ;;  %1875 = vrot.lane.b32.xlu0 %v1591_v34, %s3385_s13  ;;  %v320_v36 = vmul.f32 %v3224_v4, %v3444_v6  ;;  %v1155_v37 = vsel %vm1125_vm0, 65537, %v5312_v26  ;;  %v1759_v34 = vrot.slane %v1483_v27, 1  ;;  %vm1127_vm4 = vmpackc.low %vm3722_vm1, %vm3722_vm1 }
  0x3e   : > { %v1604_v49 = vshll.u32 %v3700_v19, 16  ;;  %v3708_v22 = vsel %vm1466_vm5, %v3700_v19, 0  ;;  %vm1468_vm2 = vcmp.ne.s16.totalorder %v3720_v29, 0  ;;  %v417_v38 = vpack.c.bf16 %v390_v32, %v389_v62 }
  0x3f   : > { %v2092_v24 = vrot.slane %v3708_v22, 1  ;;  %v321_v40 = vmul.f32 %v3225_v23, %v3444_v6  ;;  %v359_v41 = vadd.f32 %v3450_v13, %v320_v36  ;;  %v590_v42 = vadd.s32 88, %v3427_v1 }
  0x40   : > { %v1606_v30 = vrot.slane %v1604_v49, 1  ;;  %v3084_v43 = vcombine.low %v1155_v37, %v3473_v28  ;;  %v462_v44 = vshrl.u32 %v417_v38, 16  ;;  %v465_v45 = vshll.u32 %v417_v38, 16 }
  0x41   : > { %2041 = vrot.lane.b32.xlu0 %v1599_v0, %s3386_s14  ;;  %v2093_v39 = vsel %vm5319_vm15, %v2090_v55, %v2092_v24  ;;  %v592_v46 = vadd.s32 104, %v3427_v1  ;;  %v3750_v60 = vsel %vm1468_vm2, %v3700_v19, 0  ;;  %v360_v55 = vadd.f32 %v3450_v13, %v321_v40 }
  0x42   : > { %v3728_v33 = vsel %vm5309_vm3, %v1602_v21, %v1606_v30  ;;  %v391_v48 = vmax.f32 %v359_v41, 0.0  ;;  %v692_v51 = vand.u32 15, %v590_v42  ;;  %v1157_v53 = vsel %vm1127_vm4, 65537, %v5312_v26 }
  0x43   : > { %2043 = vrot.lane.b32.xlu1 %v3728_v33, %s3386_s14  ;;  %v464_v54 = vrot.slane %v462_v44, 7  ;;  %v1760_v47 = vsel %vm5319_vm15, %v1757_v15, %v1759_v34  ;;  %v392_v56 = vmax.f32 %v360_v55, 0.0  ;;  %v1761_v61 = vrot.slane %v3750_v60, 1 }
  0x44   : > { %vm3759_vm5 = vcmp.le.s32.totalorder %v692_v51, 14  ;;  %vm3765_vm9 = vcmp.ne.s16.totalorder %v3084_v43, 0  ;;  %v706_v4 = vand.u32 15, %v592_v46  ;;  %v3228_v15 = vunpack.c.l.bf16 %v3271_v35 }
  0x45   : > { %2123 = vrot.lane.b32.xlu0 %v2093_v39, %s3383_s9  ;;  %v467_v2 = vor.u32 %v465_v45, %v464_v54  ;;  %v418_v5 = vpack.c.bf16 %v392_v56, %v391_v48  ;;  %vm1333_vm10 = vmpackc.low %vm3759_vm5, %vm3759_vm5  ;;  %v3229_v16 = vunpack.c.h.bf16 %v3271_v35  ;;  %v1507_v17 = vsel %vm3765_vm9, %v3590_v52, 0  ;;  %v3272_v48 = vld [vmem:[%s3437_s23 + $0x38] sm:$0xff]  }
  0x46   : > { %v1608_v18 = vshrl.u32 %v3700_v19, 16  ;;  %v1525_v23 = vsel %vm1467_vm14, %v3700_v19, 0  ;;  %vm3791_vm11 = vcmp.le.s32.totalorder %v706_v4, 14  ;;  %v1365_v32 = vsel %vm1333_vm10, 65537, %v5312_v26 }
  0x47   : > { %1708 = vrot.lane.b32.xlu1 %v1599_v0, %s3384_s12  ;;  %v3085_v0 = vcombine.low %v1157_v53, %v3473_v28  ;;  %v3773_v10 = vsel %vm5306_vm6, %v3677_v59, %v467_v2  ;;  %v470_v21 = vshrl.u32 %v418_v5, 16  ;;  %v1762_v59 = vsel %vm5319_vm15, %v1759_v34, %v1761_v61  ;;  %vm1335_vm13 = vmpackc.low %vm3791_vm11, %vm3791_vm11 }
  0x48   : > { %v1612_v49 = vshll.u32 %v3773_v10, 16  ;;  %v473_v31 = vshll.u32 %v418_v5, 16  ;;  %v322_v37 = vmul.f32 %v3228_v15, %v3444_v6  ;;  %v323_v34 = vmul.f32 %v3229_v16, %v3444_v6 }
  0x49   : > { %1791 = vrot.lane.b32.xlu0 %v1760_v47, %s3382_s8  ;;  %vm3795_vm12 = vcmp.ne.s16.totalorder %v3085_v0, 0  ;;  %v3799_v62 = vrot.slane %v470_v21, 7  ;;  %v1929_v38 = vrot.slane %v1525_v23, 1  ;;  %v1610_v40 = vor.u32 %v1608_v18, %v1606_v30 }
  0x4a   : > { %v1508_v39 = vsel %vm3795_vm12, %v3700_v19, 0  ;;  %v1614_v41 = vrot.slane %v1612_v49, 1  ;;  %v3103_v42 = vcombine.low %v3473_v28, %v1365_v32  ;;  %v3816_v43 = vsel %vm1468_vm2, %v3773_v10, 0 }
  0x4b   : > { %1710 = vrot.lane.b32.xlu1 %v3728_v33, %s3384_s12  ;;  %v475_v44 = vor.u32 %v473_v31, %v3799_v62  ;;  %v1367_v45 = vsel %vm1335_vm13, 65537, %v5312_v26  ;;  %v587_v46 = vadd.s32 64, %v3427_v1  ;;  %v361_v55 = vadd.f32 %v3450_v13, %v322_v37 }
  0x4c   : > { %v362_v30 = vadd.f32 %v3450_v13, %v323_v34  ;;  %v1930_v51 = vsel %vm5319_vm15, %v1927_v20, %v1929_v38  ;;  %v3831_v53 = vsel %vm5309_vm3, %v1610_v40, %v1614_v41  ;;  %v1443_v47 = vrot.slane %v3103_v42, 7 }
  0x4d   : > { %1839 = vrot.lane.b32.xlu0 %v1507_v17, %s3379_s28  ;;  %v3835_v56 = vsel %vm5306_vm6, %v464_v54, %v475_v44  ;;  %v3104_v57 = vcombine.low %v3473_v28, %v1367_v45  ;;  %v3232_v35 = vunpack.c.l.bf16 %v3272_v48  ;;  %v671_v2 = vand.u32 15, %v587_v46 }
  0x4e   : > { %5370 = vst [vmem:[#allocation3_spill] sm:$0xff] %v3835_v56  ;;  %v589_v4 = vadd.s32 80, %v3427_v1  ;;  %v393_v11 = vmax.f32 %v361_v55, 0.0  ;;  %v394_v0 = vmax.f32 %v362_v30, 0.0  ;;  %v1541_v20 = vsel %vm3765_vm9, %v3700_v19, 0 }
  0x4f   : > { %1793 = vrot.lane.b32.xlu1 %v1762_v59, %s3382_s8  ;;  %v1616_v54 = vshrl.u32 %v3773_v10, 16  ;;  %v3233_v5 = vunpack.c.h.bf16 %v3272_v48  ;;  %v1620_v16 = vshll.u32 %v3835_v56, 16  ;;  %v1558_v17 = vsel %vm1467_vm14, %v3773_v10, 0 }
  0x50   : > { %v3855_v18 = vsel %vm5305_vm7, %v3693_v12, %v1443_v47  ;;  %v3857_v21 = vrot.slane %v3104_v57, 7  ;;  %v419_v59 = vpack.c.bf16 %v394_v0, %v393_v11  ;;  %v324_v49 = vmul.f32 %v3232_v35, %v3444_v6 }
  0x51   : > { %1879 = vrot.lane.b32.xlu0 %v3728_v33, %s3385_s13  ;;  %v1931_v33 = vrot.slane %v3816_v43, 1  ;;  %v325_v23 = vmul.f32 %v3233_v5, %v3444_v6  ;;  %vm3862_vm0 = vcmp.ge.s32.totalorder %v671_v2, 1  ;;  %v685_v31 = vand.u32 15, %v589_v4  ;;  %v3273_v5 = vld [vmem:[%s3437_s23 + $0x40] sm:$0xff]  }
  0x52   : > { %v1542_v7 = vsel %vm3795_vm12, %v3773_v10, 0  ;;  %v2094_v12 = vrot.slane %v1558_v17, 1  ;;  %v1618_v32 = vor.u32 %v1616_v54, %v1614_v41  ;;  %v3870_v37 = vrot.slane %v1620_v16, 1  ;;  %vm1129_vm1 = vmpackc.low %vm3862_vm0, %vm3862_vm0 }
  0x53   : > { %1841 = vrot.lane.b32.xlu1 %v1508_v39, %s3379_s28  ;;  %v1932_v15 = vsel %vm5319_vm15, %v1929_v38, %v1931_v33  ;;  %v3875_v34 = vsel %vm1468_vm2, %v3835_v56, 0  ;;  %vm1469_vm14 = vcmp.ne.s16.totalorder %v3855_v18, 0  ;;  %v3880_v38 = vsel %vm5305_vm7, %v1443_v47, %v3857_v21 }
  0x54   : > { %v478_v39 = vshrl.u32 %v419_v59, 16  ;;  %v363_v40 = vadd.f32 %v3450_v13, %v324_v49  ;;  %v364_v41 = vadd.f32 %v3450_v13, %v325_v23  ;;  %vm3889_vm2 = vcmp.ge.s32.totalorder %v685_v31, 1 }
  0x55   : > { %1961 = vrot.lane.b32.xlu0 %v1930_v51, %s3381_s30  ;;  %v2095_v42 = vsel %vm5319_vm15, %v2092_v24, %v2094_v12  ;;  %v2096_v44 = vrot.slane %v3875_v34, 1  ;;  %v594_v45 = vadd.s32 120, %v3427_v1  ;;  %v1623_v46 = vsel %vm5309_vm3, %v1618_v32, %v3870_v37  ;;  %vm1131_vm5 = vmpackc.low %vm3889_vm2, %vm3889_vm2 }
  0x56   : > { %v1485_v55 = vsel %vm1469_vm14, %v3773_v10, 0  ;;  %vm1470_vm4 = vcmp.ne.s16.totalorder %v3880_v38, 0  ;;  %v1159_v30 = vsel %vm1129_vm1, 65537, %v5312_v26  ;;  %v3909_v22 = vrot.slane %v478_v39, 7 }
  0x57   : > { %1881 = vrot.lane.b32.xlu1 %v3831_v53, %s3385_s13  ;;  %v481_v24 = vshll.u32 %v419_v59, 16  ;;  %v395_v48 = vmax.f32 %v363_v40, 0.0  ;;  %v396_v51 = vmax.f32 %v364_v41, 0.0  ;;  %v2097_v47 = vsel %vm5319_vm15, %v2094_v12, %v2096_v44 }
  0x58   : > { %v1763_v57 = vrot.slane %v1485_v55, 1  ;;  %v720_v35 = vand.u32 15, %v594_v45  ;;  %v3919_v2 = vsel %vm1470_vm4, %v3835_v56, 0  ;;  %v3086_v4 = vcombine.low %v1159_v30, %v3473_v28 }
  0x59   : > { %2009 = vrot.lane.b32.xlu0 %v1541_v20, %s3380_s29  ;;  %v1161_v11 = vsel %vm1131_vm5, 65537, %v5312_v26  ;;  %v596_v0 = vadd.s32 136, %v3427_v1  ;;  %v483_v20 = vor.u32 %v481_v24, %v3909_v22  ;;  %v420_v54 = vpack.c.bf16 %v396_v51, %v395_v48 }
  0x5a   : > { %v1765_v16 = vrot.slane %v3919_v2, 1  ;;  %v3087_v17 = vcombine.low %v1161_v11, %v3473_v28  ;;  %vm3934_vm10 = vcmp.le.s32.totalorder %v720_v35, 14  ;;  %vm3938_vm11 = vcmp.ne.s16.totalorder %v3086_v4, 0  ;;  %v3274_v35 = vld [vmem:[%s3437_s23 + $0x48] sm:$0xff]  }
  0x5b   : > { %1963 = vrot.lane.b32.xlu1 %v1932_v15, %s3381_s30  ;;  %v1764_v15 = vsel %vm5319_vm15, %v1761_v61, %v1763_v57  ;;  %v734_v23 = vand.u32 15, %v596_v0  ;;  %v3236_v36 = vunpack.c.l.bf16 %v3273_v5  ;;  %v486_v60 = vshrl.u32 %v420_v54, 16  ;;  %vm1337_vm13 = vmpackc.low %vm3934_vm10, %vm3934_vm10 }
  0x5c   : > { %v3237_v61 = vunpack.c.h.bf16 %v3273_v5  ;;  %v1766_v31 = vsel %vm5319_vm15, %v1763_v57, %v1765_v16  ;;  %vm3957_vm0 = vcmp.ne.s16.totalorder %v3087_v17, 0  ;;  %v1624_v12 = vshrl.u32 %v3835_v56, 16 }
  0x5d   : > { %2045 = vrot.lane.b32.xlu0 %v3831_v53, %s3386_s14  ;;  %v1527_v39 = vsel %vm1469_vm14, %v3835_v56, 0  ;;  %vm3966_vm1 = vcmp.le.s32.totalorder %v734_v23, 14  ;;  %v326_v41 = vmul.f32 %v3236_v36, %v3444_v6  ;;  %v3971_v29 = vrot.slane %v486_v60, 7 }
  0x5e   : > { %v1369_v45 = vsel %vm1337_vm13, 65537, %v5312_v26  ;;  %v327_v55 = vmul.f32 %v3237_v61, %v3444_v6  ;;  %v1933_v30 = vrot.slane %v1527_v39, 1  ;;  %vm1339_vm2 = vmpackc.low %vm3966_vm1, %vm3966_vm1  ;;  %v591_v24 = vadd.s32 96, %v3427_v1 }
  0x5f   : > { %2011 = vrot.lane.b32.xlu1 %v1542_v7, %s3380_s29  ;;  %v1509_v7 = vsel %vm3938_vm11, %v3773_v10, 0  ;;  %v1510_v48 = vsel %vm3957_vm0, %v3835_v56, 0  ;;  %v1626_v51 = vor.u32 %v1624_v12, %v3870_v37  ;;  %v3105_v57 = vcombine.low %v3473_v28, %v1369_v45 }
  0x60   : > { %v365_v0 = vadd.f32 %v3450_v13, %v326_v41  ;;  %v1934_v37 = vsel %vm5319_vm15, %v1931_v33, %v1933_v30  ;;  %v699_v5 = vand.u32 15, %v591_v24  ;;  %v3240_v17 = vunpack.c.l.bf16 %v3274_v35 }
  0x61   : > { %2125 = vrot.lane.b32.xlu0 %v2095_v42, %s3383_s9  ;;  %v489_v42 = vshll.u32 %v420_v54, 16  ;;  %v1371_v54 = vsel %vm1339_vm2, 65537, %v5312_v26  ;;  %v1447_v36 = vrot.slane %v3105_v57, 7  ;;  %v3241_v60 = vunpack.c.h.bf16 %v3274_v35  ;;  %v3279_v35 = vld [vmem:[%s3437_s23 + $0x70] sm:$0xff]  }
  0x62   : > { %v3106_v61 = vcombine.low %v3473_v28, %v1371_v54  ;;  %v397_v43 = vmax.f32 %v365_v0, 0.0  ;;  %v1543_v33 = vsel %vm3938_vm11, %v3835_v56, 0  ;;  %vm4018_vm5 = vcmp.ge.s32.totalorder %v699_v5, 1 }
  0x63   : > { %2047 = vrot.lane.b32.xlu1 %v1623_v46, %s3386_s14  ;;  %v491_v11 = vor.u32 %v489_v42, %v3971_v29  ;;  %v4031_v41 = vsel %vm5305_vm7, %v3857_v21, %v1447_v36  ;;  %v329_v24 = vmul.f32 %v3241_v60, %v3444_v6  ;;  %vm1133_vm13 = vmpackc.low %vm4018_vm5, %vm4018_vm5  ;;  %v598_v38 = vadd.s32 152, %v3427_v1 }
  0x64   : > { %v4033_v42 = vrot.slane %v3106_v61, 7  ;;  %vm1471_vm10 = vcmp.ne.s16.totalorder %v4031_v41, 0  ;;  %v1163_v5 = vsel %vm1133_vm13, 65537, %v5312_v26  ;;  %vm2485_vm2 = vcmask 1041408  }
  0x65   : > { %2127 = vrot.lane.b32.xlu0 %v2097_v47, %s3383_s9 }
  0x67   : > { %1712 = vrot.lane.b32.xlu1 %v3831_v53, %s3384_s12  ;;  %v3944_v53 = vsel %vm5306_vm6, %v3799_v62, %v483_v20  ;;  %v5380_v62 = vmov 0  ;;  %v366_v20 = vadd.f32 %v3450_v13, %v327_v55  ;;  %v328_v55 = vmul.f32 %v3240_v17, %v3444_v6 }
  0x68   : > { %5379 = vst [vmem:[#allocation4_spill] sm:$0xff] %v3944_v53  ;;  %v5381_v62 = vsel %vm3957_vm0, 4294967295, %v5380_v62  ;;  %v1628_v32 = vshll.u32 %v3944_v53, 16  ;;  %v3990_v4 = vsel %vm1470_vm4, %v3944_v53, 0  ;;  %v1560_v40 = vsel %vm1469_vm14, %v3944_v53, 0 }
  0x69   : > { %1795 = vrot.lane.b32.xlu0 %v1764_v15, %s3382_s8  ;;  %5382 = vst [vmem:[#allocation5_spill] sm:$0xff] %v5381_v62  ;;  %v593_v15 = vadd.s32 112, %v3427_v1  ;;  %v1935_v23 = vrot.slane %v3990_v4, 1  ;;  %v1544_v18 = vsel %vm3957_vm0, %v3944_v53, 0  ;;  %v3260_v17 = vunpack.c.l.bf16 %v3279_v35 }
  0x6a   : > { %v1630_v47 = vrot.slane %v1628_v32, 1  ;;  %v1487_v34 = vsel %vm1471_vm10, %v3944_v53, 0 }
  0x6b   : > { %1714 = vrot.lane.b32.xlu1 %v1623_v46, %s3384_s12  ;;  %v1936_v32 = vsel %vm5319_vm15, %v1933_v30, %v1935_v23  ;;  %v2098_v30 = vrot.slane %v1560_v40, 1 }
  0x6c   : > { %v4003_v59 = vsel %vm5309_vm3, %v1626_v51, %v1630_v47 }
  0x6d   : > { %1843 = vrot.lane.b32.xlu0 %v1509_v7, %s3379_s28  ;;  %v1632_v7 = vshrl.u32 %v3944_v53, 16  ;;  %v2099_v54 = vsel %vm5319_vm15, %v2096_v44, %v2098_v30  ;;  %v3366_v44 = vld [vmem:[%s5302_s3 + $0x10] ss:$0 sps:$4 sm:$0x33]  }
  0x6e   : > { %3344 = vmatprep.subr.msk.bf16.mxu0 %vm2485_vm2, %v3366_v44  ;;  %3345 = vmatprep.subr.msk.bf16.mxu1 %vm2485_vm2, %v3366_v44 }
  0x6f   : > { %1797 = vrot.lane.b32.xlu1 %v1766_v31, %s3382_s8  ;;  %v398_v31 = vmax.f32 %v366_v20, 0.0  ;;  %v1634_v21 = vor.u32 %v1632_v7, %v1630_v47  ;;  %v367_v47 = vadd.f32 %v3450_v13, %v328_v55  ;;  %v368_v20 = vadd.f32 %v3450_v13, %v329_v24 }
  0x70   : > { %v3088_v7 = vcombine.low %v1163_v5, %v3473_v28 }
  0x71   : > { %1883 = vrot.lane.b32.xlu0 %v1623_v46, %s3385_s13  ;;  %v4008_v46 = vsel %vm5306_vm6, %v3909_v22, %v491_v11  ;;  %v713_v22 = vand.u32 15, %v593_v15  ;;  %v421_v45 = vpack.c.bf16 %v398_v31, %v397_v43  ;;  %v4060_v11 = vsel %vm5305_vm7, %v1447_v36, %v4033_v42 }
  0x72   : > { %5385 = vst [vmem:[#allocation6_spill] sm:$0xff] %v4008_v46  ;;  %v1636_v39 = vshll.u32 %v4008_v46, 16  ;;  %v4051_v57 = vsel %vm1470_vm4, %v4008_v46, 0  ;;  %v600_v15 = vadd.s32 168, %v3427_v1  ;;  %vm1472_vm1 = vcmp.ne.s16.totalorder %v4060_v11, 0 }
  0x73   : > { %1845 = vrot.lane.b32.xlu1 %v1510_v48, %s3379_s28  ;;  %vm4042_vm14 = vcmp.ge.s32.totalorder %v713_v22, 1  ;;  %v494_v0 = vshrl.u32 %v421_v45, 16  ;;  %v497_v61 = vshll.u32 %v421_v45, 16  ;;  %v399_v43 = vmax.f32 %v367_v47, 0.0 }
  0x74   : > { %v4046_v51 = vrot.slane %v1636_v39, 1  ;;  %vm1135_vm4 = vmpackc.low %vm4042_vm14, %vm4042_vm14  ;;  %v400_v31 = vmax.f32 %v368_v20, 0.0  ;;  %v748_v22 = vand.u32 15, %v598_v38  ;;  %v1767_v39 = vrot.slane %v1487_v34, 1 }
  0x75   : > { %1965 = vrot.lane.b32.xlu0 %v1934_v37, %s3381_s30  ;;  %v2100_v37 = vrot.slane %v4051_v57, 1  ;;  %v4088_v60 = vrot.slane %v494_v0, 7  ;;  %v1165_v12 = vsel %vm1135_vm4, 65537, %v5312_v26  ;;  %v762_v40 = vand.u32 15, %v600_v15  ;;  %v3275_v0 = vld [vmem:[%s3437_s23 + $0x50] sm:$0xff]  }
  0x76   : > { %v4079_v36 = vsel %vm5309_vm3, %v1634_v21, %v4046_v51  ;;  %v4101_v45 = vsel %vm1472_vm1, %v4008_v46, 0  ;;  %v422_v24 = vpack.c.bf16 %v400_v31, %v399_v43  ;;  %v338_v48 = vmul.f32 %v3260_v17, %v3444_v6 }
  0x77   : > { %1885 = vrot.lane.b32.xlu1 %v4003_v59, %s3385_s13  ;;  %v499_v55 = vor.u32 %v497_v61, %v4088_v60  ;;  %vm4108_vm5 = vcmp.le.s32.totalorder %v748_v22, 14  ;;  %v1768_v47 = vsel %vm5319_vm15, %v1765_v16, %v1767_v39  ;;  %v5308_v20 = vrot.slane %v4101_v45, 1  ;;  %v4170_v22 = vld [vmem:[%s5300_s1] ss:$0 sm:$0xff] }
  0x78   : > { %vm4119_vm14 = vcmp.ne.s16.totalorder %v3088_v7, 0  ;;  %vm4123_vm13 = vcmp.le.s32.totalorder %v762_v40, 14  ;;  %vm1341_vm4 = vmpackc.low %vm4108_vm5, %vm4108_vm5  ;;  %v3244_v2 = vunpack.c.l.bf16 %v3275_v0  ;;  %v3245_v16 = vunpack.c.h.bf16 %v3275_v0 }
  0x79   : > { %2013 = vrot.lane.b32.xlu0 %v1543_v33, %s3380_s29  ;;  %v3261_v33 = vunpack.c.h.bf16 %v3279_v35  ;;  %v377_v5 = vadd.f32 %v3450_v13, %v338_v48  ;;  %v1511_v17 = vsel %vm4119_vm14, %v3944_v53, 0  ;;  %v5398_v34 = vmov 0 }
  0x7a   : > { %v1529_v43 = vsel %vm1471_vm10, %v4008_v46, 0  ;;  %v505_v31 = vshll.u32 %v422_v24, 16  ;;  %v597_v38 = vadd.s32 144, %v3427_v1  ;;  %v5419_v58 = vrot.slane %v4101_v45, 1 }
  0x7b   : > { %1967 = vrot.lane.b32.xlu1 %v1936_v32, %s3381_s30  ;;  %v2101_v32 = vsel %vm5319_vm15, %v2098_v30, %v2100_v37  ;;  %v339_v21 = vmul.f32 %v3261_v33, %v3444_v6  ;;  %v3089_v30 = vcombine.low %v1165_v12, %v3473_v28  ;;  %v5392_v6 = vmov 0 }
  0x7c   : > { %v5393_v6 = vsel %vm4119_vm14, 4294967295, %v5392_v6  ;;  %v1373_v33 = vsel %vm1341_vm4, 65537, %v5312_v26  ;;  %v409_v40 = vmax.f32 %v377_v5, 0.0  ;;  %v1937_v48 = vrot.slane %v1529_v43, 1 }
  0x7d   : > { %2049 = vrot.lane.b32.xlu0 %v4003_v59, %s3386_s14  ;;  %5394 = vst [vmem:[#allocation7_spill] sm:$0xff] %v5393_v6  ;;  %v378_v15 = vadd.f32 %v3450_v13, %v339_v21  ;;  %vm4148_vm7 = vcmp.ne.s16.totalorder %v3089_v30, 0  ;;  %v1640_v13 = vshrl.u32 %v4008_v46, 16  ;;  %v3276_v30 = vld [vmem:[%s3437_s23 + $0x58] sm:$0xff]   ;;  %v3107_v0 = vcombine.low %v3473_v28, %v1373_v33 }
  0x7e   : > { %v5399_v34 = vsel %vm4148_vm7, 4294967295, %v5398_v34 }
  0x7f   : > { %2015 = vrot.lane.b32.xlu1 %v1544_v18, %s3380_s29  ;;  %v2487_v18 = vsel %vm2485_vm2, %v3366_v44, 0  ;;  %vm1343_vm2 = vmpackc.low %vm4123_vm13, %vm4123_vm13  ;;  %5400 = vst [vmem:[#allocation9_spill] sm:$0xff] %v5399_v34  ;;  %v595_v44 = vadd.s32 128, %v3427_v1  ;;  %vm5404_vm13 = vcmask 1040384  }
  0x80   : > { %3305 = vmatpush3.bf16.msra.mxu0 %v2487_v18  ;;  %3343 = vmatpush3.bf16.msra.mxu1 %v2487_v18  ;;  %v1375_v12 = vsel %vm1343_vm2, 65537, %v5312_v26  ;;  %v1642_v18 = vor.u32 %v1640_v13, %v4046_v51  ;;  %v4193_v51 = vld [vmem:[%s5301_s2] ss:$0 sm:$0xff]  ;;  %v1938_v13 = vsel %vm5319_vm15, %v1935_v23, %v1937_v48 }
  0x81   : > { %2129 = vrot.lane.b32.xlu0 %v2099_v54, %s3383_s9  ;;  %v4129_v54 = vsel %vm5306_vm6, %v3971_v29, %v499_v55  ;;  %v1770_v29 = vsel %vm5319_vm15, %v1767_v39, %v5308_v20  ;;  %v331_v39 = vmul.f32 %v4170_v22, %v3245_v16  ;;  %v410_v55 = vmax.f32 %v378_v15, 0.0  ;;  %v3277_v20 = vld [vmem:[%s3437_s23 + $0x60] sm:$0xff]  }
  0x82   : > { %5397 = vst [vmem:[#allocation8_spill] sm:$0xff] %v4129_v54  ;;  %v1644_v61 = vshll.u32 %v4129_v54, 16  ;;  %v727_v21 = vand.u32 15, %v595_v44  ;;  %v3248_v15 = vunpack.c.l.bf16 %v3276_v30 }
  0x83   : > { %2051 = vrot.lane.b32.xlu1 %v4079_v36, %s3386_s14  ;;  %v370_v5 = vadd.f32 %v4193_v51, %v331_v39 }
  0x84   : > { %v1646_v35 = vrot.slane %v1644_v61, 1  ;;  %vm4205_vm5 = vcmp.ge.s32.totalorder %v727_v21, 1  ;;  %v332_v39 = vmul.f32 %v4170_v22, %v3248_v15 }
  0x85   : > { %2131 = vrot.lane.b32.xlu0 %v2101_v32, %s3383_s9  ;;  %v330_v32 = vmul.f32 %v4170_v22, %v3244_v2  ;;  %vm1137_vm4 = vmpackc.low %vm4205_vm5, %vm4205_vm5  ;;  %vm5410_vm5 = vsmask.f32 256 }
  0x86   : > { %v4210_v61 = vsel %vm5309_vm3, %v1642_v18, %v1646_v35  ;;  %v1562_v18 = vsel %vm1471_vm10, %v4129_v54, 0  ;;  %vm5405_vm10 = vmmov %vm5404_vm13  ;;  %v371_v15 = vadd.f32 %v4193_v51, %v332_v39 }
  0x87   : > { %1716 = vrot.lane.b32.xlu1 %v4003_v59, %s3384_s12  ;;  %v502_v59 = vshrl.u32 %v422_v24, 16  ;;  %v1512_v24 = vsel %vm4148_vm7, %v4008_v46, 0  ;;  %v369_v16 = vadd.f32 %v4193_v51, %v330_v32  ;;  %v402_v32 = vmax.f32 %v370_v5, 0.0 }
  0x89   : > { %1799 = vrot.lane.b32.xlu0 %v1768_v47, %s3382_s8  ;;  %v4164_v7 = vrot.slane %v502_v59, 7  ;;  %v3108_v47 = vcombine.low %v3473_v28, %v1375_v12  ;;  %v4187_v59 = vsel %vm1472_vm1, %v4129_v54, 0  ;;  %v401_v23 = vmax.f32 %v369_v16, 0.0 }
  0x8a   : > { %v5307_v43 = vrot.slane %v4187_v59, 1 }
  0x8b   : > { %1718 = vrot.lane.b32.xlu1 %v4079_v36, %s3384_s12  ;;  %v507_v2 = vor.u32 %v505_v31, %v4164_v7  ;;  %v741_v31 = vand.u32 15, %v597_v38  ;;  %v4219_v4 = vrot.slane %v3108_v47, 7  ;;  %v602_v47 = vadd.s32 184, %v3427_v1 }
  0x8c   : > { %v1940_v21 = vsel %vm5319_vm15, %v1937_v48, %v5307_v43  ;;  %v553_v38 = vshll.u32 %v3487_v50, 16  ;;  %v2102_v50 = vrot.slane %v1562_v18, 1 }
  0x8d   : > { %1847 = vrot.lane.b32.xlu0 %v1511_v17, %s3379_s28  ;;  %v3249_v17 = vunpack.c.h.bf16 %v3276_v30  ;;  %v4217_v12 = vsel %vm5306_vm6, %v4088_v60, %v507_v2  ;;  %v1545_v60 = vsel %vm4119_vm14, %v4008_v46, 0  ;;  %vm4251_vm2 = vcmp.ge.s32.totalorder %v741_v31, 1 }
  0x8e   : > { %5403 = vst [vmem:[#allocation10_spill] sm:$0xff] %v4217_v12  ;;  %v1652_v30 = vshll.u32 %v4217_v12, 16  ;;  %v423_v2 = vpack.c.bf16 %v402_v32, %v401_v23  ;;  %v1167_v31 = vsel %vm1137_vm4, 65537, %v5312_v26  ;;  %vm1139_vm6 = vmpackc.low %vm4251_vm2, %vm4251_vm2  ;;  %v776_v11 = vand.u32 15, %v602_v47 }
  0x8f   : > { %1801 = vrot.lane.b32.xlu1 %v1770_v29, %s3382_s8  ;;  %v4199_v29 = vpack.c.bf16 %v410_v55, %v409_v40  ;;  %v333_v40 = vmul.f32 %v4170_v22, %v3249_v17  ;;  %v555_v39 = vor.u32 %v553_v38, %v3507_v3  ;;  %v2103_v44 = vsel %vm5319_vm15, %v2100_v37, %v2102_v50 }
  0x90   : > { %v4278_v23 = vrot.slane %v1652_v30, 1  ;;  %v1169_v57 = vsel %vm1139_vm6, 65537, %v5312_v26  ;;  %vm5324_vm6 = vcmask 31744  }
  0x91   : > { %1887 = vrot.lane.b32.xlu0 %v4079_v36, %s3385_s13  ;;  %v1451_v36 = vrot.slane %v3107_v0, 7  ;;  %v542_v55 = vshrl.u32 %v4199_v29, 16  ;;  %v372_v17 = vadd.f32 %v4193_v51, %v333_v40  ;;  %v510_v40 = vshrl.u32 %v423_v2, 16 }
  0x93   : > { %1849 = vrot.lane.b32.xlu1 %v1512_v24, %s3379_s28  ;;  %v1648_v24 = vshrl.u32 %v4129_v54, 16  ;;  %v4240_v0 = vsel %vm5404_vm13, %v4033_v42, %v1451_v36  ;;  %v4249_v41 = vsel %vm5405_vm10, %v1451_v36, %v4219_v4  ;;  %v1546_v42 = vsel %vm4148_vm7, %v4129_v54, 0 }
  0x94   : > { %v4269_v36 = vsel %vm1472_vm1, %v4217_v12, 0  ;;  %vm5311_vm13 = vcmp.ne.s16.totalorder %v4240_v0, 0  ;;  %vm5325_vm10 = vcmp.ne.s16.totalorder %v4249_v41, 0  ;;  %v4285_v32 = vrot.slane %v542_v55, 7 }
  0x95   : > { %1969 = vrot.lane.b32.xlu0 %v1938_v13, %s3381_s30  ;;  %v1650_v13 = vor.u32 %v1648_v24, %v1646_v35  ;;  %v604_v35 = vadd.s32 200, %v3427_v1  ;;  %v403_v24 = vmax.f32 %v371_v15, 0.0  ;;  %v404_v18 = vmax.f32 %v372_v17, 0.0 }
  0x96   : > { %v5310_v55 = vrot.slane %v4269_v36, 1  ;;  %v4301_v3 = vsel %vm5325_vm10, %v4217_v12, 0  ;;  %vm4313_vm1 = vcmp.le.s32.totalorder %v776_v11, 14  ;;  %v4320_v15 = vsel %vm5410_vm5, %v4285_v32, %v555_v39 }
  0x97   : > { %v4213_v33 = vpop.permute.xlu0 %1835  ;;  %1889 = vrot.lane.b32.xlu1 %v4210_v61, %s3385_s13  ;;  %v4309_v30 = vsel %vm5309_vm3, %v1650_v13, %v4278_v23  ;;  %v790_v48 = vand.u32 15, %v604_v35  ;;  %v4322_v17 = vrot.slane %v510_v40, 7  ;;  %v3091_v11 = vcombine.low %v1169_v57, %v3473_v28  ;;  %vm1345_vm5 = vmpackc.low %vm4313_vm1, %vm4313_vm1 }
  0x98   : > { %v4255_v16 = vpop.permute.xlu1 %1837  ;;  %v4326_v43 = vpack.c.bf16 %v404_v18, %v403_v24  ;;  %v2105_v35 = vsel %vm5319_vm15, %v2102_v50, %v5310_v55  ;;  %v1656_v40 = vshrl.u32 %v4217_v12, 16  ;;  %v4348_v24 = vsel %vm5311_vm13, %v4217_v12, 0 }
  0x99   : > { %2017 = vrot.lane.b32.xlu0 %v1545_v60, %s3380_s29  ;;  %v1489_v60 = vsel %vm5311_vm13, %v4129_v54, 0  ;;  %vm4350_vm3 = vcmp.le.s32.totalorder %v790_v48, 14  ;;  %v1243_v57 = vsel %vm3492_vm8, %v3526_v9, 0  ;;  %v3252_v55 = vunpack.c.l.bf16 %v3277_v20 }
  0x9a   : > { %v1771_v13 = vrot.slane %v1489_v60, 1  ;;  %vm4360_vm13 = vcmp.ne.s16.totalorder %v3091_v11, 0  ;;  %v5416_v39 = vmov 0  ;;  %v518_v48 = vshrl.u32 %v4326_v43, 16  ;;  %vm1347_vm4 = vmpackc.low %vm4350_vm3, %vm4350_vm3 }
  0x9b   : > { %v4261_v5 = vpop.permute.xlu0 %2005  ;;  %1971 = vrot.lane.b32.xlu1 %v1940_v21, %s3381_s30  ;;  %v3090_v21 = vcombine.low %v1167_v31, %v3473_v28  ;;  %v513_v31 = vshll.u32 %v423_v2, 16  ;;  %v5411_v2 = vmov 0  ;;  %v5417_v39 = vsel %vm4360_vm13, 4294967295, %v5416_v39 }
  0x9c   : > { %5418 = vst [vmem:[#allocation12_spill] sm:$0xff] %v5417_v39  ;;  %v1772_v9 = vsel %vm5319_vm15, %v5419_v58, %v1771_v13  ;;  %v4382_v58 = vor.u32 %v1656_v40, %v4278_v23  ;;  %vm5423_vm1 = vsmask.f32 256  ;;  %v4399_v40 = vrot.slane %v518_v48, 7 }
  0x9d   : > { %2053 = vrot.lane.b32.xlu0 %v4210_v61, %s3386_s14  ;;  %vm4335_vm2 = vcmp.ne.s16.totalorder %v3090_v21, 0  ;;  %v601_v21 = vadd.s32 176, %v3427_v1  ;;  %v515_v38 = vor.u32 %v513_v31, %v4322_v17  ;;  %v606_v48 = vadd.s32 216, %v3427_v1 }
  0x9e   : > { %v5412_v2 = vsel %vm4335_vm2, 4294967295, %v5411_v2  ;;  %v1513_v31 = vsel %vm4335_vm2, %v4129_v54, 0  ;;  %v1514_v54 = vsel %vm4360_vm13, %v4217_v12, 0 }
  0x9f   : > { %2019 = vrot.lane.b32.xlu1 %v1546_v42, %s3380_s29  ;;  %v4305_v37 = vpop.permute.xlu1 %2007  ;;  %v4311_v47 = vpop.permute.xlu0 %1957  ;;  %v599_v42 = vadd.s32 160, %v3427_v1  ;;  %5413 = vst [vmem:[#allocation11_spill] sm:$0xff] %v5412_v2  ;;  %v769_v11 = vand.u32 15, %v601_v21  ;;  %v5425_v21 = vmov 0   ;;  %v1245_v2 = vsel %vm3795_vm12, %v3590_v52, 0 }
  0xa1   : > { %2133 = vrot.lane.b32.xlu0 %v2103_v44, %s3383_s9  ;;  %v755_v18 = vand.u32 15, %v599_v42  ;;  %v1377_v42 = vsel %vm1345_vm5, 65537, %v5312_v26 }
  0xa2   : > { %v3109_v34 = vcombine.low %v3473_v28, %v1377_v42 }
  0xa3   : > { %2055 = vrot.lane.b32.xlu1 %v4309_v30, %s3386_s14  ;;  %v1788_v44 = vpop.permute.xlu1 %1787  ;;  %v4343_v60 = vpop.permute.xlu0 %2121  ;;  %vm4384_vm8 = vcmp.ge.s32.totalorder %v755_v18, 1  ;;  %v521_v18 = vshll.u32 %v4326_v43, 16 }
  0xa4   : > { %vm1141_vm5 = vmpackc.low %vm4384_vm8, %vm4384_vm8  ;;  %v1455_v53 = vrot.slane %v3109_v34, 7  ;;  %vm5434_vm8 = vcmp.ne.s16.totalorder %v4240_v0, 0 }
  0xa5   : > { %2135 = vrot.lane.b32.xlu0 %v2105_v35, %s3383_s9  ;;  %v3253_v35 = vunpack.c.h.bf16 %v3277_v20  ;;  %v4393_v20 = vsel %vm5423_vm1, %v4164_v7, %v515_v38  ;;  %v1379_v7 = vsel %vm1347_vm4, 65537, %v5425_v21  ;;  %vm4429_vm1 = vcmp.ge.s32.totalorder %v769_v11, 1 }
  0xa6   : > { %5424 = vst [vmem:[#allocation13_spill] sm:$0xff] %v4393_v20  ;;  %v3110_v6 = vcombine.low %v3473_v28, %v1379_v7  ;;  %v523_v62 = vor.u32 %v521_v18, %v4399_v40  ;;  %v4446_v11 = vsel %vm1141_vm5, 65537, %v5425_v21  ;;  %vm5435_vm5 = vcmask 130048  }
  0xa7   : > { %1720 = vrot.lane.b32.xlu1 %v4210_v61, %s3384_s12  ;;  %v1790_v26 = vpop.permute.xlu1 %1789  ;;  %v1705_v46 = vpop.permute.xlu0 %1704  ;;  %v5420_v61 = vrot.slane %v4301_v3, 1  ;;  %v335_v50 = vmul.f32 %v4170_v22, %v3253_v35  ;;  %vm5451_vm4 = vcmask 261120  }
  0xa8   : > { %v2155_v23 = vsel %vm5324_vm6, 0, %v1705_v46  ;;  %v5427_v46 = vrot.slane %v4187_v59, 1  ;;  %v1660_v59 = vshll.u32 %v4393_v20, 16 }
  0xa9   : > { %v1774_v45 = vsel %vm5319_vm15, %v1771_v13, %v5420_v61  ;;  %v334_v13 = vmul.f32 %v4170_v22, %v3252_v55  ;;  %1803 = vrot.lane.b32.xlu0 %v1772_v9, %s3382_s8  ;;  %v5426_v55 = vrot.slane %v4348_v24, 1  ;;  %v4427_v61 = vsel %vm5325_vm10, %v4393_v20, 0 }
  0xaa   : > { %v1662_v7 = vrot.slane %v1660_v59, 1  ;;  %vm5438_vm10 = vcmask 162816  }
  0xab   : > { %1722 = vrot.lane.b32.xlu1 %v4309_v30, %s3384_s12  ;;  %v1942_v38 = vsel %vm5319_vm15, %v5427_v46, %v5426_v55  ;;  %v1960_v42 = vpop.permute.xlu1 %1959  ;;  %v1707_v9 = vpop.permute.xlu0 %1706  ;;  %v608_v46 = vadd.s32 232, %v3427_v1  ;;  %vm5430_vm15 = vcmask 64512  }
  0xac   : > { %v2203_v35 = vsel %vm5430_vm15, %v2155_v23, %v1788_v44  ;;  %v2158_v43 = vsel %vm5324_vm6, %v1243_v57, %v1707_v9  ;;  %vm5431_vm3 = vmmov %vm5430_vm15  ;;  %v373_v44 = vadd.f32 %v4193_v51, %v334_v13  ;;  %vm5432_vm15 = vcmask 97280  }
  0xad   : > { %v2205_v56 = vsel %vm5431_vm3, %v2158_v43, %v1790_v26  ;;  %1851 = vrot.lane.b32.xlu0 %v1513_v31, %s3379_s28  ;;  %v5330_v26 = vrot.slane %v4427_v61, 1  ;;  %v374_v57 = vadd.f32 %v4193_v51, %v335_v50  ;;  %v804_v31 = vand.u32 15, %v606_v48  ;;  %vm5433_vm3 = vmmov %vm5432_vm15 }
  0xae   : > { %v2238_v34 = vsel %vm5432_vm15, %v2205_v56, %v4255_v16  ;;  %v2236_v25 = vsel %vm5433_vm3, %v2203_v35, %v4213_v33  ;;  %v4459_v13 = vsel %vm5434_vm8, %v4393_v20, 0  ;;  %v818_v43 = vand.u32 15, %v608_v46  ;;  %vm5436_vm15 = vmmov %vm5435_vm5 }
  0xaf   : > { %1805 = vrot.lane.b32.xlu1 %v1774_v45, %s3382_s8  ;;  %v1878_v23 = vpop.permute.xlu1 %1877  ;;  %v1876_v18 = vpop.permute.xlu0 %1875  ;;  %v3278_v45 = vld [vmem:[%s3437_s23 + $0x68] sm:$0xff]   ;;  %vm5437_vm6 = vcmask 1040384   ;;  %v4468_v48 = vrot.slane %v3110_v6, 7  ;;  %vm5439_vm3 = vmmov %vm5438_vm10  ;;  %vm5440_vm8 = vsmask.f32 256  ;;  %v405_v59 = vmax.f32 %v373_v44, 0.0 }
  0xb0   : > { %v2271_v56 = vsel %vm5435_vm5, %v2238_v34, %v1878_v23  ;;  %v2269_v16 = vsel %vm5436_vm15, %v2236_v25, %v1876_v18  ;;  %v4466_v50 = vsel %vm5437_vm6, %v4219_v4, %v1455_v53  ;;  %v4477_v0 = vsel %vm5440_vm8, %v4322_v17, %v523_v62 }
  0xb1   : > { %v2304_v33 = vsel %vm5438_vm10, %v2271_v56, %v1960_v42  ;;  %v2302_v9 = vsel %vm5439_vm3, %v2269_v16, %v4311_v47  ;;  %1891 = vrot.lane.b32.xlu0 %v4309_v30, %s3385_s13  ;;  %vm5441_vm6 = vcmask 195584   ;;  %v406_v6 = vmax.f32 %v374_v57, 0.0 }
  0xb2   : > { %v2335_v4 = vsel %vm5441_vm6, %v2302_v9, %v4261_v5  ;;  %v3256_v42 = vunpack.c.l.bf16 %v3278_v45  ;;  %vm4485_vm5 = vcmp.le.s32.totalorder %v804_v31, 14  ;;  %vm5444_vm15 = vsmask.f32 7424  ;;  %vm5447_vm8 = vmmov %vm5441_vm6 }
  0xb3   : > { %1853 = vrot.lane.b32.xlu1 %v1514_v54, %s3379_s28  ;;  %v4491_v62 = vsel %vm5444_vm15, %v4382_v58, %v1662_v7  ;;  %v2042_v30 = vpop.permute.xlu0 %2041  ;;  %v1664_v54 = vshrl.u32 %v4393_v20, 16  ;;  %v3257_v17 = vunpack.c.h.bf16 %v3278_v45  ;;  %vm4494_vm3 = vcmp.le.s32.totalorder %v818_v43, 14 }
  0xb4   : > { %v2337_v35 = vsel %vm5447_vm8, %v2304_v33, %v4305_v37  ;;  %vm5448_vm6 = vcmask 228352   ;;  %v5449_v34 = vrot.slane %v4348_v24, 1  ;;  %vm5450_vm15 = vcmask 1046528   ;;  %vm5452_vm8 = vmpackc.low %vm4429_vm1, %vm4429_vm1 }
  0xb5   : > { %v2044_v46 = vpop.permute.xlu1 %2043  ;;  %v2368_v44 = vsel %vm5448_vm6, %v2335_v4, %v2042_v30  ;;  %v2106_v57 = vrot.slane %v4459_v13, 1  ;;  %1973 = vrot.lane.b32.xlu0 %v1942_v38, %s3381_s30  ;;  %v1668_v23 = vshll.u32 %v4477_v0, 16  ;;  %vm1475_vm10 = vcmp.ne.s16.totalorder %v4466_v50, 0  ;;  %vm1349_vm6 = vmpackc.low %vm4485_vm5, %vm4485_vm5 }
  0xb6   : > { %v1944_v58 = vsel %vm5450_vm15, %v5449_v34, %v5330_v26  ;;  %v2401_v31 = vsel %vm5451_vm4, %v2368_v44, %v4343_v60  ;;  %v1173_v37 = vsel %vm5452_vm8, 65537, %v5425_v21  ;;  %vm5453_vm15 = vcmask 293888   ;;  %vm1351_vm1 = vmpackc.low %vm4494_vm3, %vm4494_vm3 }
  0xb7   : > { %1893 = vrot.lane.b32.xlu1 %v4491_v62, %s3385_s13  ;;  %3306 = vmatprep.mubr.msk.bf16.mxu0 %vm5453_vm15, %v2401_v31  ;;  %v1548_v60 = vsel %vm4360_vm13, %v4393_v20, 0  ;;  %vm5454_vm4 = vcmask 1040384   ;;  %v4531_v38 = vpack.c.bf16 %v406_v6, %v405_v59  ;;  %v336_v55 = vmul.f32 %v4170_v22, %v3256_v42  ;;  %v2124_v25 = vpop.permute.xlu0 %2123 }
  0xb8   : > { %v4529_v24 = vsel %vm5454_vm4, %v1455_v53, %v4468_v48  ;;  %vm5455_vm8 = vcmask 228352   ;;  %v1666_v45 = vor.u32 %v1664_v54, %v1662_v7  ;;  %v337_v43 = vmul.f32 %v4170_v22, %v3257_v17 }
  0xb9   : > { %v2370_v18 = vsel %vm5455_vm8, %v2337_v35, %v2044_v46  ;;  %v1700_v56 = vshll.u32 %v4320_v15, 16  ;;  %v4540_v16 = vpop.permute.xlu1 %1708  ;;  %vm5456_vm15 = vcmask 261120   ;;  %v5457_v33 = vrot.slane %v4269_v36, 1 }
  0xba   : > { %v2403_v53 = vsel %vm5456_vm15, %v2370_v18, %v2124_v25  ;;  %vm5458_vm4 = vcmask 1046528   ;;  %v4551_v59 = vsel %vm1475_vm10, %v4393_v20, 0  ;;  %v3093_v7 = vcombine.low %v1173_v37, %v3473_v28 }
  0xbb   : > { %v2107_v9 = vsel %vm5458_vm4, %v5457_v33, %v2106_v57  ;;  %v5459_v22 = vsel %vm4335_vm2, %v4217_v12, 0  ;;  %vm5460_vm8 = vcmask 293888   ;;  %v4560_v4 = vrot.slane %v1668_v23, 1  ;;  %1975 = vrot.lane.b32.xlu1 %v1944_v58, %s3381_s30  ;;  %v4584_v17 = vpop.permute.xlu0 %1791 }
  0xbc   : > { %2021 = vrot.lane.b32.xlu0 %v5459_v22, %s3380_s29  ;;  %3307 = vmatmul.mubr.msk.bf16.vlgmr.msra.gmra.mrb[0].mxu0 %vm5460_vm8, %v2403_v53  ;;  %vm5326_vm15 = vcmp.ne.s16.totalorder %v4529_v24, 0  ;;  %v1381_v36 = vsel %vm1349_vm6, 65537, %v5425_v21  ;;  %v1383_v6 = vsel %vm1351_vm1, 65537, %v5425_v21  ;;  %vm5461_vm4 = vcmp.ne.s16.totalorder %v4249_v41, 0 }
  0xbd   : > { %v4579_v42 = vsel %vm5461_vm4, %v4477_v0, 0  ;;  %v526_v30 = vshrl.u32 %v4531_v38, 16  ;;  %v375_v47 = vadd.f32 %v4193_v51, %v336_v55  ;;  %v610_v54 = vadd.s32 248, %v3427_v1  ;;  %v4591_v34 = vpop.permute.xlu1 %1710 }
  0xbe   : > { %v376_v46 = vadd.f32 %v4193_v51, %v337_v43  ;;  %v4587_v5 = vrot.slane %v1700_v56, 1  ;;  %v1867_v35 = vshrl.u32 %v4320_v15, 16  ;;  %v1871_v44 = vshll.u32 %v3539_v14, 16 }
  0xbf   : > { %vm4593_vm5 = vcmp.ne.s16.totalorder %v3093_v7, 0  ;;  %v3111_v58 = vcombine.low %v3473_v28, %v1381_v36  ;;  %v3112_v31 = vcombine.low %v3473_v28, %v1383_v6  ;;  %v832_v23 = vand.u32 15, %v610_v54  ;;  %2023 = vrot.lane.b32.xlu1 %v1548_v60, %s3380_s29  ;;  %v4614_v53 = vpop.permute.xlu0 %1839 }
  0xc0   : > { %2057 = vrot.lane.b32.xlu0 %v4491_v62, %s3386_s14  ;;  %vm5464_vm3 = vsmask.f32 7424  ;;  %v5329_v37 = vrot.slane %v4579_v42, 1  ;;  %v1869_v55 = vor.u32 %v1867_v35, %v4587_v5  ;;  %v4607_v18 = vrot.slane %v1871_v44, 1 }
  0xc1   : > { %v4603_v51 = vsel %vm5464_vm3, %v1666_v45, %v4560_v4  ;;  %v4610_v25 = vrot.slane %v526_v30, 7  ;;  %v529_v43 = vshll.u32 %v4531_v38, 16  ;;  %v603_v56 = vadd.s32 192, %v3427_v1  ;;  %vm5465_vm8 = vmmov %vm5464_vm3  ;;  %v4623_v22 = vpop.permute.xlu1 %1793 }
  0xc2   : > { %vm1058_vm6 = vcmp.le.s32.totalorder %v832_v23, 14  ;;  %v407_v33 = vmax.f32 %v375_v47, 0.0  ;;  %v408_v45 = vmax.f32 %v376_v46, 0.0  ;;  %v4618_v7 = vsel %vm5465_vm8, %v1869_v55, %v4607_v18 }
  0xc3   : > { %vm1353_vm1 = vmpackc.low %vm1058_vm6, %vm1058_vm6  ;;  %v3092_v38 = vcombine.low %v4446_v11, %v3473_v28  ;;  %v4627_v36 = vrot.slane %v3111_v58, 7  ;;  %v1461_v6 = vrot.slane %v3112_v31, 7  ;;  %v1775_v47 = vrot.slane %v4551_v59, 1  ;;  %2059 = vrot.lane.b32.xlu1 %v4603_v51, %s3386_s14  ;;  %v1880_v59 = vpop.permute.xlu0 %1879 }
  0xc4   : > { %v1385_v30 = vsel %vm1353_vm1, 65537, %v5425_v21  ;;  %2137 = vrot.lane.b32.xlu0 %v2107_v9, %s3383_s9  ;;  %vm5466_vm4 = vcmask 1046528   ;;  %v4643_v46 = vsel %vm5326_vm15, %v4477_v0, 0  ;;  %v783_v35 = vand.u32 15, %v603_v56 }
  0xc5   : > { %v3113_v54 = vcombine.low %v3473_v28, %v1385_v30  ;;  %v2109_v11 = vsel %vm5466_vm4, %v2106_v57, %v5329_v37  ;;  %v605_v9 = vadd.s32 208, %v3427_v1  ;;  %v531_v44 = vor.u32 %v529_v43, %v4610_v25  ;;  %v4649_v23 = vpop.permute.xlu1 %1841  ;;  %vm5471_vm1 = vmmov %vm5466_vm4 }
  0xc6   : > { %v426_v58 = vpack.c.bf16 %v408_v45, %v407_v33  ;;  %vm4651_vm3 = vcmp.ne.s16.totalorder %v3092_v38, 0  ;;  %vm5469_vm6 = vcmask 1040384   ;;  %v5470_v55 = vrot.slane %v4301_v3, 1 }
  0xc7   : > { %v4647_v31 = vrot.slane %v3113_v54, 7  ;;  %v4657_v57 = vsel %vm5469_vm6, %v4627_v36, %v1461_v6  ;;  %v5328_v43 = vrot.slane %v4643_v46, 1  ;;  %vm5472_vm8 = vmmov %vm5469_vm6  ;;  %1724 = vrot.lane.b32.xlu1 %v4491_v62, %s3384_s12  ;;  %vm4671_vm15 = vcmp.ge.s32.totalorder %v783_v35, 1  ;;  %v1962_v30 = vpop.permute.xlu0 %1961 }
  0xc8   : > { %2139 = vrot.lane.b32.xlu0 %v2109_v11, %s3383_s9  ;;  %v1776_v56 = vsel %vm5471_vm1, %v5470_v55, %v1775_v47  ;;  %v797_v38 = vand.u32 15, %v605_v9  ;;  %vm5475_vm1 = vsmask.f32 256  ;;  %v534_v54 = vshrl.u32 %v426_v58, 16 }
  0xc9   : > { %v4666_v33 = vsel %vm5472_vm8, %v1461_v6, %v4647_v31  ;;  %vm5327_vm4 = vcmp.ne.s16.totalorder %v4647_v31, 0  ;;  %v4681_v6 = vsel %vm5475_vm1, %v4399_v40, %v531_v44  ;;  %vm5337_vm8 = vcmp.ne.s16.totalorder %v4657_v57, 0  ;;  %v1882_v35 = vpop.permute.xlu1 %1881 }
  0xca   : > { %vm5335_vm6 = vcmp.ne.s16.totalorder %v4666_v33, 0  ;;  %v1538_v3 = vsel %vm5327_vm4, %v3539_v14, 0  ;;  %v1244_v11 = vsel %vm3765_vm9, %v3522_v8, 0  ;;  %v4695_v9 = vsel %vm5337_vm8, %v4320_v15, 0  ;;  %vm1145_vm9 = vmpackc.low %vm4671_vm15, %vm4671_vm15 }
  0xcb   : > { %v4687_v62 = vsel %vm5335_vm6, %v4320_v15, 0  ;;  %v1955_v44 = vrot.slane %v1538_v3, 1  ;;  %vm5476_vm1 = vcmask 1046528   ;;  %v1515_v63 = vsel %vm4651_vm3, %v4393_v20, 0  ;;  %1726 = vrot.lane.b32.xlu1 %v4603_v51, %s3384_s12  ;;  %v2010_v37 = vpop.permute.xlu0 %2009 }
  0xcc   : > { %v1953_v40 = vrot.slane %v4687_v62, 1  ;;  %1807 = vrot.lane.b32.xlu0 %v1776_v56, %s3382_s8  ;;  %v1778_v55 = vsel %vm5476_vm1, %v1775_v47, %v5328_v43  ;;  %v1672_v8 = vshrl.u32 %v4477_v0, 16  ;;  %v4709_v60 = vsel %vm5335_vm6, %v3539_v14, 0 }
  0xcd   : > { %v1676_v56 = vshll.u32 %v4681_v6, 16  ;;  %v1533_v47 = vsel %vm1475_vm10, %v4477_v0, 0  ;;  %vm4720_vm1 = vcmp.ge.s32.totalorder %v797_v38, 1  ;;  %vm5479_vm4 = vcmask 1046528   ;;  %v1964_v45 = vpop.permute.xlu1 %1963 }
  0xce   : > { %v4727_v43 = vsel %vm5479_vm4, %v1953_v40, %v1955_v44  ;;  %v4729_v26 = vrot.slane %v534_v54, 7  ;;  %v537_v20 = vshll.u32 %v426_v58, 16  ;;  %v2116_v12 = vrot.slane %v4695_v9, 1  ;;  %vm1147_vm12 = vmpackc.low %vm4720_vm1, %vm4720_vm1 }
  0xcf   : > { %v5336_v39 = vrot.slane %v4709_v60, 1  ;;  %vm5480_vm15 = vcmask 31744   ;;  %v1175_v44 = vsel %vm1145_vm9, 65537, %v5425_v21  ;;  %vm5481_vm6 = vcmask 64512   ;;  %1809 = vrot.lane.b32.xlu1 %v1778_v55, %s3382_s8 }
  0xd0   : > { %v2161_v38 = vsel %vm5480_vm15, %v1244_v11, %v4540_v16  ;;  %1855 = vrot.lane.b32.xlu0 %v1515_v63, %s3379_s28  ;;  %v1516_v52 = vsel %vm4593_vm5, %v4477_v0, 0  ;;  %v1674_v27 = vor.u32 %v1672_v8, %v4560_v4  ;;  %v1945_v16 = vrot.slane %v1533_v47, 1  ;;  %v2046_v63 = vpop.permute.xlu0 %2045 }
  0xd1   : > { %v4745_v58 = vsel %vm5479_vm4, %v2116_v12, %v5336_v39  ;;  %v2207_v54 = vsel %vm5481_vm6, %v2161_v38, %v4584_v17  ;;  %vm5482_vm9 = vcmask 97280   ;;  %v1678_v39 = vrot.slane %v1676_v56, 1  ;;  %v2012_v4 = vpop.permute.xlu1 %2011 }
  0xd2   : > { %v2240_v11 = vsel %vm5482_vm9, %v2207_v54, %v4614_v53  ;;  %vm5483_vm6 = vcmp.ne.s16.totalorder %v4529_v24, 0  ;;  %v539_v55 = vor.u32 %v537_v20, %v4729_v26  ;;  %vm5484_vm15 = vcmask 130048  }
  0xd3   : > { %v4762_v17 = vsel %vm5483_vm6, %v4681_v6, 0  ;;  %v2273_v38 = vsel %vm5484_vm15, %v2240_v11, %v1880_v59  ;;  %v3094_v8 = vcombine.low %v1175_v44, %v3473_v28  ;;  %vm5485_vm4 = vcmask 31744   ;;  %1857 = vrot.lane.b32.xlu1 %v1516_v52, %s3379_s28 }
  0xd4   : > { %v2164_v47 = vsel %vm5485_vm4, %v1245_v2, %v4591_v34  ;;  %vm5486_vm1 = vcmask 162816   ;;  %1895 = vrot.lane.b32.xlu0 %v4603_v51, %s3385_s13  ;;  %v1177_v53 = vsel %vm1147_vm12, 65537, %v5425_v21  ;;  %vm5487_vm9 = vcmask 64512   ;;  %v2126_v54 = vpop.permute.xlu0 %2125 }
  0xd5   : > { %v2306_v3 = vsel %vm5486_vm1, %v2273_v38, %v1962_v30  ;;  %v2209_v56 = vsel %vm5487_vm9, %v2164_v47, %v4623_v22  ;;  %vm5488_vm6 = vcmask 195584   ;;  %v5489_v59 = vrot.slane %v4427_v61, 1  ;;  %v2048_v52 = vpop.permute.xlu1 %2047 }
  0xd6   : > { %v2339_v20 = vsel %vm5488_vm6, %v2306_v3, %v2010_v37  ;;  %vm5490_vm15 = vcmask 1046528   ;;  %v1947_v2 = vrot.slane %v4762_v17, 1  ;;  %vm5491_vm4 = vcmask 97280  }
  0xd7   : > { %v1946_v44 = vsel %vm5490_vm15, %v5489_v59, %v1945_v16  ;;  %v2242_v34 = vsel %vm5491_vm4, %v2209_v56, %v4649_v23  ;;  %vm5492_vm1 = vcmask 228352   ;;  %vm5493_vm8 = vsmask.f32 7424 }
  0xd8   : > { %v2372_v51 = vsel %vm5492_vm1, %v2339_v20, %v2046_v63  ;;  %v1679_v30 = vsel %vm5493_vm8, %v1674_v27, %v1678_v39  ;;  %vm5494_vm12 = vsmask.f32 256  ;;  %vm5495_vm9 = vcmask 130048   ;;  %1977 = vrot.lane.b32.xlu0 %v1946_v44, %s3381_s30 }
  0xd9   : > { %v4787_v22 = vsel %vm5494_vm12, %v4610_v25, %v539_v55  ;;  %v2275_v37 = vsel %vm5495_vm9, %v2242_v34, %v1882_v35  ;;  %vm5496_vm6 = vcmask 261120   ;;  %vm4791_vm15 = vcmp.ne.s16.totalorder %v3094_v8, 0  ;;  %1897 = vrot.lane.b32.xlu1 %v1679_v30, %s3385_s13  ;;  %v2128_v8 = vpop.permute.xlu0 %2127  ;;  %v1713_v3 = vpop.permute.xlu1 %1712 }
  0xda   : > { %v2405_v61 = vsel %vm5496_vm6, %v2372_v51, %v2126_v54  ;;  %v3095_v23 = vcombine.low %v1177_v53, %v3473_v28  ;;  %vm5499_vm4 = vcmask 162816   ;;  %vm5500_vm8 = vcmask 293888  }
  0xdb   : > { %v2308_v63 = vsel %vm5499_vm4, %v2275_v37, %v1964_v45  ;;  %3310 = vmatprep.mubr.msk.bf16.mxu0 %vm5500_vm8, %v2405_v61  ;;  %v1254_v25 = vsel %vm4791_vm15, %v4477_v0, 0  ;;  %vm5501_vm1 = vcmask 195584   ;;  %v1549_v27 = vsel %vm4651_vm3, %v4477_v0, 0 }
  0xdc   : > { %v2341_v35 = vsel %vm5501_vm1, %v2308_v63, %v2012_v4  ;;  %v1680_v55 = vshrl.u32 %v4681_v6, 16  ;;  %vm5502_vm12 = vcmask 228352   ;;  %vm5503_vm9 = vcmask 1046528   ;;  %2025 = vrot.lane.b32.xlu0 %v1549_v27, %s3380_s29 }
  0xdd   : > { %v2374_v45 = vsel %vm5502_vm12, %v2341_v35, %v2048_v52  ;;  %v1948_v38 = vsel %vm5503_vm9, %v1945_v16, %v1947_v2  ;;  %v1684_v47 = vshll.u32 %v4787_v22, 16  ;;  %v1566_v4 = vsel %vm1475_vm10, %v4681_v6, 0  ;;  %v1796_v44 = vpop.permute.xlu0 %1795 }
  0xde   : > { %v2407_v53 = vsel %vm5496_vm6, %v2374_v45, %v2128_v8  ;;  %vm4817_vm4 = vcmp.ne.s16.totalorder %v3095_v23, 0  ;;  %vm5506_vm1 = vcmask 1040384   ;;  %1979 = vrot.lane.b32.xlu1 %v1948_v38, %s3381_s30  ;;  %v2110_v20 = vrot.slane %v1566_v4, 1 }
  0xdf   : > { %3311 = vmatmul.mubr.msk.bf16.gmra.mrb[4].mxu0 %vm5500_vm8, %v2407_v53  ;;  %v4826_v16 = vsel %vm5506_vm1, %v4468_v48, %v4627_v36  ;;  %v1255_v50 = vsel %vm4817_vm4, %v4681_v6, 0  ;;  %v1550_v59 = vsel %vm4593_vm5, %v4681_v6, 0  ;;  %v1682_v34 = vor.u32 %v1680_v55, %v1678_v39  ;;  %v1715_v48 = vpop.permute.xlu1 %1714  ;;  %vm5510_vm8 = vmmov %vm5503_vm9 }
  0xe0   : > { %v1686_v51 = vrot.slane %v1684_v47, 1  ;;  %vm5507_vm10 = vcmp.ne.s16.totalorder %v4529_v24, 0  ;;  %vm5338_vm12 = vcmp.ne.s16.totalorder %v4826_v16, 0  ;;  %2061 = vrot.lane.b32.xlu0 %v1679_v30, %s3386_s14  ;;  %v5508_v36 = vrot.slane %v4579_v42, 1 }
  0xe1   : > { %v4838_v54 = vsel %vm5507_vm10, %v4787_v22, 0  ;;  %vm5509_vm6 = vsmask.f32 7424  ;;  %v1844_v61 = vpop.permute.xlu0 %1843  ;;  %v1493_v24 = vsel %vm5338_vm12, %v4681_v6, 0  ;;  %v545_v23 = vshll.u32 %v4199_v29, 16  ;;  %vm5513_vm10 = vmmov %vm5510_vm8 }
  0xe2   : > { %2027 = vrot.lane.b32.xlu1 %v1550_v59, %s3380_s29  ;;  %v2111_v37 = vsel %vm5503_vm9, %v5508_v36, %v2110_v20  ;;  %v2112_v52 = vrot.slane %v4838_v54, 1  ;;  %v1687_v39 = vsel %vm5509_vm6, %v1682_v34, %v1686_v51  ;;  %v1779_v35 = vrot.slane %v1493_v24, 1  ;;  %vm5515_vm6 = vmmov %vm5510_vm8 }
  0xe3   : > { %v1798_v63 = vpop.permute.xlu1 %1797  ;;  %v547_v55 = vor.u32 %v545_v23, %v4285_v32  ;;  %vm5511_vm1 = vcmp.ne.s16.totalorder %v4657_v57, 0  ;;  %v5512_v29 = vrot.slane %v4643_v46, 1  ;;  %vm5514_vm9 = vsmask.f32 256 }
  0xe4   : > { %2141 = vrot.lane.b32.xlu0 %v2111_v37, %s3383_s9  ;;  %v2113_v42 = vsel %vm5510_vm8, %v2110_v20, %v2112_v52  ;;  %v4861_v38 = vsel %vm5511_vm1, %v4787_v22, 0  ;;  %v1246_v20 = vsel %vm3938_vm11, %v3700_v19, 0  ;;  %v1517_v46 = vsel %vm4791_vm15, %v4681_v6, 0 }
  0xe5   : > { %v1884_v27 = vpop.permute.xlu0 %1883  ;;  %v1780_v8 = vsel %vm5513_vm10, %v5512_v29, %v1779_v35  ;;  %v1781_v4 = vrot.slane %v4861_v38, 1  ;;  %v4871_v32 = vsel %vm5514_vm9, %v4729_v26, %v547_v55  ;;  %v1688_v26 = vshrl.u32 %v4787_v22, 16 }
  0xe6   : > { %2063 = vrot.lane.b32.xlu1 %v1687_v39, %s3386_s14  ;;  %v1692_v34 = vshll.u32 %v4871_v32, 16  ;;  %v1535_v49 = vsel %vm5338_vm12, %v4787_v22, 0  ;;  %vm5516_vm11 = vcmask 31744   ;;  %v1247_v24 = vsel %vm3957_vm0, %v3773_v10, 0 }
  0xe7   : > { %v1846_v45 = vpop.permute.xlu1 %1845  ;;  %v2167_v36 = vsel %vm5516_vm11, %v1246_v20, %v1713_v3  ;;  %vm5518_vm8 = vcmask 64512   ;;  %vm5519_vm10 = vcmask 97280   ;;  %v1518_v3 = vsel %vm4817_vm4, %v4787_v22, 0  ;;  %vm5521_vm9 = vmmov %vm5516_vm11 }
  0xe8   : > { %2143 = vrot.lane.b32.xlu0 %v2113_v42, %s3383_s9  ;;  %v2211_v23 = vsel %vm5518_vm8, %v2167_v36, %v1796_v44  ;;  %v1949_v42 = vrot.slane %v1535_v49, 1  ;;  %v1694_v20 = vrot.slane %v1692_v34, 1  ;;  %vm5520_vm0 = vcmask 130048   ;;  %vm5523_vm11 = vmmov %vm5518_vm8 }
  0xe9   : > { %v1966_v47 = vpop.permute.xlu0 %1965  ;;  %v2244_v55 = vsel %vm5519_vm10, %v2211_v23, %v1844_v61  ;;  %vm5524_vm8 = vcmask 195584   ;;  %vm5531_vm12 = vcmask 293888  }
  0xea   : > { %1728 = vrot.lane.b32.xlu1 %v1679_v30, %s3384_s12  ;;  %v1782_v30 = vsel %vm5515_vm6, %v1779_v35, %v1781_v4  ;;  %v4899_v35 = vsel %vm5511_vm1, %v4871_v32, 0  ;;  %v2277_v10 = vsel %vm5520_vm0, %v2244_v55, %v1884_v27  ;;  %vm5522_vm6 = vcmask 162816  }
  0xeb   : > { %v1886_v53 = vpop.permute.xlu1 %1885  ;;  %v1951_v57 = vrot.slane %v4899_v35, 1  ;;  %vm5525_vm1 = vcmask 1046528   ;;  %v607_v27 = vadd.s32 224, %v3427_v1  ;;  %vm5526_vm0 = vcmask 228352  }
  0xec   : > { %1811 = vrot.lane.b32.xlu0 %v1780_v8, %s3382_s8  ;;  %v1690_v8 = vor.u32 %v1688_v26, %v1686_v51  ;;  %v1950_v51 = vsel %vm5525_vm1, %v1947_v2, %v1949_v42  ;;  %vm5532_vm1 = vcmask 195584   ;;  %v609_v55 = vadd.s32 240, %v3427_v1 }
  0xed   : > { %v2014_v59 = vpop.permute.xlu0 %2013 }
  0xee   : > { %1730 = vrot.lane.b32.xlu1 %v1687_v39, %s3384_s12 }
  0xef   : > { %v1968_v19 = vpop.permute.xlu1 %1967 }
  0xf0   : > { %1859 = vrot.lane.b32.xlu0 %v1517_v46, %s3379_s28  ;;  %v2170_v46 = vsel %vm5521_vm9, %v1247_v24, %v1715_v48  ;;  %vm5527_vm9 = vsmask.f32 7424  ;;  %v1696_v24 = vshrl.u32 %v4871_v32, 16 }
  0xf1   : > { %v2050_v29 = vpop.permute.xlu0 %2049  ;;  %v2213_v61 = vsel %vm5523_vm11, %v2170_v46, %v1798_v63  ;;  %vm5529_vm11 = vcmask 261120  }
  0xf2   : > { %1813 = vrot.lane.b32.xlu1 %v1782_v30, %s3382_s8  ;;  %v2310_v30 = vsel %vm5522_vm6, %v2277_v10, %v1966_v47  ;;  %v2246_v48 = vsel %vm5519_vm10, %v2213_v61, %v1846_v45  ;;  %vm5528_vm6 = vcmask 130048   ;;  %vm5533_vm10 = vcmask 1046528  }
  0xf3   : > { %v2016_v44 = vpop.permute.xlu1 %2015  ;;  %v2343_v49 = vsel %vm5524_vm8, %v2310_v30, %v2014_v59  ;;  %v2279_v34 = vsel %vm5528_vm6, %v2246_v48, %v1886_v53  ;;  %vm5530_vm8 = vcmask 162816   ;;  %v1952_v2 = vsel %vm5533_vm10, %v1949_v42, %v1951_v57 }
  0xf4   : > { %1899 = vrot.lane.b32.xlu0 %v1687_v39, %s3385_s13  ;;  %v2376_v47 = vsel %vm5526_vm0, %v2343_v49, %v2050_v29  ;;  %v1695_v39 = vsel %vm5527_vm9, %v1690_v8, %v1694_v20  ;;  %v2312_v36 = vsel %vm5530_vm8, %v2279_v34, %v1968_v19  ;;  %v1551_v45 = vsel %vm4791_vm15, %v4787_v22, 0  ;;  %vm5535_vm9 = vmmov %vm5529_vm11 }
  0xf5   : > { %v2130_v26 = vpop.permute.xlu0 %2129  ;;  %v2345_v17 = vsel %vm5532_vm1, %v2312_v36, %v2016_v44  ;;  %v811_v53 = vand.u32 15, %v607_v27  ;;  %vm5536_vm6 = vcmask 293888   ;;  %v1698_v1 = vor.u32 %v1696_v24, %v1694_v20  ;;  %vm5539_vm1 = vmmov %vm5533_vm10  ;;  %v5547_v36 = vld [vmem:[#allocation3_spill] sm:$0xff] }
  0xf6   : > { %1861 = vrot.lane.b32.xlu1 %v1518_v3, %s3379_s28  ;;  %v2409_v59 = vsel %vm5529_vm11, %v2376_v47, %v2130_v26  ;;  %v825_v44 = vand.u32 15, %v609_v55  ;;  %vm5540_vm10 = vsmask.f32 7424 }
  0xf7   : > { %v2052_v63 = vpop.permute.xlu1 %2051  ;;  %3314 = vmatprep.mubr.msk.bf16.mxu0 %vm5531_vm12, %v2409_v59  ;;  %vm5534_vm12 = vcmp.ne.s16.totalorder %v4826_v16, 0  ;;  %vm4943_vm11 = vcmp.ge.s32.totalorder %v811_v53, 1  ;;  %v1552_v16 = vsel %vm4817_vm4, %v4871_v32, 0  ;;  %v1703_v61 = vsel %vm5540_vm10, %v1698_v1, %v4587_v5  ;;  %v5553_v53 = vld [vmem:[#allocation4_spill] sm:$0xff] }
  0xf8   : > { %1981 = vrot.lane.b32.xlu0 %v1950_v51, %s3381_s30  ;;  %v2378_v37 = vsel %vm5526_vm0, %v2345_v17, %v2052_v63  ;;  %v1568_v23 = vsel %vm5534_vm12, %v4871_v32, 0  ;;  %vm1149_vm8 = vmpackc.low %vm4943_vm11, %vm4943_vm11  ;;  %vm5541_vm0 = vcmp.ne.s16.totalorder %v4666_v33, 0  ;;  %vm1025_vm12 = vcmp.ge.s32.totalorder %v825_v44, 1 }
  0xf9   : > { %v2132_v19 = vpop.permute.xlu0 %2131  ;;  %v2114_v42 = vrot.slane %v1568_v23, 1  ;;  %v1495_v20 = vsel %vm5541_vm0, %v4871_v32, 0  ;;  %v1179_v27 = vsel %vm1149_vm8, 65537, %v5425_v21  ;;  %vm5543_vm11 = vcmp.ne.s16.totalorder %v4647_v31, 0  ;;  %vm5544_vm8 = vmmov %vm5539_vm1 }
  0xfa   : > { %1901 = vrot.lane.b32.xlu1 %v1695_v39, %s3385_s13  ;;  %v2411_v29 = vsel %vm5535_vm9, %v2378_v37, %v2132_v19  ;;  %vm5542_vm9 = vmmov %vm5539_vm1  ;;  %v3096_v48 = vcombine.low %v1179_v27, %v3473_v28  ;;  %v1496_v33 = vsel %vm5543_vm11, %v4320_v15, 0  ;;  %v1249_v19 = vsel %vm4148_vm7, %v5553_v53, 0 }
  0xfb   : > { %v1717_v3 = vpop.permute.xlu1 %1716  ;;  %3315 = vmatmul.mubr.msk.bf16.gmra.mrb[8].mxu0 %vm5536_vm6, %v2411_v29  ;;  %v2115_v30 = vsel %vm5539_vm1, %v2112_v52, %v2114_v42  ;;  %v2117_v54 = vsel %vm5542_vm9, %v2114_v42, %v2116_v12  ;;  %v1783_v52 = vrot.slane %v1495_v20, 1  ;;  %vm1151_vm6 = vmpackc.low %vm1025_vm12, %vm1025_vm12  ;;  %v1785_v34 = vrot.slane %v1496_v33, 1 }
  0xfc   : > { %2029 = vrot.lane.b32.xlu0 %v1551_v45, %s3380_s29  ;;  %v1181_v26 = vsel %vm1151_vm6, 65537, %v5425_v21  ;;  %vm4979_vm1 = vcmp.ne.s16.totalorder %v3096_v48, 0  ;;  %v1248_v21 = vsel %vm4119_vm14, %v5547_v36, 0  ;;  %vm5549_vm10 = vmmov %vm5544_vm8  ;;  %vm5552_vm12 = vcmask 31744   ;;  %v5574_v36 = vld [vmem:[#allocation6_spill] sm:$0xff] }
  0xfd   : > { %v1800_v10 = vpop.permute.xlu0 %1799  ;;  %v1784_v12 = vsel %vm5544_vm8, %v1781_v4, %v1783_v52  ;;  %v3097_v31 = vcombine.low %v1181_v26, %v3473_v28  ;;  %v1519_v38 = vsel %vm4979_vm1, %v4871_v32, 0  ;;  %v1786_v4 = vsel %vm5549_vm10, %v1783_v52, %v1785_v34  ;;  %vm5558_vm11 = vmmov %vm5552_vm12  ;;  %v5570_v26 = vld [vmem:[#allocation2_spill] sm:$0xff] }
  0xfe   : > { %1983 = vrot.lane.b32.xlu1 %v1952_v2, %s3381_s30  ;;  %v2173_v28 = vsel %vm5552_vm12, %v1248_v21, %v1717_v3  ;;  %vm5555_vm14 = vcmask 64512   ;;  %vm5556_vm9 = vcmask 97280   ;;  %vm5557_vm6 = vcmask 130048  }
  0xff   : > { %v1719_v46 = vpop.permute.xlu1 %1718  ;;  %vm4993_vm0 = vcmp.ne.s16.totalorder %v3097_v31, 0  ;;  %v2215_v24 = vsel %vm5555_vm14, %v2173_v28, %v1800_v10  ;;  %vm5559_vm8 = vcmask 162816   ;;  %vm5560_vm7 = vmmov %vm5555_vm14  ;;  %vm5561_vm10 = vcmask 195584  }
 0x100   : > { %2065 = vrot.lane.b32.xlu0 %v1695_v39, %s3386_s14  ;;  %v1520_v55 = vsel %vm4993_vm0, %v4320_v15, 0  ;;  %v2176_v8 = vsel %vm5558_vm11, %v1249_v19, %v1719_v46  ;;  %vm5562_vm12 = vcmask 1046528   ;;  %vm5563_vm14 = vmmov %vm5556_vm9  ;;  %vm5565_vm11 = vcmask 261120  }
 0x101   : > { %v1848_v49 = vpop.permute.xlu0 %1847  ;;  %v1954_v44 = vsel %vm5562_vm12, %v1951_v57, %v1953_v40  ;;  %v1553_v40 = vsel %vm4979_vm1, %v4320_v15, 0  ;;  %v1554_v48 = vsel %vm4993_vm0, %v3539_v14, 0  ;;  %v1250_v21 = vsel %vm4335_vm2, %v5574_v36, 0 }
 0x102   : > { %2031 = vrot.lane.b32.xlu1 %v1552_v16, %s3380_s29  ;;  %v2248_v23 = vsel %vm5556_vm9, %v2215_v24, %v1848_v49  ;;  %vm5564_vm9 = vcmask 228352   ;;  %vm5627_vm4 = vcmask 293888  }
 0x103   : > { %v1802_v51 = vpop.permute.xlu1 %1801  ;;  %vm5567_vm12 = vmmov %vm5564_vm9 }
 0x104   : > { %2145 = vrot.lane.b32.xlu0 %v2115_v30, %s3383_s9  ;;  %v2217_v10 = vsel %vm5560_vm7, %v2176_v8, %v1802_v51  ;;  %vm5566_vm7 = vcmask 293888  }
 0x105   : > { %v1888_v5 = vpop.permute.xlu0 %1887 }
 0x106   : > { %2067 = vrot.lane.b32.xlu1 %v1703_v61, %s3386_s14  ;;  %v2281_v42 = vsel %vm5557_vm6, %v2248_v23, %v1888_v5 }
 0x107   : > { %v1850_v47 = vpop.permute.xlu1 %1849 }
 0x108   : > { %2147 = vrot.lane.b32.xlu0 %v2117_v54, %s3383_s9  ;;  %v2250_v30 = vsel %vm5563_vm14, %v2217_v10, %v1850_v47  ;;  %v2037_v54 = vshrl.u32 %v3539_v14, 16  ;;  %vm5568_vm14 = vmmov %vm5565_vm11  ;;  %v5572_v14 = vrot.slane %v4709_v60, 1 }
 0x109   : > { %v1970_v9 = vpop.permute.xlu0 %1969 }
 0x10a   : > { %1732 = vrot.lane.b32.xlu1 %v1695_v39, %s3384_s12  ;;  %v2314_v16 = vsel %vm5559_vm8, %v2281_v42, %v1970_v9  ;;  %v2039_v47 = vor.u32 %v2037_v54, %v4607_v18 }
 0x10b   : > { %v1890_v59 = vpop.permute.xlu1 %1889 }
 0x10c   : > { %1815 = vrot.lane.b32.xlu0 %v1784_v12, %s3382_s8  ;;  %v2283_v20 = vsel %vm5557_vm6, %v2250_v30, %v1890_v59  ;;  %vm5571_vm6 = vsmask.f32 7424 }
 0x10d   : > { %v2018_v39 = vpop.permute.xlu0 %2017  ;;  %v2040_v12 = vsel %vm5571_vm6, %v2039_v47, %v5570_v26  ;;  %vm5585_vm6 = vcmask 195584  }
 0x10e   : > { %1734 = vrot.lane.b32.xlu1 %v1703_v61, %s3384_s12  ;;  %v2347_v1 = vsel %vm5561_vm10, %v2314_v16, %v2018_v39  ;;  %v5577_v39 = vld [vmem:[#allocation8_spill] sm:$0xff] }
 0x10f   : > { %v1972_v2 = vpop.permute.xlu1 %1971  ;;  %v1251_v60 = vsel %vm4360_vm13, %v5577_v39, 0 }
 0x110   : > { %1863 = vrot.lane.b32.xlu0 %v1519_v38, %s3379_s28  ;;  %v2316_v27 = vsel %vm5559_vm8, %v2283_v20, %v1972_v2  ;;  %vm5576_vm8 = vcmask 31744  }
 0x111   : > { %v2054_v29 = vpop.permute.xlu0 %2053 }
 0x112   : > { %1817 = vrot.lane.b32.xlu1 %v1786_v4, %s3382_s8  ;;  %v2380_v46 = vsel %vm5564_vm9, %v2347_v1, %v2054_v29  ;;  %vm5569_vm9 = vmmov %vm5566_vm7 }
 0x113   : > { %v2020_v3 = vpop.permute.xlu1 %2019 }
 0x114   : > { %1903 = vrot.lane.b32.xlu0 %v1703_v61, %s3385_s13  ;;  %v2349_v62 = vsel %vm5561_vm10, %v2316_v27, %v2020_v3  ;;  %vm5580_vm10 = vcmask 97280  }
 0x115   : > { %v2134_v49 = vpop.permute.xlu0 %2133 }
 0x116   : > { %1865 = vrot.lane.b32.xlu1 %v1520_v55, %s3379_s28  ;;  %v2413_v51 = vsel %vm5565_vm11, %v2380_v46, %v2134_v49  ;;  %vm5573_vm11 = vcmask 1046528  }
 0x117   : > { %v2056_v61 = vpop.permute.xlu1 %2055  ;;  %3318 = vmatprep.mubr.msk.bf16.mxu0 %vm5566_vm7, %v2413_v51  ;;  %v2120_v18 = vsel %vm5573_vm11, %v5572_v14, %v5570_v26  ;;  %vm5579_vm7 = vcmask 64512   ;;  %vm5586_vm11 = vmmov %vm5580_vm10 }
 0x118   : > { %1985 = vrot.lane.b32.xlu0 %v1954_v44, %s3381_s30  ;;  %v2382_v35 = vsel %vm5567_vm12, %v2349_v62, %v2056_v61  ;;  %vm5581_vm12 = vcmask 130048   ;;  %vm5584_vm2 = vmmov %vm5579_vm7 }
 0x119   : > { %v2136_v57 = vpop.permute.xlu0 %2135  ;;  %vm5588_vm13 = vmmov %vm5581_vm12 }
 0x11a   : > { %1905 = vrot.lane.b32.xlu1 %v4618_v7, %s3385_s13  ;;  %v2415_v5 = vsel %vm5568_vm14, %v2382_v35, %v2136_v57  ;;  %vm5582_vm14 = vmmov %vm5576_vm8 }
 0x11b   : > { %v1721_v52 = vpop.permute.xlu1 %1720  ;;  %3319 = vmatmul.mubr.msk.bf16.gmra.mrb[12].mxu0 %vm5569_vm9, %v2415_v5  ;;  %vm5583_vm9 = vcmask 162816  }
 0x11c   : > { %2033 = vrot.lane.b32.xlu0 %v1553_v40, %s3380_s29 }
 0x11d   : > { %v1804_v15 = vpop.permute.xlu0 %1803 }
 0x11e   : > { %1987 = vrot.lane.b32.xlu1 %v4727_v43, %s3381_s30 }
 0x11f   : > { %v1723_v33 = vpop.permute.xlu1 %1722 }
 0x120   : > { %2069 = vrot.lane.b32.xlu0 %v4618_v7, %s3386_s14  ;;  %v2182_v23 = vsel %vm5582_vm14, %v1251_v60, %v1723_v33  ;;  %vm5592_vm14 = vmmov %vm5585_vm6 }
 0x121   : > { %v1852_v9 = vpop.permute.xlu0 %1851 }
 0x122   : > { %2035 = vrot.lane.b32.xlu1 %v1554_v48, %s3380_s29  ;;  %v5596_v48 = vld [vmem:[#allocation10_spill] sm:$0xff]  ;;  %s235_s29 = scalar_lea.vmem %s5304_s5, %s3080_s20 }
 0x123   : > { %v1806_v34 = vpop.permute.xlu1 %1805 }
 0x124   : > { %2149 = vrot.lane.b32.xlu0 %v4745_v58, %s3383_s9  ;;  %v2179_v58 = vsel %vm5576_vm8, %v1250_v21, %v1721_v52  ;;  %v2221_v29 = vsel %vm5584_vm2, %v2182_v23, %v1806_v34  ;;  %vm5587_vm8 = vcmask 228352  }
 0x125   : > { %v1892_v43 = vpop.permute.xlu0 %1891  ;;  %v2219_v28 = vsel %vm5579_vm7, %v2179_v58, %v1804_v15  ;;  %vm5589_vm7 = vcmask 261120   ;;  %v1252_v15 = vsel %vm4651_vm3, %v5596_v48, 0 }
 0x126   : > { %2071 = vrot.lane.b32.xlu1 %v2040_v12, %s3386_s14  ;;  %v2252_v53 = vsel %vm5580_vm10, %v2219_v28, %v1852_v9  ;;  %vm5590_vm10 = vmmov %vm5583_vm9 }
 0x127   : > { %v1854_v59 = vpop.permute.xlu1 %1853  ;;  %v2285_v19 = vsel %vm5581_vm12, %v2252_v53, %v1892_v43  ;;  %vm5591_vm12 = vcmask 293888   ;;  %vm5594_vm2 = vmmov %vm5589_vm7  ;;  %v5601_v43 = vld [vmem:[#allocation13_spill] sm:$0xff] }
 0x128   : > { %v2254_v3 = vsel %vm5586_vm11, %v2221_v29, %v1854_v59  ;;  %vm5597_vm11 = vcmask 31744   ;;  %v5602_v59 = vsel %vm4593_vm5, %v5601_v43, 0  ;;  %vm5611_vm5 = vcmask 293888  }
 0x129   : > { %v1974_v7 = vpop.permute.xlu0 %1973 }
 0x12a   : > { %2151 = vrot.lane.b32.xlu1 %v2120_v18, %s3383_s9  ;;  %v2318_v55 = vsel %vm5583_vm9, %v2285_v19, %v1974_v7  ;;  %vm5593_vm9 = vmmov %vm5587_vm8 }
 0x12b   : > { %v1894_v31 = vpop.permute.xlu1 %1893 }
 0x12c   : > { %v2287_v10 = vsel %vm5588_vm13, %v2254_v3, %v1894_v31  ;;  %vm5599_vm13 = vcmask 97280  }
 0x12e   : > { %v2022_v38 = vpop.permute.xlu0 %2021 }
 0x12f   : > { %v1976_v4 = vpop.permute.xlu1 %1975  ;;  %v2351_v42 = vsel %vm5585_vm6, %v2318_v55, %v2022_v38  ;;  %vm5595_vm6 = vmmov %vm5591_vm12 }
 0x130   : > { %v2320_v30 = vsel %vm5590_vm10, %v2287_v10, %v1976_v4  ;;  %vm5603_vm10 = vmmov %vm5597_vm11 }
 0x132   : > { %v2058_v37 = vpop.permute.xlu0 %2057 }
 0x133   : > { %v2024_v24 = vpop.permute.xlu1 %2023  ;;  %v2384_v8 = vsel %vm5587_vm8, %v2351_v42, %v2058_v37  ;;  %vm5598_vm8 = vcmask 64512  }
 0x134   : > { %v2353_v46 = vsel %vm5592_vm14, %v2320_v30, %v2024_v24  ;;  %vm5605_vm3 = vmmov %vm5598_vm8 }
 0x136   : > { %v2138_v16 = vpop.permute.xlu0 %2137 }
 0x137   : > { %v2060_v1 = vpop.permute.xlu1 %2059  ;;  %v2417_v44 = vsel %vm5589_vm7, %v2384_v8, %v2138_v16  ;;  %vm5600_vm7 = vcmask 130048  }
 0x138   : > { %3322 = vmatprep.mubr.msk.bf16.mxu1 %vm5591_vm12, %v2417_v44  ;;  %v2386_v49 = vsel %vm5593_vm9, %v2353_v46, %v2060_v1  ;;  %vm5604_vm12 = vcmask 162816   ;;  %vm5606_vm9 = vmmov %vm5599_vm13 }
 0x13a   : > { %v2140_v20 = vpop.permute.xlu0 %2139 }
 0x13b   : > { %v1725_v61 = vpop.permute.xlu1 %1724  ;;  %v2419_v51 = vsel %vm5594_vm2, %v2386_v49, %v2140_v20  ;;  %vm5607_vm2 = vcmask 228352  }
 0x13c   : > { %3323 = vmatmul.mubr.msk.bf16.vlgmr.msra.gmra.mrb[0].mxu1 %vm5595_vm6, %v2419_v51  ;;  %v2185_v26 = vsel %vm5597_vm11, %v1252_v15, %v1725_v61  ;;  %vm5608_vm6 = vmmov %vm5600_vm7  ;;  %vm5609_vm11 = vcmask 261120  }
 0x13e   : > { %v1808_v27 = vpop.permute.xlu0 %1807 }
 0x13f   : > { %v1727_v62 = vpop.permute.xlu1 %1726  ;;  %v2223_v12 = vsel %vm5598_vm8, %v2185_v26, %v1808_v27  ;;  %vm5610_vm8 = vmmov %vm5604_vm12 }
 0x140   : > { %v2188_v7 = vsel %vm5603_vm10, %v5602_v59, %v1727_v62  ;;  %vm5614_vm10 = vmmov %vm5609_vm11 }
 0x142   : > { %v1856_v40 = vpop.permute.xlu0 %1855 }
 0x143   : > { %v1810_v35 = vpop.permute.xlu1 %1809  ;;  %v2256_v9 = vsel %vm5599_vm13, %v2223_v12, %v1856_v40  ;;  %vm5612_vm13 = vmmov %vm5592_vm14 }
 0x144   : > { %v2225_v31 = vsel %vm5605_vm3, %v2188_v7, %v1810_v35  ;;  %vm5616_vm3 = vcmask 31744   ;;  %vm5622_vm15 = vmmov %vm5612_vm13 }
 0x146   : > { %v1896_v57 = vpop.permute.xlu0 %1895 }
 0x147   : > { %v1858_v54 = vpop.permute.xlu1 %1857  ;;  %v2289_v14 = vsel %vm5600_vm7, %v2256_v9, %v1896_v57  ;;  %vm5613_vm7 = vmmov %vm5607_vm2 }
 0x148   : > { %v2258_v17 = vsel %vm5606_vm9, %v2225_v31, %v1858_v54 }
 0x14a   : > { %v1978_v52 = vpop.permute.xlu0 %1977 }
 0x14b   : > { %v1898_v5 = vpop.permute.xlu1 %1897  ;;  %v2322_v13 = vsel %vm5604_vm12, %v2289_v14, %v1978_v52  ;;  %vm5615_vm12 = vmmov %vm5611_vm5 }
 0x14c   : > { %v2291_v4 = vsel %vm5608_vm6, %v2258_v17, %v1898_v5 }
 0x14e   : > { %v2026_v47 = vpop.permute.xlu0 %2025 }
 0x14f   : > { %v2355_v36 = vsel %vm5592_vm14, %v2322_v13, %v2026_v47  ;;  %vm5617_vm14 = vcmask 64512  }
 0x150   : > { %v1980_v33 = vpop.permute.xlu1 %1979 }
 0x151   : > { %v2324_v39 = vsel %vm5610_vm8, %v2291_v4, %v1980_v33 }
 0x152   : > { %v2062_v34 = vpop.permute.xlu0 %2061 }
 0x153   : > { %v2388_v21 = vsel %vm5607_vm2, %v2355_v36, %v2062_v34  ;;  %vm5618_vm2 = vmmov %vm5608_vm6  ;;  %v1256_v34 = vsel %vm4979_vm1, %v4787_v22, 0  ;;  %v1257_v36 = vsel %vm4993_vm0, %v4871_v32, 0 }
 0x154   : > { %v2028_v18 = vpop.permute.xlu1 %2027  ;;  %vm5619_vm6 = vmmov %vm5616_vm3 }
 0x155   : > { %v2357_v2 = vsel %vm5612_vm13, %v2324_v39, %v2028_v18  ;;  %vm5624_vm13 = vmmov %vm5613_vm7 }
 0x156   : > { %v2142_v38 = vpop.permute.xlu0 %2141  ;;  %vm5637_vm0 = vmmov %vm5619_vm6 }
 0x157   : > { %v2421_v41 = vsel %vm5609_vm11, %v2388_v21, %v2142_v38  ;;  %vm5620_vm11 = vmmov %vm5610_vm8 }
 0x158   : > { %v2064_v58 = vpop.permute.xlu1 %2063  ;;  %3326 = vmatprep.mubr.msk.bf16.mxu1 %vm5611_vm5, %v2421_v41  ;;  %vm5621_vm8 = vmmov %vm5617_vm14 }
 0x159   : > { %v2390_v60 = vsel %vm5613_vm7, %v2357_v2, %v2064_v58  ;;  %vm5623_vm5 = vmmov %vm5606_vm9 }
 0x15a   : > { %v2144_v28 = vpop.permute.xlu0 %2143  ;;  %vm5625_vm7 = vmmov %vm5618_vm2 }
 0x15b   : > { %v2423_v37 = vsel %vm5614_vm10, %v2390_v60, %v2144_v28  ;;  %vm5634_vm1 = vmmov %vm5625_vm7 }
 0x15c   : > { %v1729_v53 = vpop.permute.xlu1 %1728  ;;  %3327 = vmatmul.mubr.msk.bf16.gmra.mrb[4].mxu1 %vm5615_vm12, %v2423_v37  ;;  %vm5626_vm12 = vmmov %vm5620_vm11 }
 0x15d   : > { %v2191_v1 = vsel %vm5616_vm3, %v1254_v25, %v1729_v53  ;;  %vm5628_vm3 = vmmov %vm5622_vm15 }
 0x15e   : > { %v1812_v19 = vpop.permute.xlu0 %1811 }
 0x15f   : > { %v2227_v44 = vsel %vm5617_vm14, %v2191_v1, %v1812_v19  ;;  %vm5629_vm14 = vmmov %vm5624_vm13 }
 0x160   : > { %v1731_v24 = vpop.permute.xlu1 %1730 }
 0x161   : > { %v2194_v61 = vsel %vm5619_vm6, %v1255_v50, %v1731_v24 }
 0x162   : > { %v1860_v23 = vpop.permute.xlu0 %1859 }
 0x163   : > { %v2260_v30 = vsel %vm5606_vm9, %v2227_v44, %v1860_v23  ;;  %vm5630_vm9 = vmmov %vm5614_vm10 }
 0x164   : > { %v1814_v55 = vpop.permute.xlu1 %1813 }
 0x165   : > { %v2229_v0 = vsel %vm5621_vm8, %v2194_v61, %v1814_v55 }
 0x166   : > { %v1900_v29 = vpop.permute.xlu0 %1899 }
 0x167   : > { %v2293_v49 = vsel %vm5618_vm2, %v2260_v30, %v1900_v29  ;;  %vm5631_vm2 = vmmov %vm5627_vm4 }
 0x168   : > { %v1862_v42 = vpop.permute.xlu1 %1861 }
 0x169   : > { %v2262_v51 = vsel %vm5623_vm5, %v2229_v0, %v1862_v42 }
 0x16a   : > { %v1982_v3 = vpop.permute.xlu0 %1981 }
 0x16b   : > { %v2326_v11 = vsel %vm5620_vm11, %v2293_v49, %v1982_v3  ;;  %vm5632_vm11 = vmmov %vm5621_vm8  ;;  %vm2952_vm8 = vcmask 27648  }
 0x16c   : > { %v1902_v8 = vpop.permute.xlu1 %1901 }
 0x16d   : > { %v2295_v40 = vsel %vm5625_vm7, %v2262_v51, %v1902_v8  ;;  %vm5638_vm7 = vmmov %vm5637_vm0 }
 0x16e   : > { %v2030_v16 = vpop.permute.xlu0 %2029 }
 0x16f   : > { %v2359_v25 = vsel %vm5622_vm15, %v2326_v11, %v2030_v16  ;;  %vm5633_vm15 = vmmov %vm5623_vm5 }
 0x170   : > { %v1984_v10 = vpop.permute.xlu1 %1983  ;;  %vm5635_vm5 = vmmov %vm5626_vm12 }
 0x171   : > { %v2328_v6 = vsel %vm5626_vm12, %v2295_v40, %v1984_v10  ;;  %vm5640_vm12 = vmmov %vm5637_vm0 }
 0x172   : > { %v2066_v46 = vpop.permute.xlu0 %2065 }
 0x173   : > { %v2392_v27 = vsel %vm5624_vm13, %v2359_v25, %v2066_v46  ;;  %vm5636_vm13 = vmmov %vm5619_vm6 }
 0x174   : > { %v2032_v20 = vpop.permute.xlu1 %2031 }
 0x175   : > { %v2361_v50 = vsel %vm5628_vm3, %v2328_v6, %v2032_v20 }
 0x176   : > { %v2146_v62 = vpop.permute.xlu0 %2145 }
 0x177   : > { %v2425_v56 = vsel %vm5614_vm10, %v2392_v27, %v2146_v62  ;;  %vm5639_vm10 = vmmov %vm5628_vm3 }
 0x178   : > { %v2068_v35 = vpop.permute.xlu1 %2067  ;;  %3330 = vmatprep.mubr.msk.bf16.mxu1 %vm5627_vm4, %v2425_v56  ;;  %vm5641_vm4 = vmmov %vm5637_vm0 }
 0x179   : > { %v2394_v57 = vsel %vm5629_vm14, %v2361_v50, %v2068_v35  ;;  %vm5642_vm3 = vmmov %vm5637_vm0 }
 0x17a   : > { %v2148_v54 = vpop.permute.xlu0 %2147  ;;  %vm5643_vm14 = vmmov %vm5632_vm11 }
 0x17b   : > { %v2427_v5 = vsel %vm5630_vm9, %v2394_v57, %v2148_v54  ;;  %vm5644_vm9 = vcmask 228352  }
 0x17c   : > { %v1733_v52 = vpop.permute.xlu1 %1732  ;;  %3331 = vmatmul.mubr.msk.bf16.gmra.mrb[8].mxu1 %vm5631_vm2, %v2427_v5  ;;  %vm5645_vm2 = vmmov %vm5633_vm15 }
 0x17d   : > { %v2197_v18 = vsel %vm5619_vm6, %v1256_v34, %v1733_v52  ;;  %vm5646_vm6 = vmmov %vm5637_vm0 }
 0x17e   : > { %v1816_v48 = vpop.permute.xlu0 %1815 }
 0x17f   : > { %v2231_v59 = vsel %vm5632_vm11, %v2197_v18, %v1816_v48  ;;  %vm5647_vm11 = vmmov %vm5637_vm0 }
 0x180   : > { %v1735_v15 = vpop.permute.xlu1 %1734 }
 0x181   : > { %v2200_v37 = vsel %vm5638_vm7, %v1257_v36, %v1735_v15  ;;  %vm5651_vm7 = vmmov %vm5639_vm10 }
 0x182   : > { %v1864_v47 = vpop.permute.xlu0 %1863 }
 0x183   : > { %v2264_v31 = vsel %vm5633_vm15, %v2231_v59, %v1864_v47  ;;  %vm5648_vm15 = vcmask 261120  }
 0x184   : > { %v1818_v33 = vpop.permute.xlu1 %1817 }
 0x185   : > { %v2233_v8 = vsel %vm5643_vm14, %v2200_v37, %v1818_v33  ;;  %vm5656_vm14 = vmmov %vm5637_vm0 }
 0x186   : > { %v1904_v26 = vpop.permute.xlu0 %1903 }
 0x187   : > { %v2297_v17 = vsel %vm5634_vm1, %v2264_v31, %v1904_v26 }
 0x188   : > { %v1866_v12 = vpop.permute.xlu1 %1865 }
 0x189   : > { %v2266_v30 = vsel %vm5645_vm2, %v2233_v8, %v1866_v12  ;;  %vm5658_vm2 = vmmov %vm5637_vm0 }
 0x18a   : > { %v1986_v9 = vpop.permute.xlu0 %1985 }
 0x18b   : > { %v2330_v58 = vsel %vm5635_vm5, %v2297_v17, %v1986_v9  ;;  %vm5649_vm5 = vcmask 293888  }
 0x18c   : > { %v1906_v14 = vpop.permute.xlu1 %1905 }
 0x18d   : > { %v2299_v11 = vsel %vm5634_vm1, %v2266_v30, %v1906_v14  ;;  %vm5662_vm1 = vmmov %vm5637_vm0 }
 0x18e   : > { %v2034_v43 = vpop.permute.xlu0 %2033 }
 0x18f   : > { %v3308_v13 = vpop.f32.mrb[0].mxu0  ;;  %v2363_v19 = vsel %vm5639_vm10, %v2330_v58, %v2034_v43  ;;  %vm5652_vm10 = vmmov %vm5644_vm9 }
 0x190   : > { %v1988_v7 = vpop.permute.xlu1 %1987  ;;  %v3172_v22 = vpack.c.bf16 %v3308_v13, %v3308_v13  ;;  %v2523_v63 = vpop.f32.mrb[1].mxu0  ;;  %v2721_v28 = vmul.f32 %v3308_v13, %v3308_v13  ;;  %v2653_v55 = vsel %vm5640_vm12, %v3308_v13, 0.0  ;;  %vm5653_vm12 = vmmov %vm5648_vm15 }
 0x191   : > { %v2719_v21 = vmul.f32 %v2523_v63, %v2523_v63  ;;  %v3170_v38 = vpack.c.bf16 %v2523_v63, %v2523_v63  ;;  %v3309_v4 = vpop.f32.mrb[2].mxu0  ;;  %v2650_v53 = vsel %vm5636_vm13, %v2523_v63, 0.0  ;;  %vm5650_vm13 = vcmask 162816  }
 0x192   : > { %2955 = vst.msk [vmem:[%s5141_s26 + $0x8] sm:$0xf] %vm2952_vm8, %v3172_v22  ;;  %v3173_v41 = vpack.c.bf16 %v3309_v4, %v3309_v4  ;;  %v2070_v39 = vpop.permute.xlu0 %2069  ;;  %v2526_v2 = vpop.f32.mrb[3].mxu0  ;;  %v2722_v42 = vmul.f32 %v3309_v4, %v3309_v4  ;;  %v2754_v46 = vsel %vm5646_vm6, %v2721_v28, 0.0  ;;  %v2655_v49 = vsel %vm5647_vm11, %v3309_v4, 0.0  ;;  %vm5659_vm6 = vmmov %vm5637_vm0 }
 0x193   : > { %2953 = vst.msk [vmem:[%s5141_s26] sm:$0xf] %vm2952_vm8, %v3170_v38  ;;  %v2651_v32 = vsel %vm5637_vm0, %v2526_v2, 0.0  ;;  %v2720_v45 = vmul.f32 %v2526_v2, %v2526_v2  ;;  %v3171_v23 = vpack.c.bf16 %v2526_v2, %v2526_v2  ;;  %v2751_v29 = vsel %vm5641_vm4, %v2719_v21, 0.0  ;;  %vm5654_vm4 = vmmov %vm5649_vm5 }
 0x194   : > { %v2036_v60 = vpop.permute.xlu1 %2035  ;;  %2956 = vst.msk [vmem:[%s5141_s26 + $0xc] sm:$0xf] %vm2952_vm8, %v3173_v41  ;;  %v2652_v24 = vadd.f32 %v2651_v32, %v2650_v53  ;;  %v2396_v16 = vsel %vm5644_vm9, %v2363_v19, %v2070_v39  ;;  %v2332_v51 = vsel %vm5650_vm13, %v2299_v11, %v1988_v7  ;;  %v2756_v27 = vsel %vm5637_vm0, %v2722_v42, 0.0  ;;  %vm5657_vm9 = vmmov %vm5637_vm0 }
 0x195   : > { %v2752_v3 = vsel %vm5642_vm3, %v2720_v45, 0.0  ;;  %2954 = vst.msk [vmem:[%s5141_s26 + $0x4] sm:$0xf] %vm2952_vm8, %v3171_v23  ;;  %v2365_v62 = vsel %vm5651_vm7, %v2332_v51, %v2036_v60  ;;  %vm5655_vm3 = vmmov %vm5637_vm0 }
 0x196   : > { %v2654_v10 = vadd.f32 %v2653_v55, %v2652_v24  ;;  %v2753_v1 = vadd.f32 %v2752_v3, %v2751_v29  ;;  %v2150_v44 = vpop.permute.xlu0 %2149  ;;  %vm5660_vm11 = vmmov %vm5637_vm0 }
 0x197   : > { %v2429_v61 = vsel %vm5648_vm15, %v2396_v16, %v2150_v44  ;;  %vm5661_vm15 = vmmov %vm5637_vm0 }
 0x198   : > { %v2072_v20 = vpop.permute.xlu1 %2071  ;;  %v2755_v0 = vadd.f32 %v2754_v46, %v2753_v1  ;;  %3334 = vmatprep.mubr.msk.bf16.mxu1 %vm5649_vm5, %v2429_v61  ;;  %v2656_v25 = vadd.f32 %v2655_v49, %v2654_v10  ;;  %vm5663_vm5 = vmmov %vm5637_vm0 }
 0x199   : > { %v2398_v35 = vsel %vm5652_vm10, %v2365_v62, %v2072_v20  ;;  %vm5664_vm13 = vmmov %vm5637_vm0 }
 0x19a   : > { %v2757_v40 = vadd.f32 %v2756_v27, %v2755_v0  ;;  %vm5665_vm7 = vmmov %vm5637_vm0 }
 0x19b   : > { %vm5666_vm10 = vmmov %vm5637_vm0 }
 0x19c   : > { %v2152_v56 = vpop.permute.xlu1 %2151 }
 0x19d   : > { %v2431_v6 = vsel %vm5653_vm12, %v2398_v35, %v2152_v56  ;;  %vm5667_vm12 = vmmov %vm5637_vm0 }
 0x19e   : > { %3335 = vmatmul.mubr.msk.bf16.gmra.mrb[12].mxu1 %vm5654_vm4, %v2431_v6  ;;  %vm5668_vm4 = vmmov %vm5637_vm0 }
 0x1b2   : > { %v3312_v50 = vpop.f32.mrb[4].mxu0 }
 0x1b3   : > { %v3176_v57 = vpack.c.bf16 %v3312_v50, %v3312_v50  ;;  %v2539_v54 = vpop.f32.mrb[5].mxu0  ;;  %v2725_v47 = vmul.f32 %v3312_v50, %v3312_v50  ;;  %v2661_v7 = vsel %vm5658_vm2, %v3312_v50, 0.0  ;;  %vm5672_vm2 = vmmov %vm5637_vm0 }
 0x1b4   : > { %v2657_v52 = vsel %vm5655_vm3, %v2539_v54, 0.0  ;;  %v2723_v5 = vmul.f32 %v2539_v54, %v2539_v54  ;;  %v3174_v48 = vpack.c.bf16 %v2539_v54, %v2539_v54  ;;  %v3313_v15 = vpop.f32.mrb[6].mxu0  ;;  %vm5669_vm3 = vmmov %vm5637_vm0 }
 0x1b5   : > { %2959 = vst.msk [vmem:[%s5141_s26 + $0x18] sm:$0xf] %vm2952_vm8, %v3176_v57  ;;  %v2658_v33 = vadd.f32 %v2657_v52, %v2656_v25  ;;  %v2542_v26 = vpop.f32.mrb[7].mxu0  ;;  %v3177_v9 = vpack.c.bf16 %v3313_v15, %v3313_v15  ;;  %v2726_v13 = vmul.f32 %v3313_v15, %v3313_v15  ;;  %v2762_v36 = vsel %vm5660_vm11, %v2725_v47, 0.0  ;;  %vm5674_vm11 = vmmov %vm5637_vm0 }
 0x1b6   : > { %v2758_v12 = vsel %vm5656_vm14, %v2723_v5, 0.0  ;;  %2957 = vst.msk [vmem:[%s5141_s26 + $0x10] sm:$0xf] %vm2952_vm8, %v3174_v48  ;;  %v2659_v34 = vsel %vm5657_vm9, %v2542_v26, 0.0  ;;  %v2724_v14 = vmul.f32 %v2542_v26, %v2542_v26  ;;  %v3175_v59 = vpack.c.bf16 %v2542_v26, %v2542_v26  ;;  %vm5670_vm14 = vmmov %vm5637_vm0 }
 0x1b7   : > { %v2759_v18 = vadd.f32 %v2758_v12, %v2757_v40  ;;  %v2660_v43 = vadd.f32 %v2659_v34, %v2658_v33  ;;  %2960 = vst.msk [vmem:[%s5141_s26 + $0x1c] sm:$0xf] %vm2952_vm8, %v3177_v9  ;;  %v2663_v17 = vsel %vm5661_vm15, %v3313_v15, 0.0  ;;  %v2764_v4 = vsel %vm5662_vm1, %v2726_v13, 0.0  ;;  %vm5671_vm9 = vmmov %vm5637_vm0 }
 0x1b8   : > { %v2760_v31 = vsel %vm5659_vm6, %v2724_v14, 0.0  ;;  %2958 = vst.msk [vmem:[%s5141_s26 + $0x14] sm:$0xf] %vm2952_vm8, %v3175_v59  ;;  %vm5673_vm6 = vmmov %vm5637_vm0 }
 0x1b9   : > { %v2662_v22 = vadd.f32 %v2661_v7, %v2660_v43  ;;  %v2761_v63 = vadd.f32 %v2760_v31, %v2759_v18  ;;  %vm5675_vm15 = vmmov %vm5637_vm0 }
 0x1ba   : > { %vm5676_vm1 = vmmov %vm5637_vm0 }
 0x1bb   : > { %v2763_v21 = vadd.f32 %v2762_v36, %v2761_v63  ;;  %v2664_v38 = vadd.f32 %v2663_v17, %v2662_v22 }
 0x1bd   : > { %v2765_v58 = vadd.f32 %v2764_v4, %v2763_v21 }
 0x1ce   : > { %v3316_v41 = vpop.f32.mrb[8].mxu0 }
 0x1cf   : > { %v3180_v39 = vpack.c.bf16 %v3316_v41, %v3316_v41  ;;  %v2555_v2 = vpop.f32.mrb[9].mxu0  ;;  %v2729_v45 = vmul.f32 %v3316_v41, %v3316_v41  ;;  %v2669_v16 = vsel %vm5665_vm7, %v3316_v41, 0.0  ;;  %vm5679_vm7 = vmmov %vm5637_vm0 }
 0x1d0   : > { %v2665_v60 = vsel %vm5663_vm5, %v2555_v2, 0.0  ;;  %v2727_v28 = vmul.f32 %v2555_v2, %v2555_v2  ;;  %v3178_v53 = vpack.c.bf16 %v2555_v2, %v2555_v2  ;;  %v3317_v32 = vpop.f32.mrb[10].mxu0  ;;  %vm5677_vm5 = vmmov %vm5637_vm0 }
 0x1d1   : > { %2963 = vst.msk [vmem:[%s5141_s26 + $0x28] sm:$0xf] %vm2952_vm8, %v3180_v39  ;;  %v2666_v37 = vadd.f32 %v2665_v60, %v2664_v38  ;;  %v2558_v19 = vpop.f32.mrb[11].mxu0  ;;  %v3181_v23 = vpack.c.bf16 %v3317_v32, %v3317_v32  ;;  %v2730_v10 = vmul.f32 %v3317_v32, %v3317_v32  ;;  %v2770_v46 = vsel %vm5667_vm12, %v2729_v45, 0.0  ;;  %vm5681_vm12 = vmmov %vm5637_vm0 }
 0x1d2   : > { %v2766_v24 = vsel %vm5664_vm13, %v2727_v28, 0.0  ;;  %2961 = vst.msk [vmem:[%s5141_s26 + $0x20] sm:$0xf] %vm2952_vm8, %v3178_v53  ;;  %v2667_v55 = vsel %vm5637_vm0, %v2558_v19, 0.0  ;;  %v2728_v29 = vmul.f32 %v2558_v19, %v2558_v19  ;;  %v3179_v8 = vpack.c.bf16 %v2558_v19, %v2558_v19  ;;  %vm5678_vm13 = vmmov %vm5637_vm0 }
 0x1d3   : > { %v2767_v42 = vadd.f32 %v2766_v24, %v2765_v58  ;;  %v2668_v3 = vadd.f32 %v2667_v55, %v2666_v37  ;;  %2964 = vst.msk [vmem:[%s5141_s26 + $0x2c] sm:$0xf] %vm2952_vm8, %v3181_v23  ;;  %v2671_v49 = vsel %vm5668_vm4, %v3317_v32, 0.0  ;;  %v2772_v11 = vsel %vm5669_vm3, %v2730_v10, 0.0  ;;  %vm5682_vm4 = vmmov %vm5637_vm0 }
 0x1d4   : > { %v2768_v1 = vsel %vm5666_vm10, %v2728_v29, 0.0  ;;  %2962 = vst.msk [vmem:[%s5141_s26 + $0x24] sm:$0xf] %vm2952_vm8, %v3179_v8  ;;  %vm5680_vm10 = vmmov %vm5637_vm0 }
 0x1d5   : > { %v2670_v44 = vadd.f32 %v2669_v16, %v2668_v3  ;;  %v2769_v30 = vadd.f32 %v2768_v1, %v2767_v42  ;;  %vm5683_vm3 = vmmov %vm5637_vm0 }
 0x1d7   : > { %v2771_v20 = vadd.f32 %v2770_v46, %v2769_v30  ;;  %v2672_v61 = vadd.f32 %v2671_v49, %v2670_v44 }
 0x1d9   : > { %v2773_v0 = vadd.f32 %v2772_v11, %v2771_v20 }
 0x1ee   : > { %v3320_v25 = vpop.f32.mrb[12].mxu0 }
 0x1ef   : > { %v3184_v51 = vpack.c.bf16 %v3320_v25, %v3320_v25  ;;  %v2571_v27 = vpop.f32.mrb[13].mxu0  ;;  %v2733_v6 = vmul.f32 %v3320_v25, %v3320_v25  ;;  %v2677_v26 = vsel %vm5673_vm6, %v3320_v25, 0.0  ;;  %vm5687_vm6 = vmmov %vm5637_vm0 }
 0x1f0   : > { %v2673_v62 = vsel %vm5670_vm14, %v2571_v27, 0.0  ;;  %v2731_v40 = vmul.f32 %v2571_v27, %v2571_v27  ;;  %v3182_v35 = vpack.c.bf16 %v2571_v27, %v2571_v27  ;;  %v3321_v56 = vpop.f32.mrb[14].mxu0  ;;  %vm5684_vm14 = vmmov %vm5637_vm0 }
 0x1f1   : > { %2967 = vst.msk [vmem:[%s5141_s26 + $0x38] sm:$0xf] %vm2952_vm8, %v3184_v51  ;;  %v2674_v50 = vadd.f32 %v2673_v62, %v2672_v61  ;;  %v2574_v57 = vpop.f32.mrb[15].mxu0  ;;  %v3185_v52 = vpack.c.bf16 %v3321_v56, %v3321_v56  ;;  %v2734_v12 = vmul.f32 %v3321_v56, %v3321_v56  ;;  %v2778_v18 = vsel %vm5675_vm15, %v2733_v6, 0.0  ;;  %vm5689_vm15 = vmmov %vm5637_vm0 }
 0x1f2   : > { %v2774_v54 = vsel %vm5671_vm9, %v2731_v40, 0.0  ;;  %2965 = vst.msk [vmem:[%s5141_s26 + $0x30] sm:$0xf] %vm2952_vm8, %v3182_v35  ;;  %v2675_v5 = vsel %vm5672_vm2, %v2574_v57, 0.0  ;;  %v2732_v48 = vmul.f32 %v2574_v57, %v2574_v57  ;;  %v3183_v33 = vpack.c.bf16 %v2574_v57, %v2574_v57  ;;  %vm5685_vm9 = vmmov %vm5637_vm0 }
 0x1f3   : > { %v2775_v15 = vadd.f32 %v2774_v54, %v2773_v0  ;;  %v2676_v47 = vadd.f32 %v2675_v5, %v2674_v50  ;;  %2968 = vst.msk [vmem:[%s5141_s26 + $0x3c] sm:$0xf] %vm2952_vm8, %v3185_v52  ;;  %v2679_v43 = vsel %vm5676_vm1, %v3321_v56, 0.0  ;;  %v2780_v13 = vsel %vm5677_vm5, %v2734_v12, 0.0  ;;  %vm5686_vm2 = vmmov %vm5637_vm0 }
 0x1f4   : > { %v2776_v9 = vsel %vm5674_vm11, %v2732_v48, 0.0  ;;  %2966 = vst.msk [vmem:[%s5141_s26 + $0x34] sm:$0xf] %vm2952_vm8, %v3183_v33  ;;  %vm5688_vm11 = vmmov %vm5637_vm0 }
 0x1f5   : > { %v2678_v34 = vadd.f32 %v2677_v26, %v2676_v47  ;;  %v2777_v14 = vadd.f32 %v2776_v9, %v2775_v15  ;;  %vm5690_vm1 = vmmov %vm5637_vm0 }
 0x1f6   : > { %vm5691_vm5 = vmmov %vm5637_vm0 }
 0x1f7   : > { %v2779_v59 = vadd.f32 %v2778_v18, %v2777_v14  ;;  %v2680_v7 = vadd.f32 %v2679_v43, %v2678_v34 }
 0x1f9   : > { %v2781_v31 = vadd.f32 %v2780_v13, %v2779_v59 }
 0x20f   : > { %v3324_v22 = vpop.f32.mrb[0].mxu1 }
 0x210   : > { %v3188_v63 = vpack.c.bf16 %v3324_v22, %v3324_v22  ;;  %v2587_v36 = vpop.f32.mrb[1].mxu1  ;;  %v2737_v58 = vmul.f32 %v3324_v22, %v3324_v22  ;;  %v2685_v19 = vsel %vm5680_vm10, %v3324_v22, 0.0  ;;  %vm5694_vm10 = vmmov %vm5637_vm0 }
 0x211   : > { %v2681_v17 = vsel %vm5678_vm13, %v2587_v36, 0.0  ;;  %v2735_v21 = vmul.f32 %v2587_v36, %v2587_v36  ;;  %v3186_v38 = vpack.c.bf16 %v2587_v36, %v2587_v36  ;;  %v3325_v4 = vpop.f32.mrb[2].mxu1  ;;  %vm5692_vm13 = vmmov %vm5637_vm0 }
 0x212   : > { %2971 = vst.msk [vmem:[%s5141_s26 + $0x48] sm:$0xf] %vm2952_vm8, %v3188_v63  ;;  %v2682_v41 = vadd.f32 %v2681_v17, %v2680_v7  ;;  %v2590_v39 = vpop.f32.mrb[3].mxu1  ;;  %v3189_v60 = vpack.c.bf16 %v3325_v4, %v3325_v4  ;;  %v2738_v24 = vmul.f32 %v3325_v4, %v3325_v4  ;;  %v2786_v42 = vsel %vm5682_vm4, %v2737_v58, 0.0  ;;  %vm5696_vm4 = vmmov %vm5637_vm0 }
 0x213   : > { %v2782_v2 = vsel %vm5637_vm0, %v2735_v21, 0.0  ;;  %2969 = vst.msk [vmem:[%s5141_s26 + $0x40] sm:$0xf] %vm2952_vm8, %v3186_v38  ;;  %v2683_v28 = vsel %vm5679_vm7, %v2590_v39, 0.0  ;;  %v2736_v53 = vmul.f32 %v2590_v39, %v2590_v39  ;;  %v3187_v37 = vpack.c.bf16 %v2590_v39, %v2590_v39  ;;  %vm5693_vm7 = vmmov %vm5637_vm0 }
 0x214   : > { %v2783_v32 = vadd.f32 %v2782_v2, %v2781_v31  ;;  %v2684_v45 = vadd.f32 %v2683_v28, %v2682_v41  ;;  %2972 = vst.msk [vmem:[%s5141_s26 + $0x4c] sm:$0xf] %vm2952_vm8, %v3189_v60  ;;  %v2687_v3 = vsel %vm5683_vm3, %v3325_v4, 0.0  ;;  %v2788_v10 = vsel %vm5684_vm14, %v2738_v24, 0.0  ;;  %vm5697_vm3 = vmmov %vm5637_vm0 }
 0x215   : > { %v2784_v23 = vsel %vm5681_vm12, %v2736_v53, 0.0  ;;  %2970 = vst.msk [vmem:[%s5141_s26 + $0x44] sm:$0xf] %vm2952_vm8, %v3187_v37  ;;  %vm5695_vm12 = vmmov %vm5637_vm0 }
 0x216   : > { %v2686_v55 = vadd.f32 %v2685_v19, %v2684_v45  ;;  %v2785_v29 = vadd.f32 %v2784_v23, %v2783_v32  ;;  %vm5698_vm14 = vmmov %vm5637_vm0 }
 0x218   : > { %v2787_v8 = vadd.f32 %v2786_v42, %v2785_v29  ;;  %v2688_v16 = vadd.f32 %v2687_v3, %v2686_v55 }
 0x21a   : > { %v2789_v1 = vadd.f32 %v2788_v10, %v2787_v8 }
 0x22f   : > { %v3328_v44 = vpop.f32.mrb[4].mxu1 }
 0x230   : > { %v3192_v30 = vpack.c.bf16 %v3328_v44, %v3328_v44  ;;  %v2603_v46 = vpop.f32.mrb[5].mxu1  ;;  %v2741_v0 = vmul.f32 %v3328_v44, %v3328_v44  ;;  %v2693_v57 = vsel %vm5688_vm11, %v3328_v44, 0.0  ;;  %vm5702_vm11 = vmmov %vm5637_vm0 }
 0x231   : > { %v2689_v49 = vsel %vm5685_vm9, %v2603_v46, 0.0  ;;  %v2739_v20 = vmul.f32 %v2603_v46, %v2603_v46  ;;  %v3190_v61 = vpack.c.bf16 %v2603_v46, %v2603_v46  ;;  %v3329_v11 = vpop.f32.mrb[6].mxu1  ;;  %vm5699_vm9 = vmmov %vm5637_vm0 }
 0x232   : > { %2975 = vst.msk [vmem:[%s5141_s26 + $0x58] sm:$0xf] %vm2952_vm8, %v3192_v30  ;;  %v2690_v25 = vadd.f32 %v2689_v49, %v2688_v16  ;;  %v2606_v51 = vpop.f32.mrb[7].mxu1  ;;  %v3193_v62 = vpack.c.bf16 %v3329_v11, %v3329_v11  ;;  %v2742_v54 = vmul.f32 %v3329_v11, %v3329_v11  ;;  %v2794_v15 = vsel %vm5690_vm1, %v2741_v0, 0.0  ;;  %vm5704_vm1 = vmmov %vm5637_vm0 }
 0x233   : > { %v2790_v27 = vsel %vm5686_vm2, %v2739_v20, 0.0  ;;  %2973 = vst.msk [vmem:[%s5141_s26 + $0x50] sm:$0xf] %vm2952_vm8, %v3190_v61  ;;  %v2691_v40 = vsel %vm5687_vm6, %v2606_v51, 0.0  ;;  %v2740_v35 = vmul.f32 %v2606_v51, %v2606_v51  ;;  %v3191_v50 = vpack.c.bf16 %v2606_v51, %v2606_v51  ;;  %vm5700_vm2 = vmmov %vm5637_vm0 }
 0x234   : > { %v2791_v56 = vadd.f32 %v2790_v27, %v2789_v1  ;;  %v2692_v6 = vadd.f32 %v2691_v40, %v2690_v25  ;;  %2976 = vst.msk [vmem:[%s5141_s26 + $0x5c] sm:$0xf] %vm2952_vm8, %v3193_v62  ;;  %v2695_v47 = vsel %vm5691_vm5, %v3329_v11, 0.0  ;;  %v2796_v12 = vsel %vm5692_vm13, %v2742_v54, 0.0  ;;  %vm5701_vm6 = vmmov %vm5637_vm0 }
 0x235   : > { %v2792_v52 = vsel %vm5689_vm15, %v2740_v35, 0.0  ;;  %2974 = vst.msk [vmem:[%s5141_s26 + $0x54] sm:$0xf] %vm2952_vm8, %v3191_v50  ;;  %vm5703_vm15 = vmmov %vm5637_vm0 }
 0x236   : > { %v2694_v5 = vadd.f32 %v2693_v57, %v2692_v6  ;;  %v2793_v48 = vadd.f32 %v2792_v52, %v2791_v56  ;;  %vm5705_vm5 = vmmov %vm5637_vm0 }
 0x237   : > { %vm5706_vm13 = vmmov %vm5637_vm0 }
 0x238   : > { %v2795_v33 = vadd.f32 %v2794_v15, %v2793_v48  ;;  %v2696_v26 = vadd.f32 %v2695_v47, %v2694_v5 }
 0x23a   : > { %v2797_v9 = vadd.f32 %v2796_v12, %v2795_v33 }
 0x24f   : > { %v3332_v34 = vpop.f32.mrb[8].mxu1 }
 0x250   : > { %v3196_v14 = vpack.c.bf16 %v3332_v34, %v3332_v34  ;;  %v2619_v18 = vpop.f32.mrb[9].mxu1  ;;  %v2745_v31 = vmul.f32 %v3332_v34, %v3332_v34  ;;  %v2701_v39 = vsel %vm5695_vm12, %v3332_v34, 0.0 }
 0x251   : > { %v2697_v43 = vsel %vm5637_vm0, %v2619_v18, 0.0  ;;  %v2743_v59 = vmul.f32 %v2619_v18, %v2619_v18  ;;  %v3194_v7 = vpack.c.bf16 %v2619_v18, %v2619_v18  ;;  %v3333_v13 = vpop.f32.mrb[10].mxu1 }
 0x252   : > { %2979 = vst.msk [vmem:[%s5141_s26 + $0x68] sm:$0xf] %vm2952_vm8, %v3196_v14  ;;  %v2698_v22 = vadd.f32 %v2697_v43, %v2696_v26  ;;  %v2622_v63 = vpop.f32.mrb[11].mxu1  ;;  %v3197_v17 = vpack.c.bf16 %v3333_v13, %v3333_v13  ;;  %v2746_v2 = vmul.f32 %v3333_v13, %v3333_v13  ;;  %v2802_v32 = vsel %vm5697_vm3, %v2745_v31, 0.0 }
 0x253   : > { %v2798_v36 = vsel %vm5693_vm7, %v2743_v59, 0.0  ;;  %2977 = vst.msk [vmem:[%s5141_s26 + $0x60] sm:$0xf] %vm2952_vm8, %v3194_v7  ;;  %v2699_v21 = vsel %vm5694_vm10, %v2622_v63, 0.0  ;;  %v2744_v38 = vmul.f32 %v2622_v63, %v2622_v63  ;;  %v3195_v41 = vpack.c.bf16 %v2622_v63, %v2622_v63 }
 0x254   : > { %v2799_v4 = vadd.f32 %v2798_v36, %v2797_v9  ;;  %v2700_v58 = vadd.f32 %v2699_v21, %v2698_v22  ;;  %2980 = vst.msk [vmem:[%s5141_s26 + $0x6c] sm:$0xf] %vm2952_vm8, %v3197_v17  ;;  %v2703_v45 = vsel %vm5698_vm14, %v3333_v13, 0.0  ;;  %v2804_v24 = vsel %vm5699_vm9, %v2746_v2, 0.0 }
 0x255   : > { %v2800_v60 = vsel %vm5696_vm4, %v2744_v38, 0.0  ;;  %2978 = vst.msk [vmem:[%s5141_s26 + $0x64] sm:$0xf] %vm2952_vm8, %v3195_v41  ;;  %vm5707_vm7 = vcmask 1040384  }
 0x256   : > { %v2702_v28 = vadd.f32 %v2701_v39, %v2700_v58  ;;  %v2801_v53 = vadd.f32 %v2800_v60, %v2799_v4 }
 0x258   : > { %v2803_v37 = vadd.f32 %v2802_v32, %v2801_v53  ;;  %v2704_v19 = vadd.f32 %v2703_v45, %v2702_v28 }
 0x25a   : > { %v2805_v23 = vadd.f32 %v2804_v24, %v2803_v37 }
 0x271   : > { %v3336_v55 = vpop.f32.mrb[12].mxu1 }
 0x272   : > { %v3200_v29 = vpack.c.bf16 %v3336_v55, %v3336_v55  ;;  %v2635_v42 = vpop.f32.mrb[13].mxu1  ;;  %v2749_v1 = vmul.f32 %v3336_v55, %v3336_v55  ;;  %v2709_v51 = vsel %vm5703_vm15, %v3336_v55, 0.0 }
 0x273   : > { %v2705_v3 = vsel %vm5700_vm2, %v2635_v42, 0.0  ;;  %v2747_v8 = vmul.f32 %v2635_v42, %v2635_v42  ;;  %v3198_v16 = vpack.c.bf16 %v2635_v42, %v2635_v42  ;;  %v3337_v10 = vpop.f32.mrb[14].mxu1 }
 0x274   : > { %2983 = vst.msk [vmem:[%s5141_s26 + $0x78] sm:$0xf] %vm2952_vm8, %v3200_v29  ;;  %v2706_v44 = vadd.f32 %v2705_v3, %v2704_v19  ;;  %v2638_v30 = vpop.f32.mrb[15].mxu1  ;;  %v3201_v49 = vpack.c.bf16 %v3337_v10, %v3337_v10  ;;  %v2750_v27 = vmul.f32 %v3337_v10, %v3337_v10  ;;  %v2810_v56 = vsel %vm5705_vm5, %v2749_v1, 0.0 }
 0x275   : > { %v2806_v46 = vsel %vm5701_vm6, %v2747_v8, 0.0  ;;  %2981 = vst.msk [vmem:[%s5141_s26 + $0x70] sm:$0xf] %vm2952_vm8, %v3198_v16  ;;  %v2707_v20 = vsel %vm5702_vm11, %v2638_v30, 0.0  ;;  %v2748_v61 = vmul.f32 %v2638_v30, %v2638_v30  ;;  %v3199_v25 = vpack.c.bf16 %v2638_v30, %v2638_v30 }
 0x276   : > { %v2807_v11 = vadd.f32 %v2806_v46, %v2805_v23  ;;  %v2708_v0 = vadd.f32 %v2707_v20, %v2706_v44  ;;  %2984 = vst.msk [vmem:[%s5141_s26 + $0x7c] sm:$0xf] %vm2952_vm8, %v3201_v49  ;;  %v2711_v6 = vsel %vm5706_vm13, %v3337_v10, 0.0  ;;  %v2812_v54 = vsel %vm5637_vm0, %v2750_v27, 0.0 }
 0x277   : > { %v2808_v62 = vsel %vm5704_vm1, %v2748_v61, 0.0  ;;  %2982 = vst.msk [vmem:[%s5141_s26 + $0x74] sm:$0xf] %vm2952_vm8, %v3199_v25  ;;  %vm2822_vm8 = vcmask 25600  }
 0x278   : > { %v2710_v40 = vadd.f32 %v2709_v51, %v2708_v0  ;;  %v2809_v35 = vadd.f32 %v2808_v62, %v2807_v11 }
 0x27a   : > { %v2712_v50 = vadd.f32 %v2711_v6, %v2710_v40  ;;  %v2811_v57 = vadd.f32 %v2810_v56, %v2809_v35 }
 0x27c   : > { %v2713_v52 = vrot.slane %v2712_v50, 4  ;;  %v2813_v5 = vadd.f32 %v2812_v54, %v2811_v57 }
 0x27e   : > { %v2714_v48 = vadd.f32 %v2713_v52, %v2712_v50  ;;  %v2814_v15 = vrot.slane %v2813_v5, 4 }
 0x280   : > { %v2715_v47 = vrot.slane %v2714_v48, 2  ;;  %v2815_v33 = vadd.f32 %v2814_v15, %v2813_v5 }
 0x282   : > { %v2716_v26 = vadd.f32 %v2715_v47, %v2714_v48  ;;  %v2816_v12 = vrot.slane %v2815_v33, 2 }
 0x284   : > { %v2717_v9 = vrot.slane %v2716_v26, 1  ;;  %v2817_v34 = vadd.f32 %v2816_v12, %v2815_v33 }
 0x286   : > { %v2818_v14 = vrot.slane %v2817_v34, 1  ;;  %v2718_v18 = vadd.f32 %v2717_v9, %v2716_v26 }
 0x288   : > { %v2819_v43 = vadd.f32 %v2818_v14, %v2817_v34 }
 0x28a   : > { %v2821_v59 = vsel %vm5707_vm7, %v2718_v18, %v2819_v43 }
 0x28b   : > { %2823 = vst.msk [vmem:[%s235_s29] sm:$0x3] %vm2822_vm8, %v2821_v59 }
 0x28c PF: > { %s16_s18 = sadd.s32 1, %s3375_s18  }
 0x28d   : > { %p13_p4 = scmp.ge.s32.totalorder %s16_s18, 4  }
 0x28f   :  { %15 = sbr.rel (!%p13_p4) target bundleno = 1 (0x1), region = 78 }

</bundles_post_ra>
